<compile_context>
chip_gen: v7x
topology: tpu7x:2x2x1
jax: 0.10.0
libtpu: 0.0.40
codegen_flags: <defaults>
</compile_context>

<pallas_src>
import jax
import jax.numpy as jnp
from jax.experimental import pallas as pl
from jax.experimental.pallas import tpu as pltpu

H, W = 16, 16            # input spatial size
K = 3                    # conv kernel size
C1 = 4                   # hidden channels
H1, W1 = H - K + 1, W - K + 1        # 14, 14 (after conv1)
H2, W2 = H1 - K + 1, W1 - K + 1      # 12, 12 (after conv2)

TB = 128                 # images per block, packed on the lane axis
RH = 6                   # conv2 output rows per grid step (H2 // 2)
RH1 = RH + K - 1         # conv1 rows needed per step: 8
RHX = RH1 + K - 1        # input rows needed per step: 10
assert H2 % RH == 0 and RHX <= H


def conv_relu_conv_sigmoid_kernel(w1_ref, b1_ref, w2_ref, b2_ref, x_ref, o_ref):
    # w1_ref: (C1*K*K,) SMEM   conv1 weights [cout, cin=1, kh, kw] flattened
    # b1_ref: (C1,)     SMEM
    # w2_ref: (C1*K*K,) SMEM   conv2 weights [cout=1, cin, kh, kw] flattened
    # b2_ref: (1,)      SMEM
    # x_ref : (H, W, TB)   VMEM block (batch on lanes), full image
    # o_ref : (RH, W2, TB) VMEM block (one row-half of the output)
    tb = x_ref.shape[-1]
    r0 = pl.program_id(1) * RH            # first input / conv1 row of this half

    # Read all 2*36 weights + biases from SMEM once.
    w1 = [w1_ref[i] for i in range(C1 * K * K)]
    b1 = [b1_ref[c] for c in range(C1)]
    w2 = [w2_ref[i] for i in range(C1 * K * K)]
    b2 = b2_ref[0]

    # conv2 accumulator for this row-half (6 x 12 x 128 f32 = 12 vregs).
    acc2 = jnp.full((RH, W2, tb), b2, jnp.float32)

    for c in range(C1):
        # conv1 for channel c on the 8 rows this half needs (16 vregs).
        acc = jnp.full((RH1, W1, tb), b1[c], jnp.float32)
        for dh in range(K):
            for dw in range(K):
                # Per-tap slice straight from the VMEM ref (not a resident copy)
                # keeps only one tap slab live at a time.
                tap = x_ref[pl.ds(r0 + dh, RH1), pl.ds(dw, W1), :]
                acc = acc + tap * w1[c * K * K + dh * K + dw]
        y = jnp.maximum(acc, 0.0)         # ReLU

        # Immediately fold this channel into the conv2 accumulator and drop y,
        # so only one hidden channel is ever live.
        for dh in range(K):
            for dw in range(K):
                acc2 = acc2 + y[dh:dh + RH, dw:dw + W2, :] * w2[c * K * K + dh * K + dw]

    # Sigmoid: exp on EUP, approximate reciprocal on EUP, one Newton step on
    # the VPU to restore ~f32 accuracy (cheaper than an exact divide).
    d = 1.0 + jnp.exp(-acc2)
    r = pl.reciprocal(d, approx=True)
    r = r * (2.0 - d * r)
    o_ref[...] = r


def model_forward(x_nchw, w1, b1, w2, b2):
    """x_nchw: (N, 1, H, W) f32 -> (N, 1, H2, W2) f32 (matches the PyTorch module)."""
    N = x_nchw.shape[0]
    G = (N + TB - 1) // TB
    N_pad = G * TB

    x = x_nchw[:, 0]                                   # (N, H, W), squeeze C_in=1
    if N_pad != N:
        x = jnp.pad(x, ((0, N_pad - N), (0, 0), (0, 0)))
    # (N_pad, H, W) -> (G, TB, H, W) -> (G, H, W, TB): one contiguous slab per step.
    x_packed = jnp.transpose(x.reshape(G, TB, H, W), (0, 2, 3, 1))

    w1_flat = w1.reshape(-1)                           # (C1*K*K,)
    w2_flat = w2.reshape(-1)                           # (C1*K*K,)

    out_packed = pl.pallas_call(
        conv_relu_conv_sigmoid_kernel,
        out_shape=jax.ShapeDtypeStruct((G, H2, W2, TB), jnp.float32),
        grid=(G, H2 // RH),                            # (batch blocks, row halves)
        in_specs=[
            pl.BlockSpec(memory_space=pltpu.MemorySpace.SMEM),   # w1 (flattened)
            pl.BlockSpec(memory_space=pltpu.MemorySpace.SMEM),   # b1
            pl.BlockSpec(memory_space=pltpu.MemorySpace.SMEM),   # w2 (flattened)
            pl.BlockSpec(memory_space=pltpu.MemorySpace.SMEM),   # b2
            # Full image block; same block for both row halves (re-used by the pipeline).
            pl.BlockSpec((None, H, W, TB), lambda g, r: (g, 0, 0, 0)),
        ],
        out_specs=pl.BlockSpec((None, RH, W2, TB), lambda g, r: (g, r, 0, 0)),
        compiler_params=pltpu.CompilerParams(
            dimension_semantics=("parallel", "parallel")),
    )(w1_flat, b1, w2_flat, b2, x_packed)

    out = jnp.transpose(out_packed, (0, 3, 1, 2)).reshape(N_pad, H2, W2)[:N]
    return out[:, None, :, :]                          # (N, 1, H2, W2)


def ref_forward(x, w1, b1, w2, b2):
    """Pure-JAX reference (NCHW, OIHW) for correctness check."""
    dn = ("NCHW", "OIHW", "NCHW")
    y = jax.lax.conv_general_dilated(x, w1, (1, 1), "VALID", dimension_numbers=dn)
    y = y + b1[None, :, None, None]
    y = jnp.maximum(y, 0.0)
    y = jax.lax.conv_general_dilated(y, w2, (1, 1), "VALID", dimension_numbers=dn)
    y = y + b2[None, :, None, None]
    return jax.nn.sigmoid(y)


if __name__ == "__main__":
    key = jax.random.PRNGKey(0)
    k_x, k_w1, k_b1, k_w2, k_b2 = jax.random.split(key, 5)

    N = 2
    x = jax.random.normal(k_x, (N, 1, H, W), dtype=jnp.float32)

    # Deterministic init mimicking PyTorch Conv2d default (uniform(-1/sqrt(fan_in), ...))
    fan1 = 1 * K * K
    fan2 = C1 * K * K
    w1 = jax.random.uniform(k_w1, (C1, 1, K, K), jnp.float32,
                            -1.0 / jnp.sqrt(fan1), 1.0 / jnp.sqrt(fan1))
    b1 = jax.random.uniform(k_b1, (C1,), jnp.float32,
                            -1.0 / jnp.sqrt(fan1), 1.0 / jnp.sqrt(fan1))
    w2 = jax.random.uniform(k_w2, (1, C1, K, K), jnp.float32,
                            -1.0 / jnp.sqrt(fan2), 1.0 / jnp.sqrt(fan2))
    b2 = jax.random.uniform(k_b2, (1,), jnp.float32,
                            -1.0 / jnp.sqrt(fan2), 1.0 / jnp.sqrt(fan2))

    out = jax.block_until_ready(model_forward(x, w1, b1, w2, b2))
    ref = jax.block_until_ready(ref_forward(x, w1, b1, w2, b2))

    assert out.shape == (N, 1, H2, W2), out.shape
    assert jnp.allclose(out, ref, atol=1e-5, rtol=1e-5), "mismatch vs JAX reference"

    print("KERNEL_OK")
</pallas_src>

<mosaic_0001>
module attributes {stable_mosaic.version = 11 : i64} {
  func.func @conv_relu_conv_sigmoid_kernel(%arg0: i32, %arg1: i32, %arg2: memref<36xf32, #tpu.memory_space<smem>>, %arg3: memref<4xf32, #tpu.memory_space<smem>>, %arg4: memref<36xf32, #tpu.memory_space<smem>>, %arg5: memref<1xf32, #tpu.memory_space<smem>>, %arg6: memref<1x16x16x128xf32, #tpu.memory_space<vmem>>, %arg7: memref<1x6x12x128xf32, #tpu.memory_space<vmem>>) attributes {dimension_semantics = [#tpu.dimension_semantics<parallel>, #tpu.dimension_semantics<parallel>], iteration_bounds = array<i64: 1, 2>, scalar_prefetch = 0 : i64, scratch_operands = 0 : i64, tpu.core_type = #tpu.core_type<tc>, window_params = [{transform_indices = @transform_0, window_bounds = array<i64: 36>}, {transform_indices = @transform_1, window_bounds = array<i64: 4>}, {transform_indices = @transform_2, window_bounds = array<i64: 36>}, {transform_indices = @transform_3, window_bounds = array<i64: 1>}, {transform_indices = @transform_4, window_bounds = array<i64: 1, 16, 16, 128>}, {transform_indices = @transform_5, window_bounds = array<i64: 1, 6, 12, 128>}]} {
    %c6_i32 = arith.constant 6 : i32
    %0 = arith.muli %arg1, %c6_i32 : i32
    %c0 = arith.constant 0 : index
    %1 = memref.load %arg2[%c0] : memref<36xf32, #tpu.memory_space<smem>>
    %c1 = arith.constant 1 : index
    %2 = memref.load %arg2[%c1] : memref<36xf32, #tpu.memory_space<smem>>
    %c2 = arith.constant 2 : index
    %3 = memref.load %arg2[%c2] : memref<36xf32, #tpu.memory_space<smem>>
    %c3 = arith.constant 3 : index
    %4 = memref.load %arg2[%c3] : memref<36xf32, #tpu.memory_space<smem>>
    %c4 = arith.constant 4 : index
    %5 = memref.load %arg2[%c4] : memref<36xf32, #tpu.memory_space<smem>>
    %c5 = arith.constant 5 : index
    %6 = memref.load %arg2[%c5] : memref<36xf32, #tpu.memory_space<smem>>
    %c6 = arith.constant 6 : index
    %7 = memref.load %arg2[%c6] : memref<36xf32, #tpu.memory_space<smem>>
    %c7 = arith.constant 7 : index
    %8 = memref.load %arg2[%c7] : memref<36xf32, #tpu.memory_space<smem>>
    %c8 = arith.constant 8 : index
    %9 = memref.load %arg2[%c8] : memref<36xf32, #tpu.memory_space<smem>>
    %c9 = arith.constant 9 : index
    %10 = memref.load %arg2[%c9] : memref<36xf32, #tpu.memory_space<smem>>
    %c10 = arith.constant 10 : index
    %11 = memref.load %arg2[%c10] : memref<36xf32, #tpu.memory_space<smem>>
    %c11 = arith.constant 11 : index
    %12 = memref.load %arg2[%c11] : memref<36xf32, #tpu.memory_space<smem>>
    %c12 = arith.constant 12 : index
    %13 = memref.load %arg2[%c12] : memref<36xf32, #tpu.memory_space<smem>>
    %c13 = arith.constant 13 : index
    %14 = memref.load %arg2[%c13] : memref<36xf32, #tpu.memory_space<smem>>
    %c14 = arith.constant 14 : index
    %15 = memref.load %arg2[%c14] : memref<36xf32, #tpu.memory_space<smem>>
    %c15 = arith.constant 15 : index
    %16 = memref.load %arg2[%c15] : memref<36xf32, #tpu.memory_space<smem>>
    %c16 = arith.constant 16 : index
    %17 = memref.load %arg2[%c16] : memref<36xf32, #tpu.memory_space<smem>>
    %c17 = arith.constant 17 : index
    %18 = memref.load %arg2[%c17] : memref<36xf32, #tpu.memory_space<smem>>
    %c18 = arith.constant 18 : index
    %19 = memref.load %arg2[%c18] : memref<36xf32, #tpu.memory_space<smem>>
    %c19 = arith.constant 19 : index
    %20 = memref.load %arg2[%c19] : memref<36xf32, #tpu.memory_space<smem>>
    %c20 = arith.constant 20 : index
    %21 = memref.load %arg2[%c20] : memref<36xf32, #tpu.memory_space<smem>>
    %c21 = arith.constant 21 : index
    %22 = memref.load %arg2[%c21] : memref<36xf32, #tpu.memory_space<smem>>
    %c22 = arith.constant 22 : index
    %23 = memref.load %arg2[%c22] : memref<36xf32, #tpu.memory_space<smem>>
    %c23 = arith.constant 23 : index
    %24 = memref.load %arg2[%c23] : memref<36xf32, #tpu.memory_space<smem>>
    %c24 = arith.constant 24 : index
    %25 = memref.load %arg2[%c24] : memref<36xf32, #tpu.memory_space<smem>>
    %c25 = arith.constant 25 : index
    %26 = memref.load %arg2[%c25] : memref<36xf32, #tpu.memory_space<smem>>
    %c26 = arith.constant 26 : index
    %27 = memref.load %arg2[%c26] : memref<36xf32, #tpu.memory_space<smem>>
    %c27 = arith.constant 27 : index
    %28 = memref.load %arg2[%c27] : memref<36xf32, #tpu.memory_space<smem>>
    %c28 = arith.constant 28 : index
    %29 = memref.load %arg2[%c28] : memref<36xf32, #tpu.memory_space<smem>>
    %c29 = arith.constant 29 : index
    %30 = memref.load %arg2[%c29] : memref<36xf32, #tpu.memory_space<smem>>
    %c30 = arith.constant 30 : index
    %31 = memref.load %arg2[%c30] : memref<36xf32, #tpu.memory_space<smem>>
    %c31 = arith.constant 31 : index
    %32 = memref.load %arg2[%c31] : memref<36xf32, #tpu.memory_space<smem>>
    %c32 = arith.constant 32 : index
    %33 = memref.load %arg2[%c32] : memref<36xf32, #tpu.memory_space<smem>>
    %c33 = arith.constant 33 : index
    %34 = memref.load %arg2[%c33] : memref<36xf32, #tpu.memory_space<smem>>
    %c34 = arith.constant 34 : index
    %35 = memref.load %arg2[%c34] : memref<36xf32, #tpu.memory_space<smem>>
    %c35 = arith.constant 35 : index
    %36 = memref.load %arg2[%c35] : memref<36xf32, #tpu.memory_space<smem>>
    %c0_0 = arith.constant 0 : index
    %37 = memref.load %arg3[%c0_0] : memref<4xf32, #tpu.memory_space<smem>>
    %c1_1 = arith.constant 1 : index
    %38 = memref.load %arg3[%c1_1] : memref<4xf32, #tpu.memory_space<smem>>
    %c2_2 = arith.constant 2 : index
    %39 = memref.load %arg3[%c2_2] : memref<4xf32, #tpu.memory_space<smem>>
    %c3_3 = arith.constant 3 : index
    %40 = memref.load %arg3[%c3_3] : memref<4xf32, #tpu.memory_space<smem>>
    %c0_4 = arith.constant 0 : index
    %41 = memref.load %arg4[%c0_4] : memref<36xf32, #tpu.memory_space<smem>>
    %c1_5 = arith.constant 1 : index
    %42 = memref.load %arg4[%c1_5] : memref<36xf32, #tpu.memory_space<smem>>
    %c2_6 = arith.constant 2 : index
    %43 = memref.load %arg4[%c2_6] : memref<36xf32, #tpu.memory_space<smem>>
    %c3_7 = arith.constant 3 : index
    %44 = memref.load %arg4[%c3_7] : memref<36xf32, #tpu.memory_space<smem>>
    %c4_8 = arith.constant 4 : index
    %45 = memref.load %arg4[%c4_8] : memref<36xf32, #tpu.memory_space<smem>>
    %c5_9 = arith.constant 5 : index
    %46 = memref.load %arg4[%c5_9] : memref<36xf32, #tpu.memory_space<smem>>
    %c6_10 = arith.constant 6 : index
    %47 = memref.load %arg4[%c6_10] : memref<36xf32, #tpu.memory_space<smem>>
    %c7_11 = arith.constant 7 : index
    %48 = memref.load %arg4[%c7_11] : memref<36xf32, #tpu.memory_space<smem>>
    %c8_12 = arith.constant 8 : index
    %49 = memref.load %arg4[%c8_12] : memref<36xf32, #tpu.memory_space<smem>>
    %c9_13 = arith.constant 9 : index
    %50 = memref.load %arg4[%c9_13] : memref<36xf32, #tpu.memory_space<smem>>
    %c10_14 = arith.constant 10 : index
    %51 = memref.load %arg4[%c10_14] : memref<36xf32, #tpu.memory_space<smem>>
    %c11_15 = arith.constant 11 : index
    %52 = memref.load %arg4[%c11_15] : memref<36xf32, #tpu.memory_space<smem>>
    %c12_16 = arith.constant 12 : index
    %53 = memref.load %arg4[%c12_16] : memref<36xf32, #tpu.memory_space<smem>>
    %c13_17 = arith.constant 13 : index
    %54 = memref.load %arg4[%c13_17] : memref<36xf32, #tpu.memory_space<smem>>
    %c14_18 = arith.constant 14 : index
    %55 = memref.load %arg4[%c14_18] : memref<36xf32, #tpu.memory_space<smem>>
    %c15_19 = arith.constant 15 : index
    %56 = memref.load %arg4[%c15_19] : memref<36xf32, #tpu.memory_space<smem>>
    %c16_20 = arith.constant 16 : index
    %57 = memref.load %arg4[%c16_20] : memref<36xf32, #tpu.memory_space<smem>>
    %c17_21 = arith.constant 17 : index
    %58 = memref.load %arg4[%c17_21] : memref<36xf32, #tpu.memory_space<smem>>
    %c18_22 = arith.constant 18 : index
    %59 = memref.load %arg4[%c18_22] : memref<36xf32, #tpu.memory_space<smem>>
    %c19_23 = arith.constant 19 : index
    %60 = memref.load %arg4[%c19_23] : memref<36xf32, #tpu.memory_space<smem>>
    %c20_24 = arith.constant 20 : index
    %61 = memref.load %arg4[%c20_24] : memref<36xf32, #tpu.memory_space<smem>>
    %c21_25 = arith.constant 21 : index
    %62 = memref.load %arg4[%c21_25] : memref<36xf32, #tpu.memory_space<smem>>
    %c22_26 = arith.constant 22 : index
    %63 = memref.load %arg4[%c22_26] : memref<36xf32, #tpu.memory_space<smem>>
    %c23_27 = arith.constant 23 : index
    %64 = memref.load %arg4[%c23_27] : memref<36xf32, #tpu.memory_space<smem>>
    %c24_28 = arith.constant 24 : index
    %65 = memref.load %arg4[%c24_28] : memref<36xf32, #tpu.memory_space<smem>>
    %c25_29 = arith.constant 25 : index
    %66 = memref.load %arg4[%c25_29] : memref<36xf32, #tpu.memory_space<smem>>
    %c26_30 = arith.constant 26 : index
    %67 = memref.load %arg4[%c26_30] : memref<36xf32, #tpu.memory_space<smem>>
    %c27_31 = arith.constant 27 : index
    %68 = memref.load %arg4[%c27_31] : memref<36xf32, #tpu.memory_space<smem>>
    %c28_32 = arith.constant 28 : index
    %69 = memref.load %arg4[%c28_32] : memref<36xf32, #tpu.memory_space<smem>>
    %c29_33 = arith.constant 29 : index
    %70 = memref.load %arg4[%c29_33] : memref<36xf32, #tpu.memory_space<smem>>
    %c30_34 = arith.constant 30 : index
    %71 = memref.load %arg4[%c30_34] : memref<36xf32, #tpu.memory_space<smem>>
    %c31_35 = arith.constant 31 : index
    %72 = memref.load %arg4[%c31_35] : memref<36xf32, #tpu.memory_space<smem>>
    %c32_36 = arith.constant 32 : index
    %73 = memref.load %arg4[%c32_36] : memref<36xf32, #tpu.memory_space<smem>>
    %c33_37 = arith.constant 33 : index
    %74 = memref.load %arg4[%c33_37] : memref<36xf32, #tpu.memory_space<smem>>
    %c34_38 = arith.constant 34 : index
    %75 = memref.load %arg4[%c34_38] : memref<36xf32, #tpu.memory_space<smem>>
    %c35_39 = arith.constant 35 : index
    %76 = memref.load %arg4[%c35_39] : memref<36xf32, #tpu.memory_space<smem>>
    %c0_40 = arith.constant 0 : index
    %77 = memref.load %arg5[%c0_40] : memref<1xf32, #tpu.memory_space<smem>>
    %78 = vector.broadcast %77 : f32 to vector<6x12x128xf32>
    %79 = vector.broadcast %37 : f32 to vector<8x14x128xf32>
    %c0_i32 = arith.constant 0 : i32
    %80 = arith.addi %0, %c0_i32 : i32
    %c0_41 = arith.constant 0 : index
    %81 = arith.index_cast %80 : i32 to index
    %c0_42 = arith.constant 0 : index
    %c0_43 = arith.constant 0 : index
    %82 = vector.load %arg6[%c0_41, %81, %c0_42, %c0_43] : memref<1x16x16x128xf32, #tpu.memory_space<vmem>>, vector<1x8x14x128xf32>
    %83 = vector.shape_cast %82 : vector<1x8x14x128xf32> to vector<8x14x128xf32>
    %84 = vector.broadcast %1 : f32 to vector<8x14x128xf32>
    %85 = arith.mulf %83, %84 : vector<8x14x128xf32>
    %86 = arith.addf %79, %85 : vector<8x14x128xf32>
    %c0_i32_44 = arith.constant 0 : i32
    %87 = arith.addi %0, %c0_i32_44 : i32
    %c0_45 = arith.constant 0 : index
    %88 = arith.index_cast %87 : i32 to index
    %c1_46 = arith.constant 1 : index
    %c0_47 = arith.constant 0 : index
    %89 = vector.load %arg6[%c0_45, %88, %c1_46, %c0_47] : memref<1x16x16x128xf32, #tpu.memory_space<vmem>>, vector<1x8x14x128xf32>
    %90 = vector.shape_cast %89 : vector<1x8x14x128xf32> to vector<8x14x128xf32>
    %91 = vector.broadcast %2 : f32 to vector<8x14x128xf32>
    %92 = arith.mulf %90, %91 : vector<8x14x128xf32>
    %93 = arith.addf %86, %92 : vector<8x14x128xf32>
    %c0_i32_48 = arith.constant 0 : i32
    %94 = arith.addi %0, %c0_i32_48 : i32
    %c0_49 = arith.constant 0 : index
    %95 = arith.index_cast %94 : i32 to index
    %c2_50 = arith.constant 2 : index
    %c0_51 = arith.constant 0 : index
    %96 = vector.load %arg6[%c0_49, %95, %c2_50, %c0_51] : memref<1x16x16x128xf32, #tpu.memory_space<vmem>>, vector<1x8x14x128xf32>
    %97 = vector.shape_cast %96 : vector<1x8x14x128xf32> to vector<8x14x128xf32>
    %98 = vector.broadcast %3 : f32 to vector<8x14x128xf32>
    %99 = arith.mulf %97, %98 : vector<8x14x128xf32>
    %100 = arith.addf %93, %99 : vector<8x14x128xf32>
    %c1_i32 = arith.constant 1 : i32
    %101 = arith.addi %0, %c1_i32 : i32
    %c0_52 = arith.constant 0 : index
    %102 = arith.index_cast %101 : i32 to index
    %c0_53 = arith.constant 0 : index
    %c0_54 = arith.constant 0 : index
    %103 = vector.load %arg6[%c0_52, %102, %c0_53, %c0_54] : memref<1x16x16x128xf32, #tpu.memory_space<vmem>>, vector<1x8x14x128xf32>
    %104 = vector.shape_cast %103 : vector<1x8x14x128xf32> to vector<8x14x128xf32>
    %105 = vector.broadcast %4 : f32 to vector<8x14x128xf32>
    %106 = arith.mulf %104, %105 : vector<8x14x128xf32>
    %107 = arith.addf %100, %106 : vector<8x14x128xf32>
    %c1_i32_55 = arith.constant 1 : i32
    %108 = arith.addi %0, %c1_i32_55 : i32
    %c0_56 = arith.constant 0 : index
    %109 = arith.index_cast %108 : i32 to index
    %c1_57 = arith.constant 1 : index
    %c0_58 = arith.constant 0 : index
    %110 = vector.load %arg6[%c0_56, %109, %c1_57, %c0_58] : memref<1x16x16x128xf32, #tpu.memory_space<vmem>>, vector<1x8x14x128xf32>
    %111 = vector.shape_cast %110 : vector<1x8x14x128xf32> to vector<8x14x128xf32>
    %112 = vector.broadcast %5 : f32 to vector<8x14x128xf32>
    %113 = arith.mulf %111, %112 : vector<8x14x128xf32>
    %114 = arith.addf %107, %113 : vector<8x14x128xf32>
    %c1_i32_59 = arith.constant 1 : i32
    %115 = arith.addi %0, %c1_i32_59 : i32
    %c0_60 = arith.constant 0 : index
    %116 = arith.index_cast %115 : i32 to index
    %c2_61 = arith.constant 2 : index
    %c0_62 = arith.constant 0 : index
    %117 = vector.load %arg6[%c0_60, %116, %c2_61, %c0_62] : memref<1x16x16x128xf32, #tpu.memory_space<vmem>>, vector<1x8x14x128xf32>
    %118 = vector.shape_cast %117 : vector<1x8x14x128xf32> to vector<8x14x128xf32>
    %119 = vector.broadcast %6 : f32 to vector<8x14x128xf32>
    %120 = arith.mulf %118, %119 : vector<8x14x128xf32>
    %121 = arith.addf %114, %120 : vector<8x14x128xf32>
    %c2_i32 = arith.constant 2 : i32
    %122 = arith.addi %0, %c2_i32 : i32
    %c0_63 = arith.constant 0 : index
    %123 = arith.index_cast %122 : i32 to index
    %c0_64 = arith.constant 0 : index
    %c0_65 = arith.constant 0 : index
    %124 = vector.load %arg6[%c0_63, %123, %c0_64, %c0_65] : memref<1x16x16x128xf32, #tpu.memory_space<vmem>>, vector<1x8x14x128xf32>
    %125 = vector.shape_cast %124 : vector<1x8x14x128xf32> to vector<8x14x128xf32>
    %126 = vector.broadcast %7 : f32 to vector<8x14x128xf32>
    %127 = arith.mulf %125, %126 : vector<8x14x128xf32>
    %128 = arith.addf %121, %127 : vector<8x14x128xf32>
    %c2_i32_66 = arith.constant 2 : i32
    %129 = arith.addi %0, %c2_i32_66 : i32
    %c0_67 = arith.constant 0 : index
    %130 = arith.index_cast %129 : i32 to index
    %c1_68 = arith.constant 1 : index
    %c0_69 = arith.constant 0 : index
    %131 = vector.load %arg6[%c0_67, %130, %c1_68, %c0_69] : memref<1x16x16x128xf32, #tpu.memory_space<vmem>>, vector<1x8x14x128xf32>
    %132 = vector.shape_cast %131 : vector<1x8x14x128xf32> to vector<8x14x128xf32>
    %133 = vector.broadcast %8 : f32 to vector<8x14x128xf32>
    %134 = arith.mulf %132, %133 : vector<8x14x128xf32>
    %135 = arith.addf %128, %134 : vector<8x14x128xf32>
    %c2_i32_70 = arith.constant 2 : i32
    %136 = arith.addi %0, %c2_i32_70 : i32
    %c0_71 = arith.constant 0 : index
    %137 = arith.index_cast %136 : i32 to index
    %c2_72 = arith.constant 2 : index
    %c0_73 = arith.constant 0 : index
    %138 = vector.load %arg6[%c0_71, %137, %c2_72, %c0_73] : memref<1x16x16x128xf32, #tpu.memory_space<vmem>>, vector<1x8x14x128xf32>
    %139 = vector.shape_cast %138 : vector<1x8x14x128xf32> to vector<8x14x128xf32>
    %140 = vector.broadcast %9 : f32 to vector<8x14x128xf32>
    %141 = arith.mulf %139, %140 : vector<8x14x128xf32>
    %142 = arith.addf %135, %141 : vector<8x14x128xf32>
    %cst = arith.constant 0.000000e+00 : f32
    %143 = vector.broadcast %cst : f32 to vector<8x14x128xf32>
    %144 = arith.maximumf %142, %143 : vector<8x14x128xf32>
    %145 = vector.extract_strided_slice %144 {offsets = [0, 0, 0], sizes = [6, 12, 128], strides = [1, 1, 1]} : vector<8x14x128xf32> to vector<6x12x128xf32>
    %146 = vector.broadcast %41 : f32 to vector<6x12x128xf32>
    %147 = arith.mulf %145, %146 : vector<6x12x128xf32>
    %148 = arith.addf %78, %147 : vector<6x12x128xf32>
    %149 = vector.extract_strided_slice %144 {offsets = [0, 1, 0], sizes = [6, 12, 128], strides = [1, 1, 1]} : vector<8x14x128xf32> to vector<6x12x128xf32>
    %150 = vector.broadcast %42 : f32 to vector<6x12x128xf32>
    %151 = arith.mulf %149, %150 : vector<6x12x128xf32>
    %152 = arith.addf %148, %151 : vector<6x12x128xf32>
    %153 = vector.extract_strided_slice %144 {offsets = [0, 2, 0], sizes = [6, 12, 128], strides = [1, 1, 1]} : vector<8x14x128xf32> to vector<6x12x128xf32>
    %154 = vector.broadcast %43 : f32 to vector<6x12x128xf32>
    %155 = arith.mulf %153, %154 : vector<6x12x128xf32>
    %156 = arith.addf %152, %155 : vector<6x12x128xf32>
    %157 = vector.extract_strided_slice %144 {offsets = [1, 0, 0], sizes = [6, 12, 128], strides = [1, 1, 1]} : vector<8x14x128xf32> to vector<6x12x128xf32>
    %158 = vector.broadcast %44 : f32 to vector<6x12x128xf32>
    %159 = arith.mulf %157, %158 : vector<6x12x128xf32>
    %160 = arith.addf %156, %159 : vector<6x12x128xf32>
    %161 = vector.extract_strided_slice %144 {offsets = [1, 1, 0], sizes = [6, 12, 128], strides = [1, 1, 1]} : vector<8x14x128xf32> to vector<6x12x128xf32>
    %162 = vector.broadcast %45 : f32 to vector<6x12x128xf32>
    %163 = arith.mulf %161, %162 : vector<6x12x128xf32>
    %164 = arith.addf %160, %163 : vector<6x12x128xf32>
    %165 = vector.extract_strided_slice %144 {offsets = [1, 2, 0], sizes = [6, 12, 128], strides = [1, 1, 1]} : vector<8x14x128xf32> to vector<6x12x128xf32>
    %166 = vector.broadcast %46 : f32 to vector<6x12x128xf32>
    %167 = arith.mulf %165, %166 : vector<6x12x128xf32>
    %168 = arith.addf %164, %167 : vector<6x12x128xf32>
    %169 = vector.extract_strided_slice %144 {offsets = [2, 0, 0], sizes = [6, 12, 128], strides = [1, 1, 1]} : vector<8x14x128xf32> to vector<6x12x128xf32>
    %170 = vector.broadcast %47 : f32 to vector<6x12x128xf32>
    %171 = arith.mulf %169, %170 : vector<6x12x128xf32>
    %172 = arith.addf %168, %171 : vector<6x12x128xf32>
    %173 = vector.extract_strided_slice %144 {offsets = [2, 1, 0], sizes = [6, 12, 128], strides = [1, 1, 1]} : vector<8x14x128xf32> to vector<6x12x128xf32>
    %174 = vector.broadcast %48 : f32 to vector<6x12x128xf32>
    %175 = arith.mulf %173, %174 : vector<6x12x128xf32>
    %176 = arith.addf %172, %175 : vector<6x12x128xf32>
    %177 = vector.extract_strided_slice %144 {offsets = [2, 2, 0], sizes = [6, 12, 128], strides = [1, 1, 1]} : vector<8x14x128xf32> to vector<6x12x128xf32>
    %178 = vector.broadcast %49 : f32 to vector<6x12x128xf32>
    %179 = arith.mulf %177, %178 : vector<6x12x128xf32>
    %180 = arith.addf %176, %179 : vector<6x12x128xf32>
    %181 = vector.broadcast %38 : f32 to vector<8x14x128xf32>
    %c0_i32_74 = arith.constant 0 : i32
    %182 = arith.addi %0, %c0_i32_74 : i32
    %c0_75 = arith.constant 0 : index
    %183 = arith.index_cast %182 : i32 to index
    %c0_76 = arith.constant 0 : index
    %c0_77 = arith.constant 0 : index
    %184 = vector.load %arg6[%c0_75, %183, %c0_76, %c0_77] : memref<1x16x16x128xf32, #tpu.memory_space<vmem>>, vector<1x8x14x128xf32>
    %185 = vector.shape_cast %184 : vector<1x8x14x128xf32> to vector<8x14x128xf32>
    %186 = vector.broadcast %10 : f32 to vector<8x14x128xf32>
    %187 = arith.mulf %185, %186 : vector<8x14x128xf32>
    %188 = arith.addf %181, %187 : vector<8x14x128xf32>
    %c0_i32_78 = arith.constant 0 : i32
    %189 = arith.addi %0, %c0_i32_78 : i32
    %c0_79 = arith.constant 0 : index
    %190 = arith.index_cast %189 : i32 to index
    %c1_80 = arith.constant 1 : index
    %c0_81 = arith.constant 0 : index
    %191 = vector.load %arg6[%c0_79, %190, %c1_80, %c0_81] : memref<1x16x16x128xf32, #tpu.memory_space<vmem>>, vector<1x8x14x128xf32>
    %192 = vector.shape_cast %191 : vector<1x8x14x128xf32> to vector<8x14x128xf32>
    %193 = vector.broadcast %11 : f32 to vector<8x14x128xf32>
    %194 = arith.mulf %192, %193 : vector<8x14x128xf32>
    %195 = arith.addf %188, %194 : vector<8x14x128xf32>
    %c0_i32_82 = arith.constant 0 : i32
    %196 = arith.addi %0, %c0_i32_82 : i32
    %c0_83 = arith.constant 0 : index
    %197 = arith.index_cast %196 : i32 to index
    %c2_84 = arith.constant 2 : index
    %c0_85 = arith.constant 0 : index
    %198 = vector.load %arg6[%c0_83, %197, %c2_84, %c0_85] : memref<1x16x16x128xf32, #tpu.memory_space<vmem>>, vector<1x8x14x128xf32>
    %199 = vector.shape_cast %198 : vector<1x8x14x128xf32> to vector<8x14x128xf32>
    %200 = vector.broadcast %12 : f32 to vector<8x14x128xf32>
    %201 = arith.mulf %199, %200 : vector<8x14x128xf32>
    %202 = arith.addf %195, %201 : vector<8x14x128xf32>
    %c1_i32_86 = arith.constant 1 : i32
    %203 = arith.addi %0, %c1_i32_86 : i32
    %c0_87 = arith.constant 0 : index
    %204 = arith.index_cast %203 : i32 to index
    %c0_88 = arith.constant 0 : index
    %c0_89 = arith.constant 0 : index
    %205 = vector.load %arg6[%c0_87, %204, %c0_88, %c0_89] : memref<1x16x16x128xf32, #tpu.memory_space<vmem>>, vector<1x8x14x128xf32>
    %206 = vector.shape_cast %205 : vector<1x8x14x128xf32> to vector<8x14x128xf32>
    %207 = vector.broadcast %13 : f32 to vector<8x14x128xf32>
    %208 = arith.mulf %206, %207 : vector<8x14x128xf32>
    %209 = arith.addf %202, %208 : vector<8x14x128xf32>
    %c1_i32_90 = arith.constant 1 : i32
    %210 = arith.addi %0, %c1_i32_90 : i32
    %c0_91 = arith.constant 0 : index
    %211 = arith.index_cast %210 : i32 to index
    %c1_92 = arith.constant 1 : index
    %c0_93 = arith.constant 0 : index
    %212 = vector.load %arg6[%c0_91, %211, %c1_92, %c0_93] : memref<1x16x16x128xf32, #tpu.memory_space<vmem>>, vector<1x8x14x128xf32>
    %213 = vector.shape_cast %212 : vector<1x8x14x128xf32> to vector<8x14x128xf32>
    %214 = vector.broadcast %14 : f32 to vector<8x14x128xf32>
    %215 = arith.mulf %213, %214 : vector<8x14x128xf32>
    %216 = arith.addf %209, %215 : vector<8x14x128xf32>
    %c1_i32_94 = arith.constant 1 : i32
    %217 = arith.addi %0, %c1_i32_94 : i32
    %c0_95 = arith.constant 0 : index
    %218 = arith.index_cast %217 : i32 to index
    %c2_96 = arith.constant 2 : index
    %c0_97 = arith.constant 0 : index
    %219 = vector.load %arg6[%c0_95, %218, %c2_96, %c0_97] : memref<1x16x16x128xf32, #tpu.memory_space<vmem>>, vector<1x8x14x128xf32>
    %220 = vector.shape_cast %219 : vector<1x8x14x128xf32> to vector<8x14x128xf32>
    %221 = vector.broadcast %15 : f32 to vector<8x14x128xf32>
    %222 = arith.mulf %220, %221 : vector<8x14x128xf32>
    %223 = arith.addf %216, %222 : vector<8x14x128xf32>
    %c2_i32_98 = arith.constant 2 : i32
    %224 = arith.addi %0, %c2_i32_98 : i32
    %c0_99 = arith.constant 0 : index
    %225 = arith.index_cast %224 : i32 to index
    %c0_100 = arith.constant 0 : index
    %c0_101 = arith.constant 0 : index
    %226 = vector.load %arg6[%c0_99, %225, %c0_100, %c0_101] : memref<1x16x16x128xf32, #tpu.memory_space<vmem>>, vector<1x8x14x128xf32>
    %227 = vector.shape_cast %226 : vector<1x8x14x128xf32> to vector<8x14x128xf32>
    %228 = vector.broadcast %16 : f32 to vector<8x14x128xf32>
    %229 = arith.mulf %227, %228 : vector<8x14x128xf32>
    %230 = arith.addf %223, %229 : vector<8x14x128xf32>
    %c2_i32_102 = arith.constant 2 : i32
    %231 = arith.addi %0, %c2_i32_102 : i32
    %c0_103 = arith.constant 0 : index
    %232 = arith.index_cast %231 : i32 to index
    %c1_104 = arith.constant 1 : index
    %c0_105 = arith.constant 0 : index
    %233 = vector.load %arg6[%c0_103, %232, %c1_104, %c0_105] : memref<1x16x16x128xf32, #tpu.memory_space<vmem>>, vector<1x8x14x128xf32>
    %234 = vector.shape_cast %233 : vector<1x8x14x128xf32> to vector<8x14x128xf32>
    %235 = vector.broadcast %17 : f32 to vector<8x14x128xf32>
    %236 = arith.mulf %234, %235 : vector<8x14x128xf32>
    %237 = arith.addf %230, %236 : vector<8x14x128xf32>
    %c2_i32_106 = arith.constant 2 : i32
    %238 = arith.addi %0, %c2_i32_106 : i32
    %c0_107 = arith.constant 0 : index
    %239 = arith.index_cast %238 : i32 to index
    %c2_108 = arith.constant 2 : index
    %c0_109 = arith.constant 0 : index
    %240 = vector.load %arg6[%c0_107, %239, %c2_108, %c0_109] : memref<1x16x16x128xf32, #tpu.memory_space<vmem>>, vector<1x8x14x128xf32>
    %241 = vector.shape_cast %240 : vector<1x8x14x128xf32> to vector<8x14x128xf32>
    %242 = vector.broadcast %18 : f32 to vector<8x14x128xf32>
    %243 = arith.mulf %241, %242 : vector<8x14x128xf32>
    %244 = arith.addf %237, %243 : vector<8x14x128xf32>
    %cst_110 = arith.constant 0.000000e+00 : f32
    %245 = vector.broadcast %cst_110 : f32 to vector<8x14x128xf32>
    %246 = arith.maximumf %244, %245 : vector<8x14x128xf32>
    %247 = vector.extract_strided_slice %246 {offsets = [0, 0, 0], sizes = [6, 12, 128], strides = [1, 1, 1]} : vector<8x14x128xf32> to vector<6x12x128xf32>
    %248 = vector.broadcast %50 : f32 to vector<6x12x128xf32>
    %249 = arith.mulf %247, %248 : vector<6x12x128xf32>
    %250 = arith.addf %180, %249 : vector<6x12x128xf32>
    %251 = vector.extract_strided_slice %246 {offsets = [0, 1, 0], sizes = [6, 12, 128], strides = [1, 1, 1]} : vector<8x14x128xf32> to vector<6x12x128xf32>
    %252 = vector.broadcast %51 : f32 to vector<6x12x128xf32>
    %253 = arith.mulf %251, %252 : vector<6x12x128xf32>
    %254 = arith.addf %250, %253 : vector<6x12x128xf32>
    %255 = vector.extract_strided_slice %246 {offsets = [0, 2, 0], sizes = [6, 12, 128], strides = [1, 1, 1]} : vector<8x14x128xf32> to vector<6x12x128xf32>
    %256 = vector.broadcast %52 : f32 to vector<6x12x128xf32>
    %257 = arith.mulf %255, %256 : vector<6x12x128xf32>
    %258 = arith.addf %254, %257 : vector<6x12x128xf32>
    %259 = vector.extract_strided_slice %246 {offsets = [1, 0, 0], sizes = [6, 12, 128], strides = [1, 1, 1]} : vector<8x14x128xf32> to vector<6x12x128xf32>
    %260 = vector.broadcast %53 : f32 to vector<6x12x128xf32>
    %261 = arith.mulf %259, %260 : vector<6x12x128xf32>
    %262 = arith.addf %258, %261 : vector<6x12x128xf32>
    %263 = vector.extract_strided_slice %246 {offsets = [1, 1, 0], sizes = [6, 12, 128], strides = [1, 1, 1]} : vector<8x14x128xf32> to vector<6x12x128xf32>
    %264 = vector.broadcast %54 : f32 to vector<6x12x128xf32>
    %265 = arith.mulf %263, %264 : vector<6x12x128xf32>
    %266 = arith.addf %262, %265 : vector<6x12x128xf32>
    %267 = vector.extract_strided_slice %246 {offsets = [1, 2, 0], sizes = [6, 12, 128], strides = [1, 1, 1]} : vector<8x14x128xf32> to vector<6x12x128xf32>
    %268 = vector.broadcast %55 : f32 to vector<6x12x128xf32>
    %269 = arith.mulf %267, %268 : vector<6x12x128xf32>
    %270 = arith.addf %266, %269 : vector<6x12x128xf32>
    %271 = vector.extract_strided_slice %246 {offsets = [2, 0, 0], sizes = [6, 12, 128], strides = [1, 1, 1]} : vector<8x14x128xf32> to vector<6x12x128xf32>
    %272 = vector.broadcast %56 : f32 to vector<6x12x128xf32>
    %273 = arith.mulf %271, %272 : vector<6x12x128xf32>
    %274 = arith.addf %270, %273 : vector<6x12x128xf32>
    %275 = vector.extract_strided_slice %246 {offsets = [2, 1, 0], sizes = [6, 12, 128], strides = [1, 1, 1]} : vector<8x14x128xf32> to vector<6x12x128xf32>
    %276 = vector.broadcast %57 : f32 to vector<6x12x128xf32>
    %277 = arith.mulf %275, %276 : vector<6x12x128xf32>
    %278 = arith.addf %274, %277 : vector<6x12x128xf32>
    %279 = vector.extract_strided_slice %246 {offsets = [2, 2, 0], sizes = [6, 12, 128], strides = [1, 1, 1]} : vector<8x14x128xf32> to vector<6x12x128xf32>
    %280 = vector.broadcast %58 : f32 to vector<6x12x128xf32>
    %281 = arith.mulf %279, %280 : vector<6x12x128xf32>
    %282 = arith.addf %278, %281 : vector<6x12x128xf32>
    %283 = vector.broadcast %39 : f32 to vector<8x14x128xf32>
    %c0_i32_111 = arith.constant 0 : i32
    %284 = arith.addi %0, %c0_i32_111 : i32
    %c0_112 = arith.constant 0 : index
    %285 = arith.index_cast %284 : i32 to index
    %c0_113 = arith.constant 0 : index
    %c0_114 = arith.constant 0 : index
    %286 = vector.load %arg6[%c0_112, %285, %c0_113, %c0_114] : memref<1x16x16x128xf32, #tpu.memory_space<vmem>>, vector<1x8x14x128xf32>
    %287 = vector.shape_cast %286 : vector<1x8x14x128xf32> to vector<8x14x128xf32>
    %288 = vector.broadcast %19 : f32 to vector<8x14x128xf32>
    %289 = arith.mulf %287, %288 : vector<8x14x128xf32>
    %290 = arith.addf %283, %289 : vector<8x14x128xf32>
    %c0_i32_115 = arith.constant 0 : i32
    %291 = arith.addi %0, %c0_i32_115 : i32
    %c0_116 = arith.constant 0 : index
    %292 = arith.index_cast %291 : i32 to index
    %c1_117 = arith.constant 1 : index
    %c0_118 = arith.constant 0 : index
    %293 = vector.load %arg6[%c0_116, %292, %c1_117, %c0_118] : memref<1x16x16x128xf32, #tpu.memory_space<vmem>>, vector<1x8x14x128xf32>
    %294 = vector.shape_cast %293 : vector<1x8x14x128xf32> to vector<8x14x128xf32>
    %295 = vector.broadcast %20 : f32 to vector<8x14x128xf32>
    %296 = arith.mulf %294, %295 : vector<8x14x128xf32>
    %297 = arith.addf %290, %296 : vector<8x14x128xf32>
    %c0_i32_119 = arith.constant 0 : i32
    %298 = arith.addi %0, %c0_i32_119 : i32
    %c0_120 = arith.constant 0 : index
    %299 = arith.index_cast %298 : i32 to index
    %c2_121 = arith.constant 2 : index
    %c0_122 = arith.constant 0 : index
    %300 = vector.load %arg6[%c0_120, %299, %c2_121, %c0_122] : memref<1x16x16x128xf32, #tpu.memory_space<vmem>>, vector<1x8x14x128xf32>
    %301 = vector.shape_cast %300 : vector<1x8x14x128xf32> to vector<8x14x128xf32>
    %302 = vector.broadcast %21 : f32 to vector<8x14x128xf32>
    %303 = arith.mulf %301, %302 : vector<8x14x128xf32>
    %304 = arith.addf %297, %303 : vector<8x14x128xf32>
    %c1_i32_123 = arith.constant 1 : i32
    %305 = arith.addi %0, %c1_i32_123 : i32
    %c0_124 = arith.constant 0 : index
    %306 = arith.index_cast %305 : i32 to index
    %c0_125 = arith.constant 0 : index
    %c0_126 = arith.constant 0 : index
    %307 = vector.load %arg6[%c0_124, %306, %c0_125, %c0_126] : memref<1x16x16x128xf32, #tpu.memory_space<vmem>>, vector<1x8x14x128xf32>
    %308 = vector.shape_cast %307 : vector<1x8x14x128xf32> to vector<8x14x128xf32>
    %309 = vector.broadcast %22 : f32 to vector<8x14x128xf32>
    %310 = arith.mulf %308, %309 : vector<8x14x128xf32>
    %311 = arith.addf %304, %310 : vector<8x14x128xf32>
    %c1_i32_127 = arith.constant 1 : i32
    %312 = arith.addi %0, %c1_i32_127 : i32
    %c0_128 = arith.constant 0 : index
    %313 = arith.index_cast %312 : i32 to index
    %c1_129 = arith.constant 1 : index
    %c0_130 = arith.constant 0 : index
    %314 = vector.load %arg6[%c0_128, %313, %c1_129, %c0_130] : memref<1x16x16x128xf32, #tpu.memory_space<vmem>>, vector<1x8x14x128xf32>
    %315 = vector.shape_cast %314 : vector<1x8x14x128xf32> to vector<8x14x128xf32>
    %316 = vector.broadcast %23 : f32 to vector<8x14x128xf32>
    %317 = arith.mulf %315, %316 : vector<8x14x128xf32>
    %318 = arith.addf %311, %317 : vector<8x14x128xf32>
    %c1_i32_131 = arith.constant 1 : i32
    %319 = arith.addi %0, %c1_i32_131 : i32
    %c0_132 = arith.constant 0 : index
    %320 = arith.index_cast %319 : i32 to index
    %c2_133 = arith.constant 2 : index
    %c0_134 = arith.constant 0 : index
    %321 = vector.load %arg6[%c0_132, %320, %c2_133, %c0_134] : memref<1x16x16x128xf32, #tpu.memory_space<vmem>>, vector<1x8x14x128xf32>
    %322 = vector.shape_cast %321 : vector<1x8x14x128xf32> to vector<8x14x128xf32>
    %323 = vector.broadcast %24 : f32 to vector<8x14x128xf32>
    %324 = arith.mulf %322, %323 : vector<8x14x128xf32>
    %325 = arith.addf %318, %324 : vector<8x14x128xf32>
    %c2_i32_135 = arith.constant 2 : i32
    %326 = arith.addi %0, %c2_i32_135 : i32
    %c0_136 = arith.constant 0 : index
    %327 = arith.index_cast %326 : i32 to index
    %c0_137 = arith.constant 0 : index
    %c0_138 = arith.constant 0 : index
    %328 = vector.load %arg6[%c0_136, %327, %c0_137, %c0_138] : memref<1x16x16x128xf32, #tpu.memory_space<vmem>>, vector<1x8x14x128xf32>
    %329 = vector.shape_cast %328 : vector<1x8x14x128xf32> to vector<8x14x128xf32>
    %330 = vector.broadcast %25 : f32 to vector<8x14x128xf32>
    %331 = arith.mulf %329, %330 : vector<8x14x128xf32>
    %332 = arith.addf %325, %331 : vector<8x14x128xf32>
    %c2_i32_139 = arith.constant 2 : i32
    %333 = arith.addi %0, %c2_i32_139 : i32
    %c0_140 = arith.constant 0 : index
    %334 = arith.index_cast %333 : i32 to index
    %c1_141 = arith.constant 1 : index
    %c0_142 = arith.constant 0 : index
    %335 = vector.load %arg6[%c0_140, %334, %c1_141, %c0_142] : memref<1x16x16x128xf32, #tpu.memory_space<vmem>>, vector<1x8x14x128xf32>
    %336 = vector.shape_cast %335 : vector<1x8x14x128xf32> to vector<8x14x128xf32>
    %337 = vector.broadcast %26 : f32 to vector<8x14x128xf32>
    %338 = arith.mulf %336, %337 : vector<8x14x128xf32>
    %339 = arith.addf %332, %338 : vector<8x14x128xf32>
    %c2_i32_143 = arith.constant 2 : i32
    %340 = arith.addi %0, %c2_i32_143 : i32
    %c0_144 = arith.constant 0 : index
    %341 = arith.index_cast %340 : i32 to index
    %c2_145 = arith.constant 2 : index
    %c0_146 = arith.constant 0 : index
    %342 = vector.load %arg6[%c0_144, %341, %c2_145, %c0_146] : memref<1x16x16x128xf32, #tpu.memory_space<vmem>>, vector<1x8x14x128xf32>
    %343 = vector.shape_cast %342 : vector<1x8x14x128xf32> to vector<8x14x128xf32>
    %344 = vector.broadcast %27 : f32 to vector<8x14x128xf32>
    %345 = arith.mulf %343, %344 : vector<8x14x128xf32>
    %346 = arith.addf %339, %345 : vector<8x14x128xf32>
    %cst_147 = arith.constant 0.000000e+00 : f32
    %347 = vector.broadcast %cst_147 : f32 to vector<8x14x128xf32>
    %348 = arith.maximumf %346, %347 : vector<8x14x128xf32>
    %349 = vector.extract_strided_slice %348 {offsets = [0, 0, 0], sizes = [6, 12, 128], strides = [1, 1, 1]} : vector<8x14x128xf32> to vector<6x12x128xf32>
    %350 = vector.broadcast %59 : f32 to vector<6x12x128xf32>
    %351 = arith.mulf %349, %350 : vector<6x12x128xf32>
    %352 = arith.addf %282, %351 : vector<6x12x128xf32>
    %353 = vector.extract_strided_slice %348 {offsets = [0, 1, 0], sizes = [6, 12, 128], strides = [1, 1, 1]} : vector<8x14x128xf32> to vector<6x12x128xf32>
    %354 = vector.broadcast %60 : f32 to vector<6x12x128xf32>
    %355 = arith.mulf %353, %354 : vector<6x12x128xf32>
    %356 = arith.addf %352, %355 : vector<6x12x128xf32>
    %357 = vector.extract_strided_slice %348 {offsets = [0, 2, 0], sizes = [6, 12, 128], strides = [1, 1, 1]} : vector<8x14x128xf32> to vector<6x12x128xf32>
    %358 = vector.broadcast %61 : f32 to vector<6x12x128xf32>
    %359 = arith.mulf %357, %358 : vector<6x12x128xf32>
    %360 = arith.addf %356, %359 : vector<6x12x128xf32>
    %361 = vector.extract_strided_slice %348 {offsets = [1, 0, 0], sizes = [6, 12, 128], strides = [1, 1, 1]} : vector<8x14x128xf32> to vector<6x12x128xf32>
    %362 = vector.broadcast %62 : f32 to vector<6x12x128xf32>
    %363 = arith.mulf %361, %362 : vector<6x12x128xf32>
    %364 = arith.addf %360, %363 : vector<6x12x128xf32>
    %365 = vector.extract_strided_slice %348 {offsets = [1, 1, 0], sizes = [6, 12, 128], strides = [1, 1, 1]} : vector<8x14x128xf32> to vector<6x12x128xf32>
    %366 = vector.broadcast %63 : f32 to vector<6x12x128xf32>
    %367 = arith.mulf %365, %366 : vector<6x12x128xf32>
    %368 = arith.addf %364, %367 : vector<6x12x128xf32>
    %369 = vector.extract_strided_slice %348 {offsets = [1, 2, 0], sizes = [6, 12, 128], strides = [1, 1, 1]} : vector<8x14x128xf32> to vector<6x12x128xf32>
    %370 = vector.broadcast %64 : f32 to vector<6x12x128xf32>
    %371 = arith.mulf %369, %370 : vector<6x12x128xf32>
    %372 = arith.addf %368, %371 : vector<6x12x128xf32>
    %373 = vector.extract_strided_slice %348 {offsets = [2, 0, 0], sizes = [6, 12, 128], strides = [1, 1, 1]} : vector<8x14x128xf32> to vector<6x12x128xf32>
    %374 = vector.broadcast %65 : f32 to vector<6x12x128xf32>
    %375 = arith.mulf %373, %374 : vector<6x12x128xf32>
    %376 = arith.addf %372, %375 : vector<6x12x128xf32>
    %377 = vector.extract_strided_slice %348 {offsets = [2, 1, 0], sizes = [6, 12, 128], strides = [1, 1, 1]} : vector<8x14x128xf32> to vector<6x12x128xf32>
    %378 = vector.broadcast %66 : f32 to vector<6x12x128xf32>
    %379 = arith.mulf %377, %378 : vector<6x12x128xf32>
    %380 = arith.addf %376, %379 : vector<6x12x128xf32>
    %381 = vector.extract_strided_slice %348 {offsets = [2, 2, 0], sizes = [6, 12, 128], strides = [1, 1, 1]} : vector<8x14x128xf32> to vector<6x12x128xf32>
    %382 = vector.broadcast %67 : f32 to vector<6x12x128xf32>
    %383 = arith.mulf %381, %382 : vector<6x12x128xf32>
    %384 = arith.addf %380, %383 : vector<6x12x128xf32>
    %385 = vector.broadcast %40 : f32 to vector<8x14x128xf32>
    %c0_i32_148 = arith.constant 0 : i32
    %386 = arith.addi %0, %c0_i32_148 : i32
    %c0_149 = arith.constant 0 : index
    %387 = arith.index_cast %386 : i32 to index
    %c0_150 = arith.constant 0 : index
    %c0_151 = arith.constant 0 : index
    %388 = vector.load %arg6[%c0_149, %387, %c0_150, %c0_151] : memref<1x16x16x128xf32, #tpu.memory_space<vmem>>, vector<1x8x14x128xf32>
    %389 = vector.shape_cast %388 : vector<1x8x14x128xf32> to vector<8x14x128xf32>
    %390 = vector.broadcast %28 : f32 to vector<8x14x128xf32>
    %391 = arith.mulf %389, %390 : vector<8x14x128xf32>
    %392 = arith.addf %385, %391 : vector<8x14x128xf32>
    %c0_i32_152 = arith.constant 0 : i32
    %393 = arith.addi %0, %c0_i32_152 : i32
    %c0_153 = arith.constant 0 : index
    %394 = arith.index_cast %393 : i32 to index
    %c1_154 = arith.constant 1 : index
    %c0_155 = arith.constant 0 : index
    %395 = vector.load %arg6[%c0_153, %394, %c1_154, %c0_155] : memref<1x16x16x128xf32, #tpu.memory_space<vmem>>, vector<1x8x14x128xf32>
    %396 = vector.shape_cast %395 : vector<1x8x14x128xf32> to vector<8x14x128xf32>
    %397 = vector.broadcast %29 : f32 to vector<8x14x128xf32>
    %398 = arith.mulf %396, %397 : vector<8x14x128xf32>
    %399 = arith.addf %392, %398 : vector<8x14x128xf32>
    %c0_i32_156 = arith.constant 0 : i32
    %400 = arith.addi %0, %c0_i32_156 : i32
    %c0_157 = arith.constant 0 : index
    %401 = arith.index_cast %400 : i32 to index
    %c2_158 = arith.constant 2 : index
    %c0_159 = arith.constant 0 : index
    %402 = vector.load %arg6[%c0_157, %401, %c2_158, %c0_159] : memref<1x16x16x128xf32, #tpu.memory_space<vmem>>, vector<1x8x14x128xf32>
    %403 = vector.shape_cast %402 : vector<1x8x14x128xf32> to vector<8x14x128xf32>
    %404 = vector.broadcast %30 : f32 to vector<8x14x128xf32>
    %405 = arith.mulf %403, %404 : vector<8x14x128xf32>
    %406 = arith.addf %399, %405 : vector<8x14x128xf32>
    %c1_i32_160 = arith.constant 1 : i32
    %407 = arith.addi %0, %c1_i32_160 : i32
    %c0_161 = arith.constant 0 : index
    %408 = arith.index_cast %407 : i32 to index
    %c0_162 = arith.constant 0 : index
    %c0_163 = arith.constant 0 : index
    %409 = vector.load %arg6[%c0_161, %408, %c0_162, %c0_163] : memref<1x16x16x128xf32, #tpu.memory_space<vmem>>, vector<1x8x14x128xf32>
    %410 = vector.shape_cast %409 : vector<1x8x14x128xf32> to vector<8x14x128xf32>
    %411 = vector.broadcast %31 : f32 to vector<8x14x128xf32>
    %412 = arith.mulf %410, %411 : vector<8x14x128xf32>
    %413 = arith.addf %406, %412 : vector<8x14x128xf32>
    %c1_i32_164 = arith.constant 1 : i32
    %414 = arith.addi %0, %c1_i32_164 : i32
    %c0_165 = arith.constant 0 : index
    %415 = arith.index_cast %414 : i32 to index
    %c1_166 = arith.constant 1 : index
    %c0_167 = arith.constant 0 : index
    %416 = vector.load %arg6[%c0_165, %415, %c1_166, %c0_167] : memref<1x16x16x128xf32, #tpu.memory_space<vmem>>, vector<1x8x14x128xf32>
    %417 = vector.shape_cast %416 : vector<1x8x14x128xf32> to vector<8x14x128xf32>
    %418 = vector.broadcast %32 : f32 to vector<8x14x128xf32>
    %419 = arith.mulf %417, %418 : vector<8x14x128xf32>
    %420 = arith.addf %413, %419 : vector<8x14x128xf32>
    %c1_i32_168 = arith.constant 1 : i32
    %421 = arith.addi %0, %c1_i32_168 : i32
    %c0_169 = arith.constant 0 : index
    %422 = arith.index_cast %421 : i32 to index
    %c2_170 = arith.constant 2 : index
    %c0_171 = arith.constant 0 : index
    %423 = vector.load %arg6[%c0_169, %422, %c2_170, %c0_171] : memref<1x16x16x128xf32, #tpu.memory_space<vmem>>, vector<1x8x14x128xf32>
    %424 = vector.shape_cast %423 : vector<1x8x14x128xf32> to vector<8x14x128xf32>
    %425 = vector.broadcast %33 : f32 to vector<8x14x128xf32>
    %426 = arith.mulf %424, %425 : vector<8x14x128xf32>
    %427 = arith.addf %420, %426 : vector<8x14x128xf32>
    %c2_i32_172 = arith.constant 2 : i32
    %428 = arith.addi %0, %c2_i32_172 : i32
    %c0_173 = arith.constant 0 : index
    %429 = arith.index_cast %428 : i32 to index
    %c0_174 = arith.constant 0 : index
    %c0_175 = arith.constant 0 : index
    %430 = vector.load %arg6[%c0_173, %429, %c0_174, %c0_175] : memref<1x16x16x128xf32, #tpu.memory_space<vmem>>, vector<1x8x14x128xf32>
    %431 = vector.shape_cast %430 : vector<1x8x14x128xf32> to vector<8x14x128xf32>
    %432 = vector.broadcast %34 : f32 to vector<8x14x128xf32>
    %433 = arith.mulf %431, %432 : vector<8x14x128xf32>
    %434 = arith.addf %427, %433 : vector<8x14x128xf32>
    %c2_i32_176 = arith.constant 2 : i32
    %435 = arith.addi %0, %c2_i32_176 : i32
    %c0_177 = arith.constant 0 : index
    %436 = arith.index_cast %435 : i32 to index
    %c1_178 = arith.constant 1 : index
    %c0_179 = arith.constant 0 : index
    %437 = vector.load %arg6[%c0_177, %436, %c1_178, %c0_179] : memref<1x16x16x128xf32, #tpu.memory_space<vmem>>, vector<1x8x14x128xf32>
    %438 = vector.shape_cast %437 : vector<1x8x14x128xf32> to vector<8x14x128xf32>
    %439 = vector.broadcast %35 : f32 to vector<8x14x128xf32>
    %440 = arith.mulf %438, %439 : vector<8x14x128xf32>
    %441 = arith.addf %434, %440 : vector<8x14x128xf32>
    %c2_i32_180 = arith.constant 2 : i32
    %442 = arith.addi %0, %c2_i32_180 : i32
    %c0_181 = arith.constant 0 : index
    %443 = arith.index_cast %442 : i32 to index
    %c2_182 = arith.constant 2 : index
    %c0_183 = arith.constant 0 : index
    %444 = vector.load %arg6[%c0_181, %443, %c2_182, %c0_183] : memref<1x16x16x128xf32, #tpu.memory_space<vmem>>, vector<1x8x14x128xf32>
    %445 = vector.shape_cast %444 : vector<1x8x14x128xf32> to vector<8x14x128xf32>
    %446 = vector.broadcast %36 : f32 to vector<8x14x128xf32>
    %447 = arith.mulf %445, %446 : vector<8x14x128xf32>
    %448 = arith.addf %441, %447 : vector<8x14x128xf32>
    %cst_184 = arith.constant 0.000000e+00 : f32
    %449 = vector.broadcast %cst_184 : f32 to vector<8x14x128xf32>
    %450 = arith.maximumf %448, %449 : vector<8x14x128xf32>
    %451 = vector.extract_strided_slice %450 {offsets = [0, 0, 0], sizes = [6, 12, 128], strides = [1, 1, 1]} : vector<8x14x128xf32> to vector<6x12x128xf32>
    %452 = vector.broadcast %68 : f32 to vector<6x12x128xf32>
    %453 = arith.mulf %451, %452 : vector<6x12x128xf32>
    %454 = arith.addf %384, %453 : vector<6x12x128xf32>
    %455 = vector.extract_strided_slice %450 {offsets = [0, 1, 0], sizes = [6, 12, 128], strides = [1, 1, 1]} : vector<8x14x128xf32> to vector<6x12x128xf32>
    %456 = vector.broadcast %69 : f32 to vector<6x12x128xf32>
    %457 = arith.mulf %455, %456 : vector<6x12x128xf32>
    %458 = arith.addf %454, %457 : vector<6x12x128xf32>
    %459 = vector.extract_strided_slice %450 {offsets = [0, 2, 0], sizes = [6, 12, 128], strides = [1, 1, 1]} : vector<8x14x128xf32> to vector<6x12x128xf32>
    %460 = vector.broadcast %70 : f32 to vector<6x12x128xf32>
    %461 = arith.mulf %459, %460 : vector<6x12x128xf32>
    %462 = arith.addf %458, %461 : vector<6x12x128xf32>
    %463 = vector.extract_strided_slice %450 {offsets = [1, 0, 0], sizes = [6, 12, 128], strides = [1, 1, 1]} : vector<8x14x128xf32> to vector<6x12x128xf32>
    %464 = vector.broadcast %71 : f32 to vector<6x12x128xf32>
    %465 = arith.mulf %463, %464 : vector<6x12x128xf32>
    %466 = arith.addf %462, %465 : vector<6x12x128xf32>
    %467 = vector.extract_strided_slice %450 {offsets = [1, 1, 0], sizes = [6, 12, 128], strides = [1, 1, 1]} : vector<8x14x128xf32> to vector<6x12x128xf32>
    %468 = vector.broadcast %72 : f32 to vector<6x12x128xf32>
    %469 = arith.mulf %467, %468 : vector<6x12x128xf32>
    %470 = arith.addf %466, %469 : vector<6x12x128xf32>
    %471 = vector.extract_strided_slice %450 {offsets = [1, 2, 0], sizes = [6, 12, 128], strides = [1, 1, 1]} : vector<8x14x128xf32> to vector<6x12x128xf32>
    %472 = vector.broadcast %73 : f32 to vector<6x12x128xf32>
    %473 = arith.mulf %471, %472 : vector<6x12x128xf32>
    %474 = arith.addf %470, %473 : vector<6x12x128xf32>
    %475 = vector.extract_strided_slice %450 {offsets = [2, 0, 0], sizes = [6, 12, 128], strides = [1, 1, 1]} : vector<8x14x128xf32> to vector<6x12x128xf32>
    %476 = vector.broadcast %74 : f32 to vector<6x12x128xf32>
    %477 = arith.mulf %475, %476 : vector<6x12x128xf32>
    %478 = arith.addf %474, %477 : vector<6x12x128xf32>
    %479 = vector.extract_strided_slice %450 {offsets = [2, 1, 0], sizes = [6, 12, 128], strides = [1, 1, 1]} : vector<8x14x128xf32> to vector<6x12x128xf32>
    %480 = vector.broadcast %75 : f32 to vector<6x12x128xf32>
    %481 = arith.mulf %479, %480 : vector<6x12x128xf32>
    %482 = arith.addf %478, %481 : vector<6x12x128xf32>
    %483 = vector.extract_strided_slice %450 {offsets = [2, 2, 0], sizes = [6, 12, 128], strides = [1, 1, 1]} : vector<8x14x128xf32> to vector<6x12x128xf32>
    %484 = vector.broadcast %76 : f32 to vector<6x12x128xf32>
    %485 = arith.mulf %483, %484 : vector<6x12x128xf32>
    %486 = arith.addf %482, %485 : vector<6x12x128xf32>
    %cst_185 = arith.constant 0.000000e+00 : f32
    %487 = vector.broadcast %cst_185 : f32 to vector<6x12x128xf32>
    %488 = arith.subf %487, %486 : vector<6x12x128xf32>
    %489 = math.exp %488 : vector<6x12x128xf32>
    %cst_186 = arith.constant 1.000000e+00 : f32
    %490 = vector.broadcast %cst_186 : f32 to vector<6x12x128xf32>
    %491 = arith.addf %490, %489 : vector<6x12x128xf32>
    %492 = tpu.reciprocal %491 {approx = true} : vector<6x12x128xf32> -> vector<6x12x128xf32>
    %493 = arith.mulf %491, %492 : vector<6x12x128xf32>
    %cst_187 = arith.constant 2.000000e+00 : f32
    %494 = vector.broadcast %cst_187 : f32 to vector<6x12x128xf32>
    %495 = arith.subf %494, %493 : vector<6x12x128xf32>
    %496 = arith.mulf %492, %495 : vector<6x12x128xf32>
    %c0_188 = arith.constant 0 : index
    %c0_189 = arith.constant 0 : index
    %c0_190 = arith.constant 0 : index
    %c0_191 = arith.constant 0 : index
    %497 = vector.load %arg7[%c0_188, %c0_189, %c0_190, %c0_191] : memref<1x6x12x128xf32, #tpu.memory_space<vmem>>, vector<1x6x12x128xf32>
    %498 = vector.shape_cast %497 : vector<1x6x12x128xf32> to vector<6x12x128xf32>
    %499 = vector.shape_cast %496 : vector<6x12x128xf32> to vector<1x6x12x128xf32>
    tpu.vector_store %arg7[%c0_188, %c0_189, %c0_190, %c0_191], %499 {strides = array<i32>} : memref<1x6x12x128xf32, #tpu.memory_space<vmem>>, vector<1x6x12x128xf32>,
    return
  }
  func.func @transform_0(%arg0: i32, %arg1: i32) -> i32 {
    %c0_i32 = arith.constant 0 : i32
    %c0_i32_0 = arith.constant 0 : i32
    return %c0_i32 : i32
  }
  func.func @transform_1(%arg0: i32, %arg1: i32) -> i32 {
    %c0_i32 = arith.constant 0 : i32
    %c0_i32_0 = arith.constant 0 : i32
    return %c0_i32 : i32
  }
  func.func @transform_2(%arg0: i32, %arg1: i32) -> i32 {
    %c0_i32 = arith.constant 0 : i32
    %c0_i32_0 = arith.constant 0 : i32
    return %c0_i32 : i32
  }
  func.func @transform_3(%arg0: i32, %arg1: i32) -> i32 {
    %c0_i32 = arith.constant 0 : i32
    %c0_i32_0 = arith.constant 0 : i32
    return %c0_i32 : i32
  }
  func.func @transform_4(%arg0: i32, %arg1: i32) -> (i32, i32, i32, i32) {
    %c0_i32 = arith.constant 0 : i32
    %c0_i32_0 = arith.constant 0 : i32
    %c0_i32_1 = arith.constant 0 : i32
    %c0_i32_2 = arith.constant 0 : i32
    return %arg0, %c0_i32, %c0_i32_0, %c0_i32_1 : i32, i32, i32, i32
  }
  func.func @transform_5(%arg0: i32, %arg1: i32) -> (i32, i32, i32, i32) {
    %c0_i32 = arith.constant 0 : i32
    %c0_i32_0 = arith.constant 0 : i32
    %c0_i32_1 = arith.constant 0 : i32
    return %arg0, %arg1, %c0_i32, %c0_i32_0 : i32, i32, i32, i32
  }
}

</mosaic_0001>

<bundles_post_ra>
// kernel: tpu_custom_call.1
= control target key start
LH: loop header
LB: loop body
LE: loop exit
PB: predicated region body
PF: predicated region fallthrough
CT: control target
= control target key end

     0   :  { %s7535_s0 = inlined_call_operand.vmem [shape: f32[36], index: 0, kind: input, shape index: {}]   ;;  %s7536_s1 = inlined_call_operand.vmem [shape: f32[4], index: 1, kind: input, shape index: {}]   ;;  %s7537_s2 = inlined_call_operand.vmem [shape: f32[36], index: 2, kind: input, shape index: {}]   ;;  %s7538_s3 = inlined_call_operand.<no memory space> [shape: f32[1], index: 3, kind: input, shape index: {}]   ;;  %s7539_s4 = inlined_call_operand.hbm [shape: f32[1,16,16,128], index: 4, kind: input, shape index: {}]   ;;  %s7540_s5 = inlined_call_operand.vmem [shape: f32[1,12,12,128], index: 5, kind: output, shape index: {}]  }
   0x1   :  { %10 = sst [smem:[#allocation2]] %s7538_s3 }
   0x2   :  { %11 = vsyncpa [#allocation5], 0 }
   0x3   :  { %12 = vsyncpa [#allocation7], 0 }
   0x4   :  { %13 = vsyncpa [#allocation4], 0  ;;  %s4686_s20 = smov 0   ;;  %s4688_s21 = smov 0  }
   0x5   :  { %s4690_s22 = smov 0  }
   0x6 LB: > { %s198_s24 = sshll.u32 %s7536_s1, 4  ;;  %s3928_s25 = sadd.s32 4294967295, %s4645_s22   ;;  %s4645_s22 = sphi %s4690_s22, %s19_s22   ;;  %s4641_s21 = sphi %s4688_s21, %s7797_s21   ;;  %s4637_s20 = sphi %s4686_s20, %s7796_s20   ;;  %s199_s24 = int_to_ptr.vmem [resolvable:$true] %s198_s24 }
   0x7   : > { %p3930_p0 = scmp.ge.s32.totalorder %s4645_s22, 1  ;;  %p174_p1 = scmp.lt.s32.totalorder %s4645_s22, 3 }
   0x8   : > { %p4707_p2 = scmp.eq.s32.totalorder %s3928_s25, 0  ;;  %s28_s28 = sadd.s32 1, %s4641_s21 }
   0x9   : > { %p4711_p3 = pnand %p3930_p0, %p174_p1  ;;  %s187_s6 = sshll.u32 %s7535_s0, 4  ;;  %s188_s6 = int_to_ptr.vmem [resolvable:$true] %s187_s6 }
   0xa   : > { %s7612_s26 = scalar_select %p4707_p2, 1, 0 }
   0xb   : > { %s7613_s27 = scalar_select %p4711_p3, 1, 0 }
   0xc   : > { %p4133_p4 = pneg %p4711_p3  ;;  %p4727_p6 = scmp.ge.s32.totalorder %s28_s28, 2 }
   0xd   : > { %s209_s11 = sshll.u32 %s7537_s2, 4  ;;  %s4538_s12 = scalar_lea.vmem %s199_s24, 16  ;;  %s210_s11 = int_to_ptr.vmem [resolvable:$true] %s209_s11 }
   0xe   : > { %p4723_p5 = pnand %p4707_p2, %p4133_p4  ;;  %p4539_p7 = scmp.ne.s32.totalorder %s199_s24, %s4538_s12 }
   0xf   : > { %p4546_p11 = scmp.lt.s32.totalorder %s199_s24, %s199_s24  ;;  %p4547_p12 = scmp.lt.s32.totalorder %s4538_s12, %s4538_s12 }
  0x10   : > { %p4736_p8 = pneg %p4723_p5 }
  0x11   : > { %p4548_p13 = por %p4547_p12, %p4546_p11 }
  0x12   : > { %p4541_p9 = pnand %p4736_p8, %p4539_p7 }
  0x14   : > { %p4542_p10 = pneg %p4541_p9 }
  0x16   : > { %p4549_p0 = pnand %p4548_p13, %p4542_p10 }
  0x18   : > { %4552 = shalt.err (!%p4549_p0)
}
  0x19   : > { %s4647_s14 = smov [#allocation6]   ;;  %s7799_s28 = smov (%p4727_p6, %s28_s28), 0 }
  0x1a   : > { %4139 = dma.vmem_to_smem (!%p4723_p5), %s199_s24, 16, %s4647_s14, [#allocation7]  }
  0x1b   : > { %s4553_s15 = scalar_lea.vmem %s188_s6, 16  ;;  %p4561_p9 = scmp.lt.s32.totalorder %s188_s6, %s188_s6 }
  0x1c   : > { %p4554_p1 = scmp.ne.s32.totalorder %s188_s6, %s4553_s15  ;;  %p4562_p2 = scmp.lt.s32.totalorder %s4553_s15, %s4553_s15 }
  0x1e   : > { %p4556_p4 = pnand %p4554_p1, %p4736_p8  ;;  %p4563_p3 = por %p4562_p2, %p4561_p9 }
  0x20   : > { %p4557_p7 = pneg %p4556_p4 }
  0x22   : > { %p4564_p11 = pnand %p4563_p3, %p4557_p7 }
  0x24   : > { %4567 = shalt.err (!%p4564_p11)
}
  0x25   : > { %s4648_s16 = smov [#allocation3]   ;;  %s4568_s17 = scalar_lea.vmem %s210_s11, 16 }
  0x26   : > { %4136 = dma.vmem_to_smem (!%p4723_p5), %s188_s6, 16, %s4648_s16, [#allocation5]  }
  0x27   : > { %p4569_p10 = scmp.ne.s32.totalorder %s210_s11, %s4568_s17  ;;  %p4576_p13 = scmp.lt.s32.totalorder %s210_s11, %s210_s11 }
  0x28   : > { %p4577_p0 = scmp.lt.s32.totalorder %s4568_s17, %s4568_s17 }
  0x29   : > { %p4571_p6 = pnand %p4569_p10, %p4736_p8 }
  0x2a   : > { %p4578_p1 = por %p4577_p0, %p4576_p13 }
  0x2b   : > { %p4572_p12 = pneg %p4571_p6 }
  0x2d   : > { %p4579_p4 = pnand %p4578_p1, %p4572_p12 }
  0x2f   : > { %4582 = shalt.err (!%p4579_p4)
}
  0x30   : > { %s4649_s18 = smov [#allocation8]   ;;  %s4650_s19 = smov [#allocation9]  }
  0x31   : > { %4142 = dma.vmem_to_smem (!%p4723_p5), %s210_s11, 16, %s4649_s18, [#allocation7]  }
  0x32   : > { %s225_s3 = sshll.u32 %s4650_s19, 4  ;;  %s4583_s25 = scalar_lea.hbm %s7539_s4, 4096  ;;  %s226_s3 = int_to_ptr.vmem [resolvable:$true] %s225_s3 }
  0x33   : > { %p4584_p2 = scmp.ne.s32.totalorder %s7539_s4, %s4583_s25  ;;  %p4590_p9 = scmp.lt.u32.totalorder %s4583_s25, %s7539_s4 }
  0x35   : > { %p4586_p3 = pnand %p4584_p2, %p4736_p8 }
  0x37   : > { %p4587_p7 = pneg %p4586_p3 }
  0x39   : > { %p4592_p11 = pnand %p4590_p9, %p4587_p7 }
  0x3b   : > { %4595 = shalt.err (!%p4592_p11)
}
  0x3c   : > { %s4596_s9 = scalar_lea.vmem %s226_s3, 4096  ;;  %p4604_p13 = scmp.lt.s32.totalorder %s226_s3, %s226_s3 }
  0x3d   : > { %p4597_p10 = scmp.ne.s32.totalorder %s226_s3, %s4596_s9  ;;  %p4605_p0 = scmp.lt.s32.totalorder %s4596_s9, %s4596_s9 }
  0x3f   : > { %p4599_p6 = pnand %p4597_p10, %p4736_p8  ;;  %p4606_p1 = por %p4605_p0, %p4604_p13 }
  0x41   : > { %p4600_p12 = pneg %p4599_p6 }
  0x43   : > { %p4607_p4 = pnand %p4606_p1, %p4600_p12 }
  0x45   : > { %4610 = shalt.err (!%p4607_p4)
}
  0x46   : > { %s4651_s10 = smov 128   ;;  %s4652_s11 = smov 8  }
  0x47   : > { %4145 = dma.hbm_to_vmem [thread:$0]  (!%p4723_p5), %s7539_s4, 4096, %s226_s3, [#allocation4], %s4651_s10, %s4651_s10, %s4652_s11  }
  0x48   : > { %p7617_p2 = scmp.ne.s32.totalorder %s7613_s27, 0 }
  0x4a   : > { %241 = sbr.rel (%p7617_p2) target bundleno = 795 (0x31b), region = 40 }
  0x51   : > { %p7618_p3 = scmp.ne.s32.totalorder %s7612_s26, 0 }
  0x53   : > { %4624 = dma.done.wait (%p7618_p3), [#allocation5], 16  }
  0x54   : > { %4626 = vsyncadd (%p7618_p3), [#allocation5], 4294967280 }
  0x55   : > { %4628 = dma.done.wait (%p7618_p3), [#allocation7], 32  }
  0x56   : > { %4630 = vsyncadd (%p7618_p3), [#allocation7], 4294967264 }
  0x57   : > { %4632 = dma.done.wait (%p7618_p3), [#allocation4], 4096  }
  0x58   : > { %4634 = vsyncadd (%p7618_p3), [#allocation4], 4294963200 }
  0x59   : > { %259 = sfence }
  0x5a   : > { %s294_s27 = sld [smem:[#allocation3]]  ;;  %s3942_s7 = sld [smem:[#allocation3 + $0x1]]  ;;  %vm888_vm0 = vcmask 1046528   ;;  %vm956_vm1 = vcmask 1045504  }
  0x5b   : > { %s3943_s13 = sld [smem:[#allocation3 + $0x2]]  ;;  %s3944_s15 = sld [smem:[#allocation3 + $0x3]] }
  0x5c   : > { %s3945_s16 = sld [smem:[#allocation3 + $0x4]]  ;;  %s3946_s17 = sld [smem:[#allocation3 + $0x5]] }
  0x5d   : > { %s3947_s18 = sld [smem:[#allocation3 + $0x6]]  ;;  %s3948_s19 = sld [smem:[#allocation3 + $0x7]] }
  0x5e   : > { %s3949_s3 = sld [smem:[#allocation3 + $0x8]]  ;;  %s3980_s25 = sld [smem:[#allocation8 + $0x1]] }
  0x5f   : > { %s330_s23 = sld [smem:[#allocation6]]  ;;  %s3981_s29 = sld [smem:[#allocation8 + $0x2]] }
  0x60   : > { %s334_s24 = sld [smem:[#allocation8]]  ;;  %s3982_s30 = sld [smem:[#allocation8 + $0x3]]  ;;  %v391_v0 = vstv %s294_s27  ;;  %v4788_v1 = vstv %s3942_s7 }
  0x61   : > { %s3983_s6 = sld [smem:[#allocation8 + $0x4]]  ;;  %s3984_s8 = sld [smem:[#allocation8 + $0x5]]  ;;  %v4793_v2 = vstv %s3943_s13  ;;  %v4795_v3 = vstv %s3944_s15 }
  0x62   : > { %s4790_s26 = sld [smem:[#allocation2]]  ;;  %s4015_s9 = smul.u32 96, %s4637_s20  ;;  %v4797_v4 = vstv %s3945_s16  ;;  %v4799_v5 = vstv %s3946_s17 }
  0x63   : > { %7619 = vst [vmem:[#allocation13_spill] sm:$0xff] %v4799_v5  ;;  %v4803_v7 = vstv %s3947_s18  ;;  %v4805_v8 = vstv %s3948_s19  ;;  %s5388_s11 = sld [smem:[#allocation8 + $0x6]]  ;;  %s5396_s12 = sld [smem:[#allocation8 + $0x7]] }
  0x64   : > { %7620 = vst [vmem:[#allocation14_spill] sm:$0xff] %v4803_v7  ;;  %7621 = vst [vmem:[#allocation15_spill] sm:$0xff] %v4805_v8  ;;  %v4807_v9 = vstv %s3949_s3  ;;  %v4811_v11 = vstv %s3980_s25  ;;  %s4817_s10 = scalar_lea.vmem [#allocation9], %s4015_s9  ;;  %s5398_s14 = sld [smem:[#allocation8 + $0x8]] }
  0x65   : > { %v4801_v6 = vstv %s330_s23  ;;  %7622 = vst [vmem:[#allocation16_spill] sm:$0xff] %v4807_v9  ;;  %7624 = vst [vmem:[#allocation18_spill] sm:$0xff] %v4811_v11  ;;  %v4813_v12 = vstv %s3981_s29  ;;  %v375_v14 = vld [vmem:[%s4817_s10] sm:$0xff]  ;;  %v376_v15 = vld [vmem:[%s4817_s10 + $0x8] sm:$0x3f]  ;;  %s5459_s27 = sld [smem:[#allocation3 + $0x9]] }
  0x66   : > { %v4809_v10 = vstv %s334_s24  ;;  %7625 = vst [vmem:[#allocation19_spill] sm:$0xff] %v4813_v12  ;;  %v4815_v13 = vstv %s3982_s30  ;;  %v377_v16 = vld [vmem:[%s4817_s10 + $0x10] sm:$0xff]  ;;  %v378_v18 = vld [vmem:[%s4817_s10 + $0x18] sm:$0x3f]  ;;  %v392_v21 = vmul.f32 %v391_v0, %v375_v14  ;;  %v393_v22 = vmul.f32 %v391_v0, %v376_v15  ;;  %s5469_s7 = sld [smem:[#allocation3 + $0xa]]  ;;  %s5471_s13 = sld [smem:[#allocation6 + $0x1]] }
  0x67   : > { %7623 = vst [vmem:[#allocation17_spill] sm:$0xff] %v4809_v10  ;;  %7626 = vst [vmem:[#allocation20_spill] sm:$0xff] %v4815_v13  ;;  %v4822_v17 = vstv %s3983_s6  ;;  %v4826_v19 = vld [vmem:[%s4817_s10 + $0x20] sm:$0xff]  ;;  %v380_v20 = vld [vmem:[%s4817_s10 + $0x28] sm:$0x3f]  ;;  %v4829_v23 = vstv %s3984_s8  ;;  %v394_v27 = vmul.f32 %v391_v0, %v377_v16  ;;  %v395_v28 = vmul.f32 %v391_v0, %v378_v18  ;;  %s5477_s15 = sld [smem:[#allocation3 + $0xb]] }
  0x68   : > { %7627 = vst [vmem:[#allocation21_spill] sm:$0xff] %v4822_v17  ;;  %7628 = vst [vmem:[#allocation22_spill] sm:$0xff] %v4826_v19  ;;  %v4832_v24 = vld [vmem:[%s4817_s10 + $0x30] sm:$0xff]  ;;  %v382_v25 = vld [vmem:[%s4817_s10 + $0x38] sm:$0x3f]  ;;  %v396_v29 = vmul.f32 %v391_v0, %v4826_v19  ;;  %v4840_v30 = vmul.f32 %v4795_v3, %v377_v16  ;;  %v4843_v31 = vstv %s4790_s26  ;;  %v397_v35 = vmul.f32 %v391_v0, %v380_v20  ;;  %s5607_s16 = sld [smem:[#allocation3 + $0xc]] }
  0x69   : > { %7629 = vst [vmem:[#allocation23_spill] sm:$0xff] %v4829_v23  ;;  %v4836_v26 = vld [vmem:[%s4817_s10 + $0x40] sm:$0xff]  ;;  %7630 = vst [vmem:[#allocation24_spill] sm:$0xff] %v4843_v31  ;;  %v384_v32 = vld [vmem:[%s4817_s10 + $0x48] sm:$0x3f]  ;;  %v398_v36 = vmul.f32 %v391_v0, %v4832_v24  ;;  %v4853_v37 = vmul.f32 %v4795_v3, %v4826_v19  ;;  %v399_v41 = vmul.f32 %v391_v0, %v382_v25  ;;  %s5609_s17 = sld [smem:[#allocation3 + $0xd]] }
  0x6a   : > { %v4847_v33 = vld [vmem:[%s4817_s10 + $0x50] sm:$0xff]  ;;  %v386_v34 = vld [vmem:[%s4817_s10 + $0x58] sm:$0x3f]  ;;  %v4856_v38 = vld [vmem:[%s4817_s10 + $0x60] sm:$0xff]  ;;  %v400_v42 = vmul.f32 %v391_v0, %v4836_v26  ;;  %v401_v43 = vmul.f32 %v391_v0, %v384_v32  ;;  %v408_v51 = vadd.f32 %v392_v21, %v4801_v6  ;;  %v409_v52 = vadd.f32 %v393_v22, %v4801_v6  ;;  %s5615_s18 = sld [smem:[#allocation3 + $0xe]]  ;;  %s5617_s19 = sld [smem:[#allocation3 + $0xf]] }
  0x6b   : > { %v388_v39 = vld [vmem:[%s4817_s10 + $0x68] sm:$0x3f]  ;;  %v4860_v40 = vld [vmem:[%s4817_s10 + $0x70] sm:$0xff]  ;;  %v402_v44 = vmul.f32 %v391_v0, %v4847_v33  ;;  %v390_v45 = vld [vmem:[%s4817_s10 + $0x78] sm:$0x3f]  ;;  %v403_v46 = vmul.f32 %v391_v0, %v386_v34  ;;  %v404_v47 = vmul.f32 %v391_v0, %v4856_v38  ;;  %v410_v53 = vadd.f32 %v394_v27, %v4801_v6  ;;  %s5767_s3 = sld [smem:[#allocation3 + $0x10]] }
  0x6c   : > { %v405_v48 = vmul.f32 %v391_v0, %v388_v39  ;;  %v406_v49 = vmul.f32 %v391_v0, %v4860_v40  ;;  %v407_v50 = vmul.f32 %v391_v0, %v390_v45  ;;  %v424_v54 = vld [vmem:[%s4817_s10 + $0x1] sm:$0xff]  ;;  %v425_v55 = vld [vmem:[%s4817_s10 + $0x9] sm:$0x3f]  ;;  %v4873_v56 = vld [vmem:[%s4817_s10 + $0x11] sm:$0xff]  ;;  %v411_v57 = vadd.f32 %v395_v28, %v4801_v6  ;;  %s5769_s23 = sld [smem:[#allocation3 + $0x11]]  ;;  %s5777_s25 = sld [smem:[#allocation8 + $0xa]] }
  0x6d   : > { %v412_v58 = vadd.f32 %v396_v29, %v4801_v6  ;;  %v413_v59 = vadd.f32 %v397_v35, %v4801_v6  ;;  %v414_v60 = vadd.f32 %v398_v36, %v4801_v6  ;;  %v427_v61 = vld [vmem:[%s4817_s10 + $0x19] sm:$0x3f]  ;;  %v4881_v62 = vld [vmem:[%s4817_s10 + $0x21] sm:$0xff]  ;;  %v429_v63 = vld [vmem:[%s4817_s10 + $0x29] sm:$0x3f]  ;;  %v415_v0 = vadd.f32 %v399_v41, %v4801_v6  ;;  %s5775_s24 = sld [smem:[#allocation8 + $0x9]] }
  0x6e   : > { %v416_v14 = vadd.f32 %v400_v42, %v4801_v6  ;;  %v417_v15 = vadd.f32 %v401_v43, %v4801_v6  ;;  %v418_v16 = vadd.f32 %v402_v44, %v4801_v6  ;;  %v4889_v18 = vld [vmem:[%s4817_s10 + $0x31] sm:$0xff]  ;;  %v431_v20 = vld [vmem:[%s4817_s10 + $0x39] sm:$0x3f]  ;;  %v4893_v21 = vld [vmem:[%s4817_s10 + $0x41] sm:$0xff]  ;;  %v419_v22 = vadd.f32 %v403_v46, %v4801_v6  ;;  %s5953_s29 = sld [smem:[#allocation8 + $0xb]]  ;;  %s5971_s30 = sld [smem:[#allocation8 + $0xc]] }
  0x6f   : > { %v420_v25 = vadd.f32 %v404_v47, %v4801_v6  ;;  %v421_v27 = vadd.f32 %v405_v48, %v4801_v6  ;;  %v422_v28 = vadd.f32 %v406_v49, %v4801_v6  ;;  %v433_v29 = vld [vmem:[%s4817_s10 + $0x49] sm:$0x3f]  ;;  %v4901_v32 = vld [vmem:[%s4817_s10 + $0x51] sm:$0xff]  ;;  %v435_v34 = vld [vmem:[%s4817_s10 + $0x59] sm:$0x3f]  ;;  %v423_v35 = vadd.f32 %v407_v50, %v4801_v6  ;;  %s5992_s6 = sld [smem:[#allocation8 + $0xd]] }
  0x70   : > { %v4906_v36 = vld [vmem:[%s4817_s10 + $0x61] sm:$0xff]  ;;  %v437_v39 = vld [vmem:[%s4817_s10 + $0x69] sm:$0x3f]  ;;  %v4910_v41 = vld [vmem:[%s4817_s10 + $0x71] sm:$0xff]  ;;  %v441_v42 = vmul.f32 %v4788_v1, %v424_v54  ;;  %v442_v43 = vmul.f32 %v4788_v1, %v425_v55  ;;  %v443_v44 = vmul.f32 %v4788_v1, %v4873_v56  ;;  %v444_v46 = vmul.f32 %v4788_v1, %v427_v61  ;;  %s6010_s8 = sld [smem:[#allocation8 + $0xe]]  ;;  %s6047_s26 = sld [smem:[#allocation8 + $0xf]] }
  0x71   : > { %v439_v45 = vld [vmem:[%s4817_s10 + $0x79] sm:$0x3f]  ;;  %v445_v47 = vmul.f32 %v4788_v1, %v4881_v62  ;;  %v446_v6 = vmul.f32 %v4788_v1, %v429_v63  ;;  %v447_v48 = vmul.f32 %v4788_v1, %v4889_v18  ;;  %v448_v49 = vmul.f32 %v4788_v1, %v431_v20  ;;  %v473_v11 = vld [vmem:[%s4817_s10 + $0x2] sm:$0xff]  ;;  %s6049_s9 = sld [smem:[#allocation8 + $0x10]] }
  0x72   : > { %v449_v50 = vmul.f32 %v4788_v1, %v4893_v21  ;;  %v450_v54 = vmul.f32 %v4788_v1, %v433_v29  ;;  %v451_v55 = vmul.f32 %v4788_v1, %v4901_v32  ;;  %v452_v61 = vmul.f32 %v4788_v1, %v435_v34  ;;  %v474_v34 = vld [vmem:[%s4817_s10 + $0xa] sm:$0x3f]  ;;  %v4939_v31 = vld [vmem:[%s4817_s10 + $0x12] sm:$0xff]  ;;  %v476_v7 = vld [vmem:[%s4817_s10 + $0x1a] sm:$0x3f] }
  0x73   : > { %v453_v63 = vmul.f32 %v4788_v1, %v4906_v36  ;;  %v454_v23 = vmul.f32 %v4788_v1, %v437_v39  ;;  %v455_v20 = vmul.f32 %v4788_v1, %v4910_v41  ;;  %v456_v17 = vmul.f32 %v4788_v1, %v439_v45  ;;  %7631 = vst [vmem:[#allocation25_spill] sm:$0xff] %v4939_v31  ;;  %v4943_v19 = vld [vmem:[%s4817_s10 + $0x22] sm:$0xff]  ;;  %v478_v1 = vld [vmem:[%s4817_s10 + $0x2a] sm:$0x3f] }
  0x74   : > { %v457_v13 = vadd.f32 %v441_v42, %v408_v51  ;;  %v458_v29 = vadd.f32 %v442_v43, %v409_v52  ;;  %v459_v12 = vadd.f32 %v443_v44, %v410_v53  ;;  %v460_v10 = vadd.f32 %v444_v46, %v411_v57  ;;  %7632 = vst [vmem:[#allocation26_spill] sm:$0xff] %v4943_v19  ;;  %v4947_v43 = vld [vmem:[%s4817_s10 + $0x32] sm:$0xff]  ;;  %v480_v57 = vld [vmem:[%s4817_s10 + $0x3a] sm:$0x3f]  ;;  %v482_v46 = vld [vmem:[%s4817_s10 + $0x4a] sm:$0x3f] }
  0x75   : > { %v461_v9 = vadd.f32 %v445_v47, %v412_v58  ;;  %v462_v8 = vadd.f32 %v446_v6, %v413_v59  ;;  %v463_v39 = vadd.f32 %v447_v48, %v414_v60  ;;  %v464_v51 = vadd.f32 %v448_v49, %v415_v0  ;;  %7633 = vst [vmem:[#allocation27_spill] sm:$0xff] %v4947_v43  ;;  %v4951_v58 = vld [vmem:[%s4817_s10 + $0x42] sm:$0xff]  ;;  %v4955_v47 = vld [vmem:[%s4817_s10 + $0x52] sm:$0xff]  ;;  %v484_v6 = vld [vmem:[%s4817_s10 + $0x5a] sm:$0x3f] }
  0x76   : > { %v465_v52 = vadd.f32 %v449_v50, %v416_v14  ;;  %v466_v53 = vadd.f32 %v450_v54, %v417_v15  ;;  %v467_v42 = vadd.f32 %v451_v55, %v418_v16  ;;  %7634 = vst [vmem:[#allocation28_spill] sm:$0xff] %v4951_v58  ;;  %v468_v59 = vadd.f32 %v452_v61, %v419_v22  ;;  %v4959_v48 = vld [vmem:[%s4817_s10 + $0x62] sm:$0xff]  ;;  %v486_v14 = vld [vmem:[%s4817_s10 + $0x6a] sm:$0x3f]  ;;  %v4963_v15 = vld [vmem:[%s4817_s10 + $0x72] sm:$0xff] }
  0x77   : > { %v469_v60 = vadd.f32 %v453_v63, %v420_v25  ;;  %v470_v44 = vadd.f32 %v454_v23, %v421_v27  ;;  %v471_v45 = vadd.f32 %v455_v20, %v422_v28  ;;  %7635 = vst [vmem:[#allocation29_spill] sm:$0xff] %v4955_v47  ;;  %v472_v0 = vadd.f32 %v456_v17, %v423_v35  ;;  %v488_v25 = vld [vmem:[%s4817_s10 + $0x7a] sm:$0x3f] }
  0x78   : > { %7636 = vst [vmem:[#allocation30_spill] sm:$0xff] %v4959_v48  ;;  %7637 = vst [vmem:[#allocation31_spill] sm:$0xff] %v4963_v15  ;;  %v490_v16 = vmul.f32 %v4793_v2, %v473_v11  ;;  %v491_v49 = vmul.f32 %v4793_v2, %v474_v34  ;;  %v492_v22 = vmul.f32 %v4793_v2, %v4939_v31  ;;  %v4022_v31 = vld [vmem:[%s4817_s10 + $0x38] sm:$0x3f] }
  0x79   : > { %v493_v23 = vmul.f32 %v4793_v2, %v476_v7  ;;  %v494_v27 = vmul.f32 %v4793_v2, %v4943_v19  ;;  %v495_v17 = vmul.f32 %v4793_v2, %v478_v1  ;;  %v496_v28 = vmul.f32 %v4793_v2, %v4947_v43 }
  0x7a   : > { %v497_v35 = vmul.f32 %v4793_v2, %v480_v57  ;;  %v498_v11 = vmul.f32 %v4793_v2, %v4951_v58  ;;  %v499_v50 = vmul.f32 %v4793_v2, %v482_v46  ;;  %v500_v7 = vmul.f32 %v4793_v2, %v4955_v47 }
  0x7b   : > { %v501_v54 = vmul.f32 %v4793_v2, %v484_v6  ;;  %v502_v55 = vmul.f32 %v4793_v2, %v4959_v48  ;;  %v503_v61 = vmul.f32 %v4793_v2, %v486_v14  ;;  %v504_v63 = vmul.f32 %v4793_v2, %v4963_v15  ;;  %v4018_v48 = vld [vmem:[%s4817_s10 + $0x18] sm:$0x3f]  ;;  %v4020_v14 = vld [vmem:[%s4817_s10 + $0x28] sm:$0x3f] }
  0x7c   : > { %v505_v20 = vmul.f32 %v4793_v2, %v488_v25  ;;  %v506_v34 = vadd.f32 %v490_v16, %v457_v13  ;;  %v507_v1 = vadd.f32 %v491_v49, %v458_v29  ;;  %v508_v57 = vadd.f32 %v492_v22, %v459_v12  ;;  %v4024_v2 = vld [vmem:[%s4817_s10 + $0x48] sm:$0x3f]  ;;  %v4026_v16 = vld [vmem:[%s4817_s10 + $0x58] sm:$0x3f] }
  0x7d   : > { %v509_v46 = vadd.f32 %v493_v23, %v460_v10  ;;  %v510_v47 = vadd.f32 %v494_v27, %v461_v9  ;;  %v511_v6 = vadd.f32 %v495_v17, %v462_v8  ;;  %v512_v58 = vadd.f32 %v496_v28, %v463_v39  ;;  %v4028_v9 = vld [vmem:[%s4817_s10 + $0x68] sm:$0x3f]  ;;  %v4030_v8 = vld [vmem:[%s4817_s10 + $0x78] sm:$0x3f]  ;;  %v4997_v39 = vld [vmem:[%s4817_s10 + $0x80] sm:$0xff] }
  0x7e   : > { %v513_v43 = vadd.f32 %v497_v35, %v464_v51  ;;  %v514_v19 = vadd.f32 %v498_v11, %v465_v52  ;;  %v515_v15 = vadd.f32 %v499_v50, %v466_v53  ;;  %v516_v5 = vadd.f32 %v500_v7, %v467_v42  ;;  %v4032_v22 = vld [vmem:[%s4817_s10 + $0x88] sm:$0x3f] }
  0x7f   : > { %v517_v13 = vadd.f32 %v501_v54, %v468_v59  ;;  %v518_v29 = vadd.f32 %v502_v55, %v469_v60  ;;  %v519_v12 = vadd.f32 %v503_v61, %v470_v44  ;;  %v520_v10 = vadd.f32 %v504_v63, %v471_v45  ;;  %v4034_v63 = vld [vmem:[%s4817_s10 + $0x19] sm:$0x3f] }
  0x80   : > { %v521_v49 = vadd.f32 %v505_v20, %v472_v0  ;;  %v543_v25 = vmul.f32 %v4018_v48, %v4795_v3  ;;  %v545_v51 = vmul.f32 %v4020_v14, %v4795_v3  ;;  %v546_v52 = vmul.f32 %v4795_v3, %v4832_v24 }
  0x81   : > { %v547_v53 = vmul.f32 %v4022_v31, %v4795_v3  ;;  %v548_v42 = vmul.f32 %v4795_v3, %v4836_v26  ;;  %v549_v59 = vmul.f32 %v4024_v2, %v4795_v3  ;;  %v550_v60 = vmul.f32 %v4795_v3, %v4847_v33  ;;  %v4040_v2 = vld [vmem:[%s4817_s10 + $0x49] sm:$0x3f] }
  0x82   : > { %v551_v44 = vmul.f32 %v4026_v16, %v4795_v3  ;;  %v552_v45 = vmul.f32 %v4795_v3, %v4856_v38  ;;  %v553_v0 = vmul.f32 %v4028_v9, %v4795_v3  ;;  %v554_v31 = vmul.f32 %v4795_v3, %v4860_v40  ;;  %v4048_v16 = vld [vmem:[%s4817_s10 + $0x89] sm:$0x3f] }
  0x83   : > { %v555_v48 = vmul.f32 %v4030_v8, %v4795_v3  ;;  %v556_v23 = vmul.f32 %v4997_v39, %v4795_v3  ;;  %v557_v27 = vmul.f32 %v4032_v22, %v4795_v3  ;;  %v558_v17 = vadd.f32 %v4840_v30, %v506_v34  ;;  %v4036_v3 = vld [vmem:[%s4817_s10 + $0x29] sm:$0x3f] }
  0x84   : > { %v559_v28 = vadd.f32 %v543_v25, %v507_v1  ;;  %v560_v35 = vadd.f32 %v4853_v37, %v508_v57  ;;  %v561_v11 = vadd.f32 %v545_v51, %v509_v46  ;;  %v562_v50 = vadd.f32 %v546_v52, %v510_v47  ;;  %v4038_v1 = vld [vmem:[%s4817_s10 + $0x39] sm:$0x3f] }
  0x85   : > { %v563_v7 = vadd.f32 %v547_v53, %v511_v6  ;;  %v564_v54 = vadd.f32 %v548_v42, %v512_v58  ;;  %v565_v55 = vadd.f32 %v549_v59, %v513_v43  ;;  %v566_v61 = vadd.f32 %v550_v60, %v514_v19  ;;  %v4042_v46 = vld [vmem:[%s4817_s10 + $0x59] sm:$0x3f]  ;;  %v4044_v6 = vld [vmem:[%s4817_s10 + $0x69] sm:$0x3f]  ;;  %v5032_v19 = vld [vmem:[%s4817_s10 + $0x81] sm:$0xff] }
  0x86   : > { %v567_v20 = vadd.f32 %v551_v44, %v515_v15  ;;  %v568_v14 = vadd.f32 %v552_v45, %v516_v5  ;;  %v569_v30 = vadd.f32 %v553_v0, %v517_v13  ;;  %v570_v34 = vadd.f32 %v554_v31, %v518_v29  ;;  %v4046_v58 = vld [vmem:[%s4817_s10 + $0x79] sm:$0x3f] }
  0x87   : > { %v571_v37 = vadd.f32 %v555_v48, %v519_v12  ;;  %v572_v57 = vadd.f32 %v556_v23, %v520_v10  ;;  %v573_v47 = vadd.f32 %v557_v27, %v521_v49  ;;  %v591_v43 = vmul.f32 %v4797_v4, %v4873_v56  ;;  %v4050_v27 = vld [vmem:[%s4817_s10 + $0x1a] sm:$0x3f] }
  0x88   : > { %v592_v9 = vmul.f32 %v4034_v63, %v4797_v4  ;;  %v593_v5 = vmul.f32 %v4797_v4, %v4881_v62  ;;  %v594_v15 = vmul.f32 %v4036_v3, %v4797_v4  ;;  %v595_v13 = vmul.f32 %v4797_v4, %v4889_v18  ;;  %v4052_v63 = vld [vmem:[%s4817_s10 + $0x2a] sm:$0x3f] }
  0x89   : > { %v596_v29 = vmul.f32 %v4038_v1, %v4797_v4  ;;  %v597_v12 = vmul.f32 %v4797_v4, %v4893_v21  ;;  %v598_v56 = vmul.f32 %v4040_v2, %v4797_v4  ;;  %v599_v10 = vmul.f32 %v4797_v4, %v4901_v32  ;;  %v4054_v2 = vld [vmem:[%s4817_s10 + $0x3a] sm:$0x3f] }
  0x8a   : > { %v600_v49 = vmul.f32 %v4042_v46, %v4797_v4  ;;  %v601_v8 = vmul.f32 %v4797_v4, %v4906_v36  ;;  %v602_v22 = vmul.f32 %v4044_v6, %v4797_v4  ;;  %v603_v25 = vmul.f32 %v4797_v4, %v4910_v41  ;;  %v4058_v46 = vld [vmem:[%s4817_s10 + $0x5a] sm:$0x3f]  ;;  %v7638_v6 = vld [vmem:[#allocation25_spill] sm:$0xff] }
  0x8b   : > { %v604_v51 = vmul.f32 %v4046_v58, %v4797_v4  ;;  %v605_v52 = vmul.f32 %v5032_v19, %v4797_v4  ;;  %v606_v53 = vmul.f32 %v4048_v16, %v4797_v4  ;;  %v607_v42 = vadd.f32 %v591_v43, %v558_v17  ;;  %v4062_v43 = vld [vmem:[%s4817_s10 + $0x7a] sm:$0x3f]  ;;  %v4064_v58 = vld [vmem:[%s4817_s10 + $0x8a] sm:$0x3f] }
  0x8c   : > { %v608_v59 = vadd.f32 %v592_v9, %v559_v28  ;;  %v609_v60 = vadd.f32 %v593_v5, %v560_v35  ;;  %v610_v44 = vadd.f32 %v594_v15, %v561_v11  ;;  %v611_v45 = vadd.f32 %v595_v13, %v562_v50  ;;  %v4056_v28 = vld [vmem:[%s4817_s10 + $0x4a] sm:$0x3f]  ;;  %v7644_v15 = vld [vmem:[#allocation29_spill] sm:$0xff] }
  0x8d   : > { %v612_v0 = vadd.f32 %v596_v29, %v563_v7  ;;  %v613_v31 = vadd.f32 %v597_v12, %v564_v54  ;;  %v614_v48 = vadd.f32 %v598_v56, %v565_v55  ;;  %v615_v23 = vadd.f32 %v599_v10, %v566_v61  ;;  %v4060_v7 = vld [vmem:[%s4817_s10 + $0x6a] sm:$0x3f]  ;;  %v7639_v54 = vld [vmem:[#allocation13_spill] sm:$0xff] }
  0x8e   : > { %v616_v3 = vadd.f32 %v600_v49, %v567_v20  ;;  %v617_v4 = vadd.f32 %v601_v8, %v568_v14  ;;  %v618_v1 = vadd.f32 %v602_v22, %v569_v30  ;;  %v619_v17 = vadd.f32 %v603_v25, %v570_v34  ;;  %v5067_v61 = vld [vmem:[%s4817_s10 + $0x82] sm:$0xff]  ;;  %v7642_v34 = vld [vmem:[#allocation27_spill] sm:$0xff] }
  0x8f   : > { %v620_v35 = vadd.f32 %v604_v51, %v571_v37  ;;  %v621_v11 = vadd.f32 %v605_v52, %v572_v57  ;;  %v622_v50 = vadd.f32 %v606_v53, %v573_v47  ;;  %v640_v55 = vmul.f32 %v7639_v54, %v7638_v6  ;;  %7640 = vst [vmem:[#allocation25_spill] sm:$0xff] %v5067_v61  ;;  %v7641_v20 = vld [vmem:[#allocation26_spill] sm:$0xff]  ;;  %v7643_v47 = vld [vmem:[#allocation28_spill] sm:$0xff]  ;;  %v7646_v49 = vld [vmem:[#allocation31_spill] sm:$0xff] }
  0x90   : > { %v641_v16 = vmul.f32 %v4050_v27, %v7639_v54  ;;  %v642_v14 = vmul.f32 %v7639_v54, %v7641_v20  ;;  %v643_v30 = vmul.f32 %v4052_v63, %v7639_v54  ;;  %v644_v37 = vmul.f32 %v7639_v54, %v7642_v34  ;;  %v7645_v12 = vld [vmem:[#allocation30_spill] sm:$0xff] }
  0x91   : > { %v645_v57 = vmul.f32 %v4054_v2, %v7639_v54  ;;  %v646_v9 = vmul.f32 %v7639_v54, %v7643_v47  ;;  %v647_v5 = vmul.f32 %v4056_v28, %v7639_v54  ;;  %v648_v13 = vmul.f32 %v7639_v54, %v7644_v15 }
  0x92   : > { %v649_v29 = vmul.f32 %v4058_v46, %v7639_v54  ;;  %v650_v56 = vmul.f32 %v7639_v54, %v7645_v12  ;;  %v651_v10 = vmul.f32 %v4060_v7, %v7639_v54  ;;  %v652_v8 = vmul.f32 %v7639_v54, %v7646_v49 }
  0x93   : > { %v653_v22 = vmul.f32 %v4062_v43, %v7639_v54  ;;  %v654_v25 = vmul.f32 %v5067_v61, %v7639_v54  ;;  %v655_v51 = vmul.f32 %v4064_v58, %v7639_v54  ;;  %v656_v52 = vadd.f32 %v640_v55, %v607_v42  ;;  %v4067_v43 = vld [vmem:[%s4817_s10 + $0x28] sm:$0x3f]  ;;  %v4069_v61 = vld [vmem:[%s4817_s10 + $0x38] sm:$0x3f] }
  0x94   : > { %v657_v53 = vadd.f32 %v641_v16, %v608_v59  ;;  %v658_v27 = vadd.f32 %v642_v14, %v609_v60  ;;  %v659_v63 = vadd.f32 %v643_v30, %v610_v44  ;;  %v660_v2 = vadd.f32 %v644_v37, %v611_v45  ;;  %v4071_v55 = vld [vmem:[%s4817_s10 + $0x48] sm:$0x3f]  ;;  %v4073_v59 = vld [vmem:[%s4817_s10 + $0x58] sm:$0x3f] }
  0x95   : > { %v661_v28 = vadd.f32 %v645_v57, %v612_v0  ;;  %v662_v46 = vadd.f32 %v646_v9, %v613_v31  ;;  %v663_v7 = vadd.f32 %v647_v5, %v614_v48  ;;  %v664_v6 = vadd.f32 %v648_v13, %v615_v23  ;;  %v4075_v16 = vld [vmem:[%s4817_s10 + $0x68] sm:$0x3f]  ;;  %v4077_v0 = vld [vmem:[%s4817_s10 + $0x78] sm:$0x3f]  ;;  %v4080_v23 = vld [vmem:[%s4817_s10 + $0x90] sm:$0xff] }
  0x96   : > { %v665_v49 = vadd.f32 %v649_v29, %v616_v3  ;;  %v666_v54 = vadd.f32 %v650_v56, %v617_v4  ;;  %v667_v58 = vadd.f32 %v651_v10, %v618_v1  ;;  %v668_v42 = vadd.f32 %v652_v8, %v619_v17  ;;  %v7647_v14 = vld [vmem:[#allocation22_spill] sm:$0xff]  ;;  %v4081_v37 = vld [vmem:[%s4817_s10 + $0x98] sm:$0x3f] }
  0x97   : > { %v669_v60 = vadd.f32 %v653_v22, %v620_v35  ;;  %v670_v44 = vadd.f32 %v654_v25, %v621_v11  ;;  %v671_v45 = vadd.f32 %v655_v51, %v622_v50  ;;  %v7648_v31 = vld [vmem:[#allocation14_spill] sm:$0xff] }
  0x98   : > { %v692_v48 = vmul.f32 %v7648_v31, %v7647_v14  ;;  %v4079_v30 = vld [vmem:[%s4817_s10 + $0x88] sm:$0x3f]  ;;  %v693_v57 = vmul.f32 %v4067_v43, %v7648_v31  ;;  %v694_v3 = vmul.f32 %v7648_v31, %v4832_v24  ;;  %v695_v4 = vmul.f32 %v4069_v61, %v7648_v31  ;;  %v4085_v43 = vld [vmem:[%s4817_s10 + $0x39] sm:$0x3f] }
  0x99   : > { %v696_v1 = vmul.f32 %v7648_v31, %v4836_v26  ;;  %v697_v17 = vmul.f32 %v4071_v55, %v7648_v31  ;;  %v698_v35 = vmul.f32 %v7648_v31, %v4847_v33  ;;  %v699_v11 = vmul.f32 %v4073_v59, %v7648_v31  ;;  %v4083_v51 = vld [vmem:[%s4817_s10 + $0x29] sm:$0x3f] }
  0x9a   : > { %v700_v50 = vmul.f32 %v7648_v31, %v4856_v38  ;;  %v701_v9 = vmul.f32 %v4075_v16, %v7648_v31  ;;  %v702_v24 = vmul.f32 %v7648_v31, %v4860_v40  ;;  %v703_v61 = vmul.f32 %v4077_v0, %v7648_v31  ;;  %v4087_v0 = vld [vmem:[%s4817_s10 + $0x49] sm:$0x3f] }
  0x9b   : > { %v704_v26 = vmul.f32 %v4997_v39, %v7648_v31  ;;  %v705_v5 = vmul.f32 %v4079_v30, %v7648_v31  ;;  %v706_v33 = vmul.f32 %v4080_v23, %v7648_v31  ;;  %v707_v13 = vmul.f32 %v4081_v37, %v7648_v31  ;;  %v4091_v14 = vld [vmem:[%s4817_s10 + $0x69] sm:$0x3f] }
  0x9c   : > { %v708_v38 = vadd.f32 %v692_v48, %v656_v52  ;;  %v709_v29 = vadd.f32 %v693_v57, %v657_v53  ;;  %v710_v56 = vadd.f32 %v694_v3, %v658_v27  ;;  %v711_v10 = vadd.f32 %v695_v4, %v659_v63  ;;  %v4089_v53 = vld [vmem:[%s4817_s10 + $0x59] sm:$0x3f]  ;;  %v4095_v31 = vld [vmem:[%s4817_s10 + $0x89] sm:$0x3f] }
  0x9d   : > { %v712_v8 = vadd.f32 %v696_v1, %v660_v2  ;;  %v713_v40 = vadd.f32 %v697_v17, %v661_v28  ;;  %v714_v22 = vadd.f32 %v698_v35, %v662_v46  ;;  %v715_v25 = vadd.f32 %v699_v11, %v663_v7  ;;  %v4093_v28 = vld [vmem:[%s4817_s10 + $0x79] sm:$0x3f]  ;;  %v7649_v46 = vld [vmem:[#allocation15_spill] sm:$0xff]  ;;  %v4099_v17 = vld [vmem:[%s4817_s10 + $0x2a] sm:$0x3f] }
  0x9e   : > { %v716_v39 = vadd.f32 %v700_v50, %v664_v6  ;;  %v717_v55 = vadd.f32 %v701_v9, %v665_v49  ;;  %v718_v59 = vadd.f32 %v702_v24, %v666_v54  ;;  %v719_v16 = vadd.f32 %v703_v61, %v667_v58  ;;  %v4096_v6 = vld [vmem:[%s4817_s10 + $0x91] sm:$0xff]  ;;  %v4097_v48 = vld [vmem:[%s4817_s10 + $0x99] sm:$0x3f]  ;;  %v4103_v24 = vld [vmem:[%s4817_s10 + $0x4a] sm:$0x3f] }
  0x9f   : > { %v720_v52 = vadd.f32 %v704_v26, %v668_v42  ;;  %v721_v27 = vadd.f32 %v705_v5, %v669_v60  ;;  %v722_v63 = vadd.f32 %v706_v33, %v670_v44  ;;  %v723_v2 = vadd.f32 %v707_v13, %v671_v45  ;;  %v4101_v9 = vld [vmem:[%s4817_s10 + $0x3a] sm:$0x3f] }
  0xa0   : > { %v741_v7 = vmul.f32 %v7649_v46, %v4881_v62  ;;  %v742_v30 = vmul.f32 %v4083_v51, %v7649_v46  ;;  %v743_v49 = vmul.f32 %v7649_v46, %v4889_v18  ;;  %v744_v54 = vmul.f32 %v4085_v43, %v7649_v46  ;;  %v4105_v13 = vld [vmem:[%s4817_s10 + $0x5a] sm:$0x3f] }
  0xa1   : > { %v745_v58 = vmul.f32 %v7649_v46, %v4893_v21  ;;  %v746_v42 = vmul.f32 %v4087_v0, %v7649_v46  ;;  %v747_v60 = vmul.f32 %v7649_v46, %v4901_v32  ;;  %v748_v62 = vmul.f32 %v4089_v53, %v7649_v46  ;;  %v4109_v51 = vld [vmem:[%s4817_s10 + $0x7a] sm:$0x3f] }
  0xa2   : > { %v749_v44 = vmul.f32 %v7649_v46, %v4906_v36  ;;  %v750_v45 = vmul.f32 %v4091_v14, %v7649_v46  ;;  %v751_v18 = vmul.f32 %v7649_v46, %v4910_v41  ;;  %v752_v23 = vmul.f32 %v4093_v28, %v7649_v46  ;;  %v4112_v28 = vld [vmem:[%s4817_s10 + $0x92] sm:$0xff] }
  0xa3   : > { %v753_v21 = vmul.f32 %v5032_v19, %v7649_v46  ;;  %v754_v37 = vmul.f32 %v4095_v31, %v7649_v46  ;;  %v755_v32 = vmul.f32 %v4096_v6, %v7649_v46  ;;  %v756_v57 = vmul.f32 %v4097_v48, %v7649_v46  ;;  %v4113_v46 = vld [vmem:[%s4817_s10 + $0x9a] sm:$0x3f] }
  0xa4   : > { %v757_v3 = vadd.f32 %v741_v7, %v708_v38  ;;  %v758_v36 = vadd.f32 %v742_v30, %v709_v29  ;;  %v759_v4 = vadd.f32 %v743_v49, %v710_v56  ;;  %v760_v1 = vadd.f32 %v744_v54, %v711_v10  ;;  %v4107_v38 = vld [vmem:[%s4817_s10 + $0x6a] sm:$0x3f]  ;;  %v7650_v56 = vld [vmem:[#allocation16_spill] sm:$0xff] }
  0xa5   : > { %v761_v41 = vadd.f32 %v745_v58, %v712_v8  ;;  %v762_v35 = vadd.f32 %v746_v42, %v713_v40  ;;  %v763_v11 = vadd.f32 %v747_v60, %v714_v22  ;;  %v764_v50 = vadd.f32 %v748_v62, %v715_v25  ;;  %v4111_v22 = vld [vmem:[%s4817_s10 + $0x8a] sm:$0x3f] }
  0xa6   : > { %v765_v19 = vadd.f32 %v749_v44, %v716_v39  ;;  %v766_v61 = vadd.f32 %v750_v45, %v717_v55  ;;  %v767_v26 = vadd.f32 %v751_v18, %v718_v59  ;;  %v768_v5 = vadd.f32 %v752_v23, %v719_v16 }
  0xa7   : > { %v769_v33 = vadd.f32 %v753_v21, %v720_v52  ;;  %v770_v29 = vadd.f32 %v754_v37, %v721_v27  ;;  %v790_v10 = vmul.f32 %v7650_v56, %v7641_v20  ;;  %v791_v8 = vmul.f32 %v4099_v17, %v7650_v56  ;;  %v7651_v52 = vld [vmem:[#allocation31_spill] sm:$0xff] }
  0xa8   : > { %v792_v40 = vmul.f32 %v7650_v56, %v7642_v34  ;;  %v793_v25 = vmul.f32 %v4101_v9, %v7650_v56  ;;  %v794_v39 = vmul.f32 %v7650_v56, %v7643_v47  ;;  %v795_v43 = vmul.f32 %v4103_v24, %v7650_v56  ;;  %v7652_v47 = vld [vmem:[#allocation25_spill] sm:$0xff] }
  0xa9   : > { %v796_v55 = vmul.f32 %v7650_v56, %v7644_v15  ;;  %v797_v20 = vmul.f32 %v4105_v13, %v7650_v56  ;;  %v798_v59 = vmul.f32 %v7650_v56, %v7645_v12  ;;  %v799_v16 = vmul.f32 %v4107_v38, %v7650_v56  ;;  %v7653_v9 = vld [vmem:[#allocation17_spill] sm:$0xff] }
  0xaa   : > { %v800_v34 = vmul.f32 %v7650_v56, %v7651_v52  ;;  %v771_v0 = vadd.f32 %v755_v32, %v722_v63  ;;  %v772_v53 = vadd.f32 %v756_v57, %v723_v2  ;;  %v801_v27 = vmul.f32 %v4109_v51, %v7650_v56 }
  0xab   : > { %v802_v14 = vmul.f32 %v7652_v47, %v7650_v56  ;;  %v803_v15 = vmul.f32 %v4111_v22, %v7650_v56  ;;  %v806_v7 = vadd.f32 %v790_v10, %v757_v3  ;;  %v807_v31 = vadd.f32 %v791_v8, %v758_v36  ;;  %v7654_v22 = vld [vmem:[#allocation24_spill] sm:$0xff] }
  0xac   : > { %v808_v6 = vadd.f32 %v792_v40, %v759_v4  ;;  %v809_v12 = vadd.f32 %v793_v25, %v760_v1  ;;  %v810_v48 = vadd.f32 %v794_v39, %v761_v41  ;;  %v811_v30 = vadd.f32 %v795_v43, %v762_v35 }
  0xad   : > { %v812_v49 = vadd.f32 %v796_v55, %v763_v11  ;;  %v813_v54 = vadd.f32 %v797_v20, %v764_v50  ;;  %v814_v58 = vadd.f32 %v798_v59, %v765_v19  ;;  %v815_v63 = vadd.f32 %v799_v16, %v766_v61 }
  0xae   : > { %v816_v2 = vadd.f32 %v800_v34, %v767_v26  ;;  %v804_v42 = vmul.f32 %v4112_v28, %v7650_v56  ;;  %v805_v60 = vmul.f32 %v4113_v46, %v7650_v56  ;;  %v817_v62 = vadd.f32 %v801_v27, %v768_v5  ;;  %v7655_v27 = vld [vmem:[#allocation18_spill] sm:$0xff] }
  0xaf   : > { %v818_v44 = vadd.f32 %v802_v14, %v769_v33  ;;  %v819_v45 = vadd.f32 %v803_v15, %v770_v29  ;;  %v5188_v18 = vmax.f32 %v806_v7, 0.0  ;;  %v5190_v23 = vmax.f32 %v807_v31, 0.0 }
  0xb0   : > { %v5192_v21 = vmax.f32 %v808_v6, 0.0  ;;  %v5194_v37 = vmax.f32 %v809_v12, 0.0  ;;  %v5196_v32 = vmax.f32 %v810_v48, 0.0  ;;  %v5198_v57 = vmax.f32 %v811_v30, 0.0 }
  0xb1   : > { %v5200_v3 = vmax.f32 %v812_v49, 0.0  ;;  %v5202_v36 = vmax.f32 %v813_v54, 0.0  ;;  %v5204_v4 = vmax.f32 %v814_v58, 0.0  ;;  %v5206_v1 = vmax.f32 %v815_v63, 0.0 }
  0xb2   : > { %v5208_v41 = vmax.f32 %v816_v2, 0.0  ;;  %v820_v17 = vadd.f32 %v804_v42, %v771_v0  ;;  %v5210_v35 = vadd.f32 %v805_v60, %v772_v53  ;;  %v5212_v11 = vmax.f32 %v817_v62, 0.0 }
  0xb3   : > { %v5214_v50 = vmax.f32 %v818_v44, 0.0  ;;  %v5216_v19 = vmax.f32 %v819_v45, 0.0  ;;  %v839_v24 = vmul.f32 %v7653_v9, %v5188_v18  ;;  %v840_v61 = vmul.f32 %v7653_v9, %v5190_v23 }
  0xb4   : > { %v841_v26 = vmul.f32 %v7653_v9, %v5192_v21  ;;  %v842_v5 = vmul.f32 %v7653_v9, %v5194_v37  ;;  %v843_v33 = vmul.f32 %v7653_v9, %v5196_v32  ;;  %v844_v13 = vmul.f32 %v7653_v9, %v5198_v57 }
  0xb5   : > { %v845_v38 = vmul.f32 %v7653_v9, %v5200_v3  ;;  %v846_v29 = vmul.f32 %v7653_v9, %v5202_v36  ;;  %v847_v51 = vmul.f32 %v7653_v9, %v5204_v4  ;;  %v848_v56 = vmul.f32 %v7653_v9, %v5206_v1 }
  0xb6   : > { %v849_v10 = vmul.f32 %v7653_v9, %v5208_v41  ;;  %v5240_v8 = vmax.f32 %v820_v17, 0.0  ;;  %v850_v40 = vmul.f32 %v7653_v9, %v5212_v11  ;;  %v851_v25 = vadd.f32 %v839_v24, %v7654_v22 }
  0xb7   : > { %v852_v39 = vadd.f32 %v840_v61, %v7654_v22  ;;  %v853_v43 = vadd.f32 %v841_v26, %v7654_v22  ;;  %v854_v55 = vadd.f32 %v842_v5, %v7654_v22  ;;  %v855_v20 = vadd.f32 %v843_v33, %v7654_v22 }
  0xb8   : > { %v856_v59 = vadd.f32 %v844_v13, %v7654_v22  ;;  %v857_v16 = vadd.f32 %v845_v38, %v7654_v22  ;;  %v858_v52 = vadd.f32 %v846_v29, %v7654_v22  ;;  %v859_v34 = vadd.f32 %v847_v51, %v7654_v22 }
  0xb9   : > { %v860_v0 = vadd.f32 %v848_v56, %v7654_v22  ;;  %v861_v53 = vadd.f32 %v849_v10, %v7654_v22  ;;  %v864_v47 = vmul.f32 %v7655_v27, %v5188_v18  ;;  %v865_v14 = vmul.f32 %v7655_v27, %v5190_v23 }
  0xba   : > { %v866_v28 = vmul.f32 %v7655_v27, %v5192_v21  ;;  %v867_v46 = vmul.f32 %v7655_v27, %v5194_v37  ;;  %v868_v15 = vmul.f32 %v7655_v27, %v5196_v32  ;;  %v869_v7 = vmul.f32 %v7655_v27, %v5198_v57 }
  0xbb   : > { %v870_v31 = vmul.f32 %v7655_v27, %v5200_v3  ;;  %v871_v6 = vmul.f32 %v7655_v27, %v5202_v36  ;;  %v872_v12 = vmul.f32 %v7655_v27, %v5204_v4  ;;  %v873_v48 = vmul.f32 %v7655_v27, %v5206_v1 }
  0xbc   : > { %v874_v30 = vmul.f32 %v7655_v27, %v5208_v41  ;;  %v875_v49 = vmul.f32 %v7655_v27, %v5212_v11  ;;  %v889_v54 = vrot.slane %v864_v47, 1  ;;  %v890_v58 = vrot.slane %v865_v14, 1 }
  0xbd   : > { %v892_v63 = vrot.slane %v866_v28, 1  ;;  %v893_v2 = vrot.slane %v867_v46, 1  ;;  %v895_v42 = vrot.slane %v868_v15, 1  ;;  %v896_v60 = vrot.slane %v869_v7, 1 }
  0xbe   : > { %v898_v62 = vrot.slane %v870_v31, 1  ;;  %v891_v44 = vsel %vm888_vm0, %v889_v54, %v890_v58  ;;  %v899_v45 = vrot.slane %v871_v6, 1  ;;  %v901_v17 = vrot.slane %v872_v12, 1  ;;  %v7656_v6 = vld [vmem:[#allocation19_spill] sm:$0xff] }
  0xbf   : > { %v902_v9 = vrot.slane %v873_v48, 1  ;;  %v894_v24 = vsel %vm888_vm0, %v892_v63, %v893_v2  ;;  %v897_v61 = vsel %vm888_vm0, %v895_v42, %v896_v60  ;;  %v904_v26 = vrot.slane %v874_v30, 1 }
  0xc0   : > { %v905_v5 = vrot.slane %v875_v49, 1  ;;  %v862_v33 = vadd.f32 %v850_v40, %v7654_v22  ;;  %v900_v13 = vsel %vm888_vm0, %v898_v62, %v899_v45  ;;  %v919_v29 = vadd.f32 %v891_v44, %v851_v25 }
  0xc1   : > { %v903_v38 = vsel %vm888_vm0, %v901_v17, %v902_v9  ;;  %v920_v56 = vadd.f32 %v890_v58, %v852_v39  ;;  %v921_v10 = vadd.f32 %v894_v24, %v853_v43  ;;  %v922_v27 = vadd.f32 %v893_v2, %v854_v55 }
  0xc2   : > { %v906_v51 = vsel %vm888_vm0, %v904_v26, %v905_v5  ;;  %v923_v47 = vadd.f32 %v897_v61, %v855_v20  ;;  %v924_v14 = vadd.f32 %v896_v60, %v856_v59  ;;  %v925_v28 = vadd.f32 %v900_v13, %v857_v16 }
  0xc3   : > { %v926_v46 = vadd.f32 %v899_v45, %v858_v52  ;;  %v927_v15 = vadd.f32 %v903_v38, %v859_v34  ;;  %v928_v7 = vadd.f32 %v902_v9, %v860_v0  ;;  %v929_v31 = vadd.f32 %v906_v51, %v861_v53 }
  0xc4   : > { %v932_v40 = vmul.f32 %v7656_v6, %v5188_v18  ;;  %v933_v22 = vmul.f32 %v7656_v6, %v5190_v23  ;;  %v934_v25 = vmul.f32 %v7656_v6, %v5192_v21  ;;  %v935_v39 = vmul.f32 %v7656_v6, %v5194_v37 }
  0xc5   : > { %v936_v43 = vmul.f32 %v7656_v6, %v5196_v32  ;;  %v937_v55 = vmul.f32 %v7656_v6, %v5198_v57  ;;  %v938_v20 = vmul.f32 %v7656_v6, %v5200_v3  ;;  %v939_v18 = vmul.f32 %v7656_v6, %v5202_v36 }
  0xc6   : > { %v940_v23 = vmul.f32 %v7656_v6, %v5204_v4  ;;  %v941_v59 = vmul.f32 %v7656_v6, %v5206_v1  ;;  %v942_v16 = vmul.f32 %v7656_v6, %v5208_v41  ;;  %v943_v52 = vmul.f32 %v7656_v6, %v5212_v11 }
  0xc7   : > { %v957_v34 = vrot.slane %v932_v40, 2  ;;  %v958_v0 = vrot.slane %v933_v22, 2  ;;  %v960_v53 = vrot.slane %v934_v25, 2  ;;  %v961_v12 = vrot.slane %v935_v39, 2 }
  0xc8   : > { %v963_v48 = vrot.slane %v936_v43, 2  ;;  %v964_v30 = vrot.slane %v937_v55, 2  ;;  %v966_v49 = vrot.slane %v938_v20, 2  ;;  %v967_v54 = vrot.slane %v939_v18, 2 }
  0xc9   : > { %v969_v58 = vrot.slane %v940_v23, 2  ;;  %v959_v63 = vsel %vm956_vm1, %v957_v34, %v958_v0  ;;  %v962_v2 = vsel %vm956_vm1, %v960_v53, %v961_v12  ;;  %v970_v42 = vrot.slane %v941_v59, 2 }
  0xca   : > { %v972_v60 = vrot.slane %v942_v16, 2  ;;  %v930_v62 = vadd.f32 %v905_v5, %v862_v33  ;;  %v965_v44 = vsel %vm956_vm1, %v963_v48, %v964_v30  ;;  %v968_v45 = vsel %vm956_vm1, %v966_v49, %v967_v54  ;;  %v7657_v33 = vld [vmem:[#allocation20_spill] sm:$0xff] }
  0xcb   : > { %v973_v17 = vrot.slane %v943_v52, 2  ;;  %v971_v9 = vsel %vm956_vm1, %v969_v58, %v970_v42  ;;  %v987_v24 = vadd.f32 %v959_v63, %v919_v29  ;;  %v988_v61 = vadd.f32 %v958_v0, %v920_v56 }
  0xcc   : > { %v989_v26 = vadd.f32 %v962_v2, %v921_v10  ;;  %v990_v38 = vadd.f32 %v961_v12, %v922_v27  ;;  %v991_v51 = vadd.f32 %v965_v44, %v923_v47  ;;  %v992_v6 = vadd.f32 %v964_v30, %v924_v14  ;;  %v7658_v30 = vld [vmem:[#allocation21_spill] sm:$0xff] }
  0xcd   : > { %v974_v13 = vsel %vm956_vm1, %v972_v60, %v973_v17  ;;  %v993_v40 = vadd.f32 %v968_v45, %v925_v28  ;;  %v994_v22 = vadd.f32 %v967_v54, %v926_v46  ;;  %v995_v25 = vadd.f32 %v971_v9, %v927_v15 }
  0xce   : > { %v996_v39 = vadd.f32 %v970_v42, %v928_v7  ;;  %v997_v5 = vadd.f32 %v974_v13, %v929_v31  ;;  %v1000_v43 = vmul.f32 %v7657_v33, %v5192_v21  ;;  %v1001_v55 = vmul.f32 %v7657_v33, %v5194_v37 }
  0xcf   : > { %v1002_v29 = vmul.f32 %v7657_v33, %v5196_v32  ;;  %v1003_v56 = vmul.f32 %v7657_v33, %v5198_v57  ;;  %v1004_v10 = vmul.f32 %v7657_v33, %v5200_v3  ;;  %v1005_v27 = vmul.f32 %v7657_v33, %v5202_v36 }
  0xd0   : > { %v1006_v47 = vmul.f32 %v7657_v33, %v5204_v4  ;;  %v1007_v14 = vmul.f32 %v7657_v33, %v5206_v1  ;;  %v1008_v28 = vmul.f32 %v7657_v33, %v5208_v41  ;;  %v1009_v46 = vmul.f32 %v7657_v33, %v5212_v11 }
  0xd1   : > { %v1010_v15 = vmul.f32 %v7657_v33, %v5214_v50  ;;  %v998_v7 = vadd.f32 %v973_v17, %v930_v62  ;;  %v1011_v31 = vmul.f32 %v7657_v33, %v5216_v19  ;;  %v1012_v20 = vadd.f32 %v1000_v43, %v987_v24 }
  0xd2   : > { %v1013_v18 = vadd.f32 %v1001_v55, %v988_v61  ;;  %v1014_v23 = vadd.f32 %v1002_v29, %v989_v26  ;;  %v1015_v59 = vadd.f32 %v1003_v56, %v990_v38  ;;  %v1016_v16 = vadd.f32 %v1004_v10, %v991_v51 }
  0xd3   : > { %v1017_v52 = vadd.f32 %v1005_v27, %v992_v6  ;;  %v1018_v34 = vadd.f32 %v1006_v47, %v993_v40  ;;  %v1019_v0 = vadd.f32 %v1007_v14, %v994_v22  ;;  %v1020_v53 = vadd.f32 %v1008_v28, %v995_v25 }
  0xd4   : > { %v1021_v12 = vadd.f32 %v1009_v46, %v996_v39  ;;  %v1022_v48 = vadd.f32 %v1010_v15, %v997_v5  ;;  %v1025_v49 = vmul.f32 %v7658_v30, %v5192_v21  ;;  %v1026_v54 = vmul.f32 %v7658_v30, %v5194_v37 }
  0xd5   : > { %v1027_v58 = vmul.f32 %v7658_v30, %v5196_v32  ;;  %v1028_v63 = vmul.f32 %v7658_v30, %v5198_v57  ;;  %v1029_v2 = vmul.f32 %v7658_v30, %v5200_v3  ;;  %v1030_v42 = vmul.f32 %v7658_v30, %v5202_v36 }
  0xd6   : > { %v1031_v60 = vmul.f32 %v7658_v30, %v5204_v4  ;;  %v1032_v62 = vmul.f32 %v7658_v30, %v5206_v1  ;;  %v1033_v44 = vmul.f32 %v7658_v30, %v5208_v41  ;;  %v1034_v45 = vmul.f32 %v7658_v30, %v5212_v11 }
  0xd7   : > { %v1035_v17 = vmul.f32 %v7658_v30, %v5214_v50  ;;  %v1036_v9 = vmul.f32 %v7658_v30, %v5216_v19  ;;  %v1049_v24 = vrot.slane %v1025_v49, 1  ;;  %v1050_v61 = vrot.slane %v1026_v54, 1 }
  0xd8   : > { %v1052_v26 = vrot.slane %v1027_v58, 1  ;;  %v1053_v13 = vrot.slane %v1028_v63, 1  ;;  %v1055_v38 = vrot.slane %v1029_v2, 1  ;;  %v1056_v51 = vrot.slane %v1030_v42, 1  ;;  %v7659_v42 = vld [vmem:[#allocation23_spill] sm:$0xff] }
  0xd9   : > { %v1058_v6 = vrot.slane %v1031_v60, 1  ;;  %v1051_v40 = vsel %vm888_vm0, %v1049_v24, %v1050_v61  ;;  %v1059_v22 = vrot.slane %v1032_v62, 1  ;;  %v1061_v25 = vrot.slane %v1033_v44, 1 }
  0xda   : > { %v1062_v39 = vrot.slane %v1034_v45, 1  ;;  %v1054_v5 = vsel %vm888_vm0, %v1052_v26, %v1053_v13  ;;  %v1057_v33 = vsel %vm888_vm0, %v1055_v38, %v1056_v51  ;;  %v1064_v43 = vrot.slane %v1035_v17, 1 }
  0xdb   : > { %v1065_v55 = vrot.slane %v1036_v9, 1  ;;  %v1023_v29 = vadd.f32 %v1011_v31, %v998_v7  ;;  %v1060_v56 = vsel %vm888_vm0, %v1058_v6, %v1059_v22  ;;  %v1079_v27 = vadd.f32 %v1051_v40, %v1012_v20 }
  0xdc   : > { %v1063_v10 = vsel %vm888_vm0, %v1061_v25, %v1062_v39  ;;  %v1080_v14 = vadd.f32 %v1050_v61, %v1013_v18  ;;  %v1081_v28 = vadd.f32 %v1054_v5, %v1014_v23  ;;  %v1082_v46 = vadd.f32 %v1053_v13, %v1015_v59 }
  0xdd   : > { %v1066_v47 = vsel %vm888_vm0, %v1064_v43, %v1065_v55  ;;  %v1083_v15 = vadd.f32 %v1057_v33, %v1016_v16  ;;  %v1084_v30 = vadd.f32 %v1056_v51, %v1017_v52  ;;  %v1085_v49 = vadd.f32 %v1060_v56, %v1018_v34 }
  0xde   : > { %v1086_v54 = vadd.f32 %v1059_v22, %v1019_v0  ;;  %v1087_v58 = vadd.f32 %v1063_v10, %v1020_v53  ;;  %v1088_v63 = vadd.f32 %v1062_v39, %v1021_v12  ;;  %v1089_v2 = vadd.f32 %v1066_v47, %v1022_v48 }
  0xdf   : > { %v1092_v7 = vmul.f32 %v7659_v42, %v5192_v21  ;;  %v1093_v31 = vmul.f32 %v7659_v42, %v5194_v37  ;;  %v1094_v20 = vmul.f32 %v7659_v42, %v5196_v32  ;;  %v1095_v18 = vmul.f32 %v7659_v42, %v5198_v57 }
  0xe0   : > { %v1096_v23 = vmul.f32 %v7659_v42, %v5200_v3  ;;  %v1097_v59 = vmul.f32 %v7659_v42, %v5202_v36  ;;  %v1098_v16 = vmul.f32 %v7659_v42, %v5204_v4  ;;  %v1099_v21 = vmul.f32 %v7659_v42, %v5206_v1 }
  0xe1   : > { %v1100_v37 = vmul.f32 %v7659_v42, %v5208_v41  ;;  %v1101_v52 = vmul.f32 %v7659_v42, %v5212_v11  ;;  %v1102_v34 = vmul.f32 %v7659_v42, %v5214_v50  ;;  %v1103_v0 = vmul.f32 %v7659_v42, %v5216_v19 }
  0xe2   : > { %v1116_v53 = vrot.slane %v1092_v7, 2  ;;  %v1117_v12 = vrot.slane %v1093_v31, 2  ;;  %v1119_v48 = vrot.slane %v1094_v20, 2  ;;  %v1120_v60 = vrot.slane %v1095_v18, 2 }
  0xe3   : > { %v1122_v62 = vrot.slane %v1096_v23, 2  ;;  %v1123_v44 = vrot.slane %v1097_v59, 2  ;;  %v1125_v45 = vrot.slane %v1098_v16, 2  ;;  %v1126_v17 = vrot.slane %v1099_v21, 2 }
  0xe4   : > { %v1128_v9 = vrot.slane %v1100_v37, 2  ;;  %v1118_v24 = vsel %vm956_vm1, %v1116_v53, %v1117_v12  ;;  %v1121_v61 = vsel %vm956_vm1, %v1119_v48, %v1120_v60  ;;  %v1129_v26 = vrot.slane %v1101_v52, 2 }
  0xe5   : > { %v1131_v13 = vrot.slane %v1102_v34, 2  ;;  %v1090_v38 = vadd.f32 %v1065_v55, %v1023_v29  ;;  %v1124_v51 = vsel %vm956_vm1, %v1122_v62, %v1123_v44  ;;  %v1127_v6 = vsel %vm956_vm1, %v1125_v45, %v1126_v17 }
  0xe6   : > { %v1132_v40 = vrot.slane %v1103_v0, 2  ;;  %v5405_v22 = vmax.f32 %v5210_v35, 0.0  ;;  %v1130_v25 = vsel %vm956_vm1, %v1128_v9, %v1129_v26  ;;  %v1146_v39 = vadd.f32 %v1118_v24, %v1079_v27 }
  0xe7   : > { %v1147_v5 = vadd.f32 %v1117_v12, %v1080_v14  ;;  %v1148_v43 = vadd.f32 %v1121_v61, %v1081_v28  ;;  %v1149_v56 = vadd.f32 %v1120_v60, %v1082_v46  ;;  %v1150_v10 = vadd.f32 %v1124_v51, %v1083_v15 }
  0xe8   : > { %v1133_v33 = vsel %vm956_vm1, %v1131_v13, %v1132_v40  ;;  %v1151_v47 = vadd.f32 %v1123_v44, %v1084_v30  ;;  %v1152_v55 = vadd.f32 %v1127_v6, %v1085_v49  ;;  %v1153_v29 = vadd.f32 %v1126_v17, %v1086_v54 }
  0xe9   : > { %v1154_v42 = vadd.f32 %v1130_v25, %v1087_v58  ;;  %v1155_v7 = vadd.f32 %v1129_v26, %v1088_v63  ;;  %v1156_v31 = vadd.f32 %v1133_v33, %v1089_v2  ;;  %v1157_v20 = vadd.f32 %v1132_v40, %v1090_v38 }
  0xea   : > { %v1158_v35 = vstv %s5388_s11  ;;  %v1183_v63 = vstv %s5396_s12  ;;  %v5422_v2 = vstv %s5398_s14  ;;  %s6054_s11 = sld [smem:[#allocation6 + $0x2]]  ;;  %s6056_s12 = sld [smem:[#allocation8 + $0x11]] }
  0xeb   : > { %v1159_v18 = vmul.f32 %v1158_v35, %v5196_v32  ;;  %v1160_v27 = vmul.f32 %v1158_v35, %v5198_v57  ;;  %v1161_v14 = vmul.f32 %v1158_v35, %v5200_v3  ;;  %v1162_v28 = vmul.f32 %v1158_v35, %v5202_v36  ;;  %s6117_s14 = sld [smem:[#allocation3 + $0x12]] }
  0xec   : > { %v1163_v46 = vmul.f32 %v1158_v35, %v5204_v4  ;;  %v1164_v15 = vmul.f32 %v1158_v35, %v5206_v1  ;;  %v1165_v30 = vmul.f32 %v1158_v35, %v5208_v41  ;;  %v1166_v49 = vmul.f32 %v1158_v35, %v5212_v11 }
  0xed   : > { %v1167_v54 = vmul.f32 %v1158_v35, %v5214_v50  ;;  %v1168_v58 = vmul.f32 %v1158_v35, %v5216_v19  ;;  %v1169_v23 = vmul.f32 %v1158_v35, %v5240_v8  ;;  %v1170_v59 = vmul.f32 %v1158_v35, %v5405_v22 }
  0xee   : > { %v1171_v16 = vadd.f32 %v1159_v18, %v1146_v39  ;;  %v1172_v21 = vadd.f32 %v1160_v27, %v1147_v5  ;;  %v1173_v37 = vadd.f32 %v1161_v14, %v1148_v43  ;;  %v1174_v52 = vadd.f32 %v1162_v28, %v1149_v56 }
  0xef   : > { %v1175_v34 = vadd.f32 %v1163_v46, %v1150_v10  ;;  %v1176_v0 = vadd.f32 %v1164_v15, %v1151_v47  ;;  %v1177_v53 = vadd.f32 %v1165_v30, %v1152_v55  ;;  %v1178_v12 = vadd.f32 %v1166_v49, %v1153_v29 }
  0xf0   : > { %v1179_v48 = vadd.f32 %v1167_v54, %v1154_v42  ;;  %v1180_v60 = vadd.f32 %v1168_v58, %v1155_v7  ;;  %v1184_v62 = vmul.f32 %v1183_v63, %v5196_v32  ;;  %v1185_v44 = vmul.f32 %v1183_v63, %v5198_v57 }
  0xf1   : > { %v1186_v45 = vmul.f32 %v1183_v63, %v5200_v3  ;;  %v1187_v17 = vmul.f32 %v1183_v63, %v5202_v36  ;;  %v1188_v9 = vmul.f32 %v1183_v63, %v5204_v4  ;;  %v1189_v24 = vmul.f32 %v1183_v63, %v5206_v1 }
  0xf2   : > { %v1190_v61 = vmul.f32 %v1183_v63, %v5208_v41  ;;  %v1191_v26 = vmul.f32 %v1183_v63, %v5212_v11  ;;  %v1192_v13 = vmul.f32 %v1183_v63, %v5214_v50  ;;  %v1193_v38 = vmul.f32 %v1183_v63, %v5216_v19 }
  0xf3   : > { %v1194_v51 = vmul.f32 %v1183_v63, %v5240_v8  ;;  %v5438_v6 = vmul.f32 %v1183_v63, %v5405_v22  ;;  %v1208_v40 = vrot.slane %v1184_v62, 1  ;;  %v1209_v25 = vrot.slane %v1185_v44, 1 }
  0xf4   : > { %v1211_v39 = vrot.slane %v1186_v45, 1  ;;  %v1212_v5 = vrot.slane %v1187_v17, 1  ;;  %v1214_v33 = vrot.slane %v1188_v9, 1  ;;  %v1215_v43 = vrot.slane %v1189_v24, 1 }
  0xf5   : > { %v1217_v56 = vrot.slane %v1190_v61, 1  ;;  %v1218_v10 = vrot.slane %v1191_v26, 1  ;;  %v1210_v47 = vsel %vm888_vm0, %v1208_v40, %v1209_v25  ;;  %v1220_v29 = vrot.slane %v1192_v13, 1 }
  0xf6   : > { %v1213_v55 = vsel %vm888_vm0, %v1211_v39, %v1212_v5  ;;  %v1221_v42 = vrot.slane %v1193_v38, 1  ;;  %v1216_v7 = vsel %vm888_vm0, %v1214_v33, %v1215_v43  ;;  %v1223_v18 = vrot.slane %v1194_v51, 1 }
  0xf7   : > { %v1219_v35 = vsel %vm888_vm0, %v1217_v56, %v1218_v10  ;;  %v1224_v27 = vrot.slane %v5438_v6, 1  ;;  %v1181_v14 = vadd.f32 %v1169_v23, %v1156_v31  ;;  %v1182_v28 = vadd.f32 %v1170_v59, %v1157_v20 }
  0xf8   : > { %v1222_v46 = vsel %vm888_vm0, %v1220_v29, %v1221_v42  ;;  %v1238_v15 = vadd.f32 %v1210_v47, %v1171_v16  ;;  %v1239_v49 = vadd.f32 %v1209_v25, %v1172_v21  ;;  %v1240_v54 = vadd.f32 %v1213_v55, %v1173_v37 }
  0xf9   : > { %v1225_v30 = vsel %vm888_vm0, %v1223_v18, %v1224_v27  ;;  %v1241_v58 = vadd.f32 %v1212_v5, %v1174_v52  ;;  %v1242_v63 = vadd.f32 %v1216_v7, %v1175_v34  ;;  %v1243_v62 = vadd.f32 %v1215_v43, %v1176_v0  ;;  %v4232_v7 = vld [vmem:[%s4817_s10] sm:$0xff]  ;;  %v4233_v18 = vld [vmem:[%s4817_s10 + $0x8] sm:$0x3f] }
  0xfa   : > { %v1244_v44 = vadd.f32 %v1219_v35, %v1177_v53  ;;  %v1245_v45 = vadd.f32 %v1218_v10, %v1178_v12  ;;  %v1246_v17 = vadd.f32 %v1222_v46, %v1179_v48  ;;  %v1247_v9 = vadd.f32 %v1221_v42, %v1180_v60  ;;  %v5520_v46 = vld [vmem:[%s4817_s10 + $0x10] sm:$0xff] }
  0xfb   : > { %v1251_v24 = vmul.f32 %v5422_v2, %v5196_v32  ;;  %v1252_v31 = vmul.f32 %v5422_v2, %v5198_v57  ;;  %v1253_v20 = vmul.f32 %v5422_v2, %v5200_v3  ;;  %v1254_v23 = vmul.f32 %v5422_v2, %v5202_v36 }
  0xfc   : > { %v1255_v59 = vmul.f32 %v5422_v2, %v5204_v4  ;;  %v1256_v16 = vmul.f32 %v5422_v2, %v5206_v1  ;;  %v1257_v32 = vmul.f32 %v5422_v2, %v5208_v41  ;;  %v1258_v57 = vmul.f32 %v5422_v2, %v5212_v11 }
  0xfd   : > { %v1259_v3 = vmul.f32 %v5422_v2, %v5214_v50  ;;  %v1260_v36 = vmul.f32 %v5422_v2, %v5216_v19  ;;  %v1261_v4 = vmul.f32 %v5422_v2, %v5240_v8  ;;  %v1262_v1 = vmul.f32 %v5422_v2, %v5405_v22 }
  0xfe   : > { %v1275_v41 = vrot.slane %v1251_v24, 2  ;;  %v1276_v21 = vrot.slane %v1252_v31, 2  ;;  %v1278_v11 = vrot.slane %v1253_v20, 2  ;;  %v1279_v37 = vrot.slane %v1254_v23, 2  ;;  %v5535_v24 = vld [vmem:[%s4817_s10 + $0x40] sm:$0xff] }
  0xff   : > { %v1281_v50 = vrot.slane %v1255_v59, 2  ;;  %v1282_v52 = vrot.slane %v1256_v16, 2  ;;  %v1284_v34 = vrot.slane %v1257_v32, 2  ;;  %v1285_v0 = vrot.slane %v1258_v57, 2  ;;  %7672 = vst [vmem:[#allocation17_spill] sm:$0xff] %v5535_v24  ;;  %v5540_v59 = vld [vmem:[%s4817_s10 + $0x50] sm:$0xff] }
 0x100   : > { %v1277_v19 = vsel %vm956_vm1, %v1275_v41, %v1276_v21  ;;  %v1287_v53 = vrot.slane %v1259_v3, 2  ;;  %v1280_v12 = vsel %vm956_vm1, %v1278_v11, %v1279_v37  ;;  %v1288_v48 = vrot.slane %v1260_v36, 2  ;;  %v4241_v20 = vld [vmem:[%s4817_s10 + $0x48] sm:$0x3f]  ;;  %7673 = vst [vmem:[#allocation24_spill] sm:$0xff] %v5540_v59  ;;  %v5545_v3 = vld [vmem:[%s4817_s10 + $0x60] sm:$0xff] }
 0x101   : > { %v1283_v8 = vsel %vm956_vm1, %v1281_v50, %v1282_v52  ;;  %v1290_v60 = vrot.slane %v1261_v4, 2  ;;  %v1248_v22 = vadd.f32 %v1225_v30, %v1181_v14  ;;  %v1249_v2 = vadd.f32 %v1224_v27, %v1182_v28  ;;  %v4235_v30 = vld [vmem:[%s4817_s10 + $0x18] sm:$0x3f]  ;;  %7674 = vst [vmem:[#allocation18_spill] sm:$0xff] %v5545_v3  ;;  %v4245_v4 = vld [vmem:[%s4817_s10 + $0x68] sm:$0x3f] }
 0x102   : > { %v1286_v61 = vsel %vm956_vm1, %v1284_v34, %v1285_v0  ;;  %v1291_v26 = vrot.slane %v1262_v1, 2  ;;  %v1289_v13 = vsel %vm956_vm1, %v1287_v53, %v1288_v48  ;;  %v5484_v38 = vadd.f32 %v1277_v19, %v1238_v15  ;;  %v4243_v32 = vld [vmem:[%s4817_s10 + $0x58] sm:$0x3f]  ;;  %v5550_v41 = vld [vmem:[%s4817_s10 + $0x70] sm:$0xff] }
 0x103   : > { %v5486_v51 = vadd.f32 %v1276_v21, %v1239_v49  ;;  %v5488_v6 = vadd.f32 %v1280_v12, %v1240_v54  ;;  %v5491_v25 = vadd.f32 %v1279_v37, %v1241_v58  ;;  %v5493_v39 = vadd.f32 %v1283_v8, %v1242_v63  ;;  %v5525_v54 = vld [vmem:[%s4817_s10 + $0x20] sm:$0xff]  ;;  %v4237_v63 = vld [vmem:[%s4817_s10 + $0x28] sm:$0x3f]  ;;  %7675 = vst [vmem:[#allocation19_spill] sm:$0xff] %v5550_v41  ;;  %v4247_v11 = vld [vmem:[%s4817_s10 + $0x78] sm:$0x3f] }
 0x104   : > { %7660 = vst [vmem:[#allocation13_spill] sm:$0xff] %v5484_v38  ;;  %v1292_v40 = vsel %vm956_vm1, %v1290_v60, %v1291_v26  ;;  %v5495_v5 = vadd.f32 %v1282_v52, %v1243_v62  ;;  %v5497_v33 = vadd.f32 %v1286_v61, %v1244_v44  ;;  %v5499_v43 = vadd.f32 %v1285_v0, %v1245_v45  ;;  %v5530_v44 = vld [vmem:[%s4817_s10 + $0x30] sm:$0xff] }
 0x105   : > { %7661 = vst [vmem:[#allocation26_spill] sm:$0xff] %v5486_v51  ;;  %7662 = vst [vmem:[#allocation27_spill] sm:$0xff] %v5488_v6  ;;  %v5501_v56 = vadd.f32 %v1289_v13, %v1246_v17  ;;  %v5503_v10 = vadd.f32 %v1288_v48, %v1247_v9  ;;  %v5505_v47 = vadd.f32 %v1292_v40, %v1248_v22  ;;  %v1317_v29 = vstv %s5471_s13  ;;  %v4239_v17 = vld [vmem:[%s4817_s10 + $0x38] sm:$0x3f]  ;;  %s6135_s13 = sld [smem:[#allocation3 + $0x15]] }
 0x106   : > { %7663 = vst [vmem:[#allocation28_spill] sm:$0xff] %v5491_v25  ;;  %7664 = vst [vmem:[#allocation29_spill] sm:$0xff] %v5493_v39  ;;  %v5507_v55 = vadd.f32 %v1291_v26, %v1249_v2  ;;  %v1318_v42 = vstv %s5459_s27  ;;  %v5514_v14 = vstv %s5469_s7  ;;  %v5517_v28 = vstv %s5477_s15  ;;  %s6127_s27 = sld [smem:[#allocation3 + $0x13]]  ;;  %s6129_s7 = sld [smem:[#allocation3 + $0x14]] }
 0x107   : > { %7665 = vst [vmem:[#allocation30_spill] sm:$0xff] %v5495_v5  ;;  %7666 = vst [vmem:[#allocation22_spill] sm:$0xff] %v5497_v33  ;;  %v1319_v35 = vmul.f32 %v4232_v7, %v1318_v42  ;;  %v1320_v27 = vmul.f32 %v4233_v18, %v1318_v42  ;;  %v1321_v15 = vmul.f32 %v5520_v46, %v1318_v42  ;;  %s6336_s15 = sld [smem:[#allocation3 + $0x16]] }
 0x108   : > { %7667 = vst [vmem:[#allocation14_spill] sm:$0xff] %v5499_v43  ;;  %7668 = vst [vmem:[#allocation15_spill] sm:$0xff] %v5501_v56  ;;  %v1322_v49 = vmul.f32 %v4235_v30, %v1318_v42  ;;  %v1323_v58 = vmul.f32 %v5525_v54, %v1318_v42  ;;  %v1324_v62 = vmul.f32 %v4237_v63, %v1318_v42  ;;  %v4251_v30 = vld [vmem:[%s4817_s10 + $0x19] sm:$0x3f]  ;;  %v4253_v63 = vld [vmem:[%s4817_s10 + $0x29] sm:$0x3f] }
 0x109   : > { %7669 = vst [vmem:[#allocation16_spill] sm:$0xff] %v5503_v10  ;;  %7670 = vst [vmem:[#allocation31_spill] sm:$0xff] %v5505_v47  ;;  %v1325_v45 = vmul.f32 %v5530_v44, %v1318_v42  ;;  %v1326_v9 = vmul.f32 %v4239_v17, %v1318_v42  ;;  %v1327_v31 = vmul.f32 %v5535_v24, %v1318_v42 }
 0x10a   : > { %7671 = vst [vmem:[#allocation25_spill] sm:$0xff] %v5507_v55  ;;  %v1328_v23 = vmul.f32 %v4241_v20, %v1318_v42  ;;  %v1329_v16 = vmul.f32 %v5540_v59, %v1318_v42  ;;  %v1330_v57 = vmul.f32 %v4243_v32, %v1318_v42  ;;  %v1331_v36 = vmul.f32 %v5545_v3, %v1318_v42  ;;  %v5580_v20 = vld [vmem:[%s4817_s10 + $0x41] sm:$0xff] }
 0x10b   : > { %v1332_v1 = vmul.f32 %v4245_v4, %v1318_v42  ;;  %v1333_v21 = vmul.f32 %v5550_v41, %v1318_v42  ;;  %v1334_v37 = vmul.f32 %v4247_v11, %v1318_v42  ;;  %v1335_v50 = vadd.f32 %v1319_v35, %v1317_v29  ;;  %v4248_v42 = vld [vmem:[%s4817_s10 + $0x1] sm:$0xff]  ;;  %v4249_v35 = vld [vmem:[%s4817_s10 + $0x9] sm:$0x3f]  ;;  %v4259_v4 = vld [vmem:[%s4817_s10 + $0x59] sm:$0x3f] }
 0x10c   : > { %v1336_v52 = vadd.f32 %v1320_v27, %v1317_v29  ;;  %v1337_v19 = vadd.f32 %v1321_v15, %v1317_v29  ;;  %v1338_v34 = vadd.f32 %v1322_v49, %v1317_v29  ;;  %v1339_v0 = vadd.f32 %v1323_v58, %v1317_v29  ;;  %v5559_v27 = vld [vmem:[%s4817_s10 + $0x11] sm:$0xff]  ;;  %v5566_v58 = vld [vmem:[%s4817_s10 + $0x21] sm:$0xff] }
 0x10d   : > { %v1340_v53 = vadd.f32 %v1324_v62, %v1317_v29  ;;  %v1341_v12 = vadd.f32 %v1325_v45, %v1317_v29  ;;  %v1342_v8 = vadd.f32 %v1326_v9, %v1317_v29  ;;  %v1343_v48 = vadd.f32 %v1327_v31, %v1317_v29  ;;  %v5573_v45 = vld [vmem:[%s4817_s10 + $0x31] sm:$0xff]  ;;  %v4255_v9 = vld [vmem:[%s4817_s10 + $0x39] sm:$0x3f] }
 0x10e   : > { %v1344_v60 = vadd.f32 %v1328_v23, %v1317_v29  ;;  %v1345_v22 = vadd.f32 %v1329_v16, %v1317_v29  ;;  %v1346_v2 = vadd.f32 %v1330_v57, %v1317_v29  ;;  %v1347_v61 = vadd.f32 %v1331_v36, %v1317_v29  ;;  %v4257_v16 = vld [vmem:[%s4817_s10 + $0x49] sm:$0x3f]  ;;  %v5587_v57 = vld [vmem:[%s4817_s10 + $0x51] sm:$0xff] }
 0x10f   : > { %v1348_v26 = vadd.f32 %v1332_v1, %v1317_v29  ;;  %v1349_v13 = vadd.f32 %v1333_v21, %v1317_v29  ;;  %v1350_v40 = vadd.f32 %v1334_v37, %v1317_v29  ;;  %v1352_v7 = vmul.f32 %v4248_v42, %v5514_v14  ;;  %v5594_v21 = vld [vmem:[%s4817_s10 + $0x61] sm:$0xff]  ;;  %v4261_v37 = vld [vmem:[%s4817_s10 + $0x69] sm:$0x3f] }
 0x110   : > { %v1353_v18 = vmul.f32 %v4249_v35, %v5514_v14  ;;  %v1354_v15 = vmul.f32 %v5559_v27, %v5514_v14  ;;  %v1355_v49 = vmul.f32 %v4251_v30, %v5514_v14  ;;  %v1356_v29 = vmul.f32 %v5566_v58, %v5514_v14  ;;  %v5601_v35 = vld [vmem:[%s4817_s10 + $0x71] sm:$0xff] }
 0x111   : > { %v1357_v62 = vmul.f32 %v4253_v63, %v5514_v14  ;;  %v1358_v17 = vmul.f32 %v5573_v45, %v5514_v14  ;;  %v1359_v31 = vmul.f32 %v4255_v9, %v5514_v14  ;;  %v1360_v23 = vmul.f32 %v5580_v20, %v5514_v14  ;;  %v4263_v63 = vld [vmem:[%s4817_s10 + $0x79] sm:$0x3f] }
 0x112   : > { %v1361_v32 = vmul.f32 %v4257_v16, %v5514_v14  ;;  %v1362_v36 = vmul.f32 %v5587_v57, %v5514_v14  ;;  %v1363_v1 = vmul.f32 %v4259_v4, %v5514_v14  ;;  %v1364_v11 = vmul.f32 %v5594_v21, %v5514_v14 }
 0x113   : > { %v1365_v42 = vmul.f32 %v4261_v37, %v5514_v14  ;;  %v1366_v30 = vmul.f32 %v5601_v35, %v5514_v14  ;;  %v1367_v9 = vmul.f32 %v4263_v63, %v5514_v14  ;;  %v1368_v16 = vadd.f32 %v1352_v7, %v1335_v50  ;;  %v4279_v63 = vld [vmem:[%s4817_s10 + $0x7a] sm:$0x3f] }
 0x114   : > { %v1369_v55 = vadd.f32 %v1353_v18, %v1336_v52  ;;  %v1370_v47 = vadd.f32 %v1354_v15, %v1337_v19  ;;  %v1371_v4 = vadd.f32 %v1355_v49, %v1338_v34  ;;  %v1372_v10 = vadd.f32 %v1356_v29, %v1339_v0  ;;  %v4264_v52 = vld [vmem:[%s4817_s10 + $0x2] sm:$0xff]  ;;  %v4265_v34 = vld [vmem:[%s4817_s10 + $0xa] sm:$0x3f] }
 0x115   : > { %v1373_v56 = vadd.f32 %v1357_v62, %v1340_v53  ;;  %v1374_v43 = vadd.f32 %v1358_v17, %v1341_v12  ;;  %v1375_v33 = vadd.f32 %v1359_v31, %v1342_v8  ;;  %v1376_v5 = vadd.f32 %v1360_v23, %v1343_v48  ;;  %v5620_v53 = vld [vmem:[%s4817_s10 + $0x12] sm:$0xff]  ;;  %v4267_v8 = vld [vmem:[%s4817_s10 + $0x1a] sm:$0x3f]  ;;  %v5641_v18 = vld [vmem:[%s4817_s10 + $0x42] sm:$0xff] }
 0x116   : > { %v1377_v37 = vadd.f32 %v1361_v32, %v1344_v60  ;;  %v1378_v39 = vadd.f32 %v1362_v36, %v1345_v22  ;;  %v1379_v25 = vadd.f32 %v1363_v1, %v1346_v2  ;;  %v1380_v6 = vadd.f32 %v1364_v11, %v1347_v61  ;;  %v5627_v60 = vld [vmem:[%s4817_s10 + $0x22] sm:$0xff]  ;;  %v4269_v2 = vld [vmem:[%s4817_s10 + $0x2a] sm:$0x3f]  ;;  %v5648_v62 = vld [vmem:[%s4817_s10 + $0x52] sm:$0xff] }
 0x117   : > { %v1381_v51 = vadd.f32 %v1365_v42, %v1348_v26  ;;  %v1382_v14 = vadd.f32 %v1366_v30, %v1349_v13  ;;  %v1383_v50 = vadd.f32 %v1367_v9, %v1350_v40  ;;  %v1385_v19 = vmul.f32 %v4264_v52, %v5517_v28  ;;  %v5634_v26 = vld [vmem:[%s4817_s10 + $0x32] sm:$0xff]  ;;  %v4271_v40 = vld [vmem:[%s4817_s10 + $0x3a] sm:$0x3f]  ;;  %v4273_v49 = vld [vmem:[%s4817_s10 + $0x4a] sm:$0x3f]  ;;  %7676 = vst [vmem:[#allocation20_spill] sm:$0xff] %v5648_v62 }
 0x118   : > { %v1386_v0 = vmul.f32 %v4265_v34, %v5517_v28  ;;  %v1387_v12 = vmul.f32 %v5620_v53, %v5517_v28  ;;  %v1388_v48 = vmul.f32 %v4267_v8, %v5517_v28  ;;  %v1389_v22 = vmul.f32 %v5627_v60, %v5517_v28  ;;  %v4275_v31 = vld [vmem:[%s4817_s10 + $0x5a] sm:$0x3f]  ;;  %v5655_v32 = vld [vmem:[%s4817_s10 + $0x62] sm:$0xff]  ;;  %v4277_v1 = vld [vmem:[%s4817_s10 + $0x6a] sm:$0x3f] }
 0x119   : > { %v1390_v61 = vmul.f32 %v4269_v2, %v5517_v28  ;;  %v1391_v13 = vmul.f32 %v5634_v26, %v5517_v28  ;;  %v1392_v7 = vmul.f32 %v4271_v40, %v5517_v28  ;;  %v1393_v15 = vmul.f32 %v5641_v18, %v5517_v28  ;;  %7677 = vst [vmem:[#allocation21_spill] sm:$0xff] %v5655_v32  ;;  %v5662_v42 = vld [vmem:[%s4817_s10 + $0x72] sm:$0xff] }
 0x11a   : > { %v1394_v29 = vmul.f32 %v4273_v49, %v5517_v28  ;;  %v1395_v17 = vmul.f32 %v5648_v62, %v5517_v28  ;;  %v1396_v23 = vmul.f32 %v4275_v31, %v5517_v28  ;;  %v1397_v36 = vmul.f32 %v5655_v32, %v5517_v28  ;;  %7678 = vst [vmem:[#allocation23_spill] sm:$0xff] %v5662_v42 }
 0x11b   : > { %v1398_v11 = vmul.f32 %v4277_v1, %v5517_v28  ;;  %v1399_v30 = vmul.f32 %v5662_v42, %v5517_v28  ;;  %v1400_v9 = vmul.f32 %v4279_v63, %v5517_v28  ;;  %v1401_v52 = vadd.f32 %v1385_v19, %v1368_v16 }
 0x11c   : > { %v1402_v34 = vadd.f32 %v1386_v0, %v1369_v55  ;;  %v1403_v8 = vadd.f32 %v1387_v12, %v1370_v47  ;;  %v1404_v2 = vadd.f32 %v1388_v48, %v1371_v4  ;;  %v1405_v40 = vadd.f32 %v1389_v22, %v1372_v10  ;;  %v4284_v48 = vld [vmem:[%s4817_s10 + $0x58] sm:$0x3f] }
 0x11d   : > { %v1406_v49 = vadd.f32 %v1390_v61, %v1373_v56  ;;  %v1407_v31 = vadd.f32 %v1391_v13, %v1374_v43  ;;  %v1408_v1 = vadd.f32 %v1392_v7, %v1375_v33  ;;  %v1409_v38 = vadd.f32 %v1393_v15, %v1376_v5  ;;  %v4280_v43 = vld [vmem:[%s4817_s10 + $0x18] sm:$0x3f]  ;;  %v4285_v13 = vld [vmem:[%s4817_s10 + $0x68] sm:$0x3f] }
 0x11e   : > { %v1410_v32 = vadd.f32 %v1394_v29, %v1377_v37  ;;  %v1411_v42 = vadd.f32 %v1395_v17, %v1378_v39  ;;  %v1412_v62 = vadd.f32 %v1396_v23, %v1379_v25  ;;  %v1413_v28 = vadd.f32 %v1397_v36, %v1380_v6  ;;  %v4282_v37 = vld [vmem:[%s4817_s10 + $0x38] sm:$0x3f]  ;;  %v5693_v23 = vld [vmem:[%s4817_s10 + $0x80] sm:$0xff] }
 0x11f   : > { %v1414_v16 = vadd.f32 %v1398_v11, %v1381_v51  ;;  %v1415_v19 = vadd.f32 %v1399_v30, %v1382_v14  ;;  %v1416_v55 = vadd.f32 %v1400_v9, %v1383_v50  ;;  %v1417_v47 = vstv %s5607_s16  ;;  %v4281_v51 = vld [vmem:[%s4817_s10 + $0x28] sm:$0x3f]  ;;  %v4286_v29 = vld [vmem:[%s4817_s10 + $0x78] sm:$0x3f]  ;;  %7679 = vst [vmem:[#allocation32_spill] sm:$0xff] %v5693_v23  ;;  %s6338_s16 = sld [smem:[#allocation3 + $0x17]] }
 0x120   : > { %v5670_v4 = vstv %s5609_s17  ;;  %v1418_v56 = vmul.f32 %v5520_v46, %v1417_v47  ;;  %v1419_v10 = vmul.f32 %v4280_v43, %v1417_v47  ;;  %v5675_v5 = vstv %s5615_s18  ;;  %v4283_v50 = vld [vmem:[%s4817_s10 + $0x48] sm:$0x3f]  ;;  %s6344_s17 = sld [smem:[#allocation3 + $0x18]]  ;;  %s6346_s18 = sld [smem:[#allocation3 + $0x19]] }
 0x121   : > { %v5678_v33 = vstv %s5617_s19  ;;  %v1420_v25 = vmul.f32 %v5525_v54, %v1417_v47  ;;  %v1421_v6 = vmul.f32 %v4281_v51, %v1417_v47  ;;  %v1422_v39 = vmul.f32 %v5530_v44, %v1417_v47  ;;  %v4288_v11 = vld [vmem:[%s4817_s10 + $0x88] sm:$0x3f]  ;;  %s6475_s19 = sld [smem:[#allocation3 + $0x1a]] }
 0x122   : > { %v1423_v14 = vmul.f32 %v4282_v37, %v1417_v47  ;;  %v1424_v46 = vmul.f32 %v5535_v24, %v1417_v47  ;;  %v1425_v0 = vmul.f32 %v4283_v50, %v1417_v47  ;;  %v1426_v12 = vmul.f32 %v5540_v59, %v1417_v47 }
 0x123   : > { %v1427_v22 = vmul.f32 %v4284_v48, %v1417_v47  ;;  %v1428_v61 = vmul.f32 %v5545_v3, %v1417_v47  ;;  %v1429_v7 = vmul.f32 %v4285_v13, %v1417_v47  ;;  %v1430_v15 = vmul.f32 %v5550_v41, %v1417_v47 }
 0x124   : > { %v1431_v17 = vmul.f32 %v4286_v29, %v1417_v47  ;;  %v1432_v36 = vmul.f32 %v5693_v23, %v1417_v47  ;;  %v1433_v30 = vmul.f32 %v4288_v11, %v1417_v47  ;;  %v1434_v63 = vadd.f32 %v1418_v56, %v1401_v52  ;;  %v4294_v56 = vld [vmem:[%s4817_s10 + $0x69] sm:$0x3f] }
 0x125   : > { %v1435_v9 = vadd.f32 %v1419_v10, %v1402_v34  ;;  %v1436_v43 = vadd.f32 %v1420_v25, %v1403_v8  ;;  %v1437_v51 = vadd.f32 %v1421_v6, %v1404_v2  ;;  %v1438_v37 = vadd.f32 %v1422_v39, %v1405_v40  ;;  %v4289_v8 = vld [vmem:[%s4817_s10 + $0x19] sm:$0x3f] }
 0x126   : > { %v1439_v50 = vadd.f32 %v1423_v14, %v1406_v49  ;;  %v1440_v48 = vadd.f32 %v1424_v46, %v1407_v31  ;;  %v1441_v13 = vadd.f32 %v1425_v0, %v1408_v1  ;;  %v1442_v41 = vadd.f32 %v1426_v12, %v1409_v38  ;;  %v4290_v38 = vld [vmem:[%s4817_s10 + $0x29] sm:$0x3f]  ;;  %v4295_v6 = vld [vmem:[%s4817_s10 + $0x79] sm:$0x3f]  ;;  %v5726_v14 = vld [vmem:[%s4817_s10 + $0x81] sm:$0xff] }
 0x127   : > { %v1443_v3 = vadd.f32 %v1427_v22, %v1410_v32  ;;  %v1444_v29 = vadd.f32 %v1428_v61, %v1411_v42  ;;  %v1445_v59 = vadd.f32 %v1429_v7, %v1412_v62  ;;  %v1446_v24 = vadd.f32 %v1430_v15, %v1413_v28  ;;  %v4291_v42 = vld [vmem:[%s4817_s10 + $0x39] sm:$0x3f]  ;;  %v4292_v31 = vld [vmem:[%s4817_s10 + $0x49] sm:$0x3f] }
 0x128   : > { %v1447_v23 = vadd.f32 %v1431_v17, %v1414_v16  ;;  %v1448_v47 = vadd.f32 %v1432_v36, %v1415_v19  ;;  %v1449_v52 = vadd.f32 %v1433_v30, %v1416_v55  ;;  %v1451_v34 = vmul.f32 %v5559_v27, %v5670_v4  ;;  %v4293_v16 = vld [vmem:[%s4817_s10 + $0x59] sm:$0x3f]  ;;  %v4297_v0 = vld [vmem:[%s4817_s10 + $0x89] sm:$0x3f] }
 0x129   : > { %v1452_v2 = vmul.f32 %v4289_v8, %v5670_v4  ;;  %v1453_v40 = vmul.f32 %v5566_v58, %v5670_v4  ;;  %v1454_v32 = vmul.f32 %v4290_v38, %v5670_v4  ;;  %v1455_v62 = vmul.f32 %v5573_v45, %v5670_v4 }
 0x12a   : > { %v1456_v49 = vmul.f32 %v4291_v42, %v5670_v4  ;;  %v1457_v27 = vmul.f32 %v5580_v20, %v5670_v4  ;;  %v1458_v1 = vmul.f32 %v4292_v31, %v5670_v4  ;;  %v1459_v28 = vmul.f32 %v5587_v57, %v5670_v4 }
 0x12b   : > { %v1460_v19 = vmul.f32 %v4293_v16, %v5670_v4  ;;  %v1461_v55 = vmul.f32 %v5594_v21, %v5670_v4  ;;  %v1462_v10 = vmul.f32 %v4294_v56, %v5670_v4  ;;  %v1463_v25 = vmul.f32 %v5601_v35, %v5670_v4 }
 0x12c   : > { %v1464_v39 = vmul.f32 %v4295_v6, %v5670_v4  ;;  %v1465_v46 = vmul.f32 %v5726_v14, %v5670_v4  ;;  %v1466_v12 = vmul.f32 %v4297_v0, %v5670_v4  ;;  %v1467_v22 = vadd.f32 %v1451_v34, %v1434_v63  ;;  %v7681_v34 = vld [vmem:[#allocation21_spill] sm:$0xff] }
 0x12d   : > { %v1468_v61 = vadd.f32 %v1452_v2, %v1435_v9  ;;  %v1469_v7 = vadd.f32 %v1453_v40, %v1436_v43  ;;  %v1470_v15 = vadd.f32 %v1454_v32, %v1437_v51  ;;  %v1471_v17 = vadd.f32 %v1455_v62, %v1438_v37  ;;  %v4298_v43 = vld [vmem:[%s4817_s10 + $0x1a] sm:$0x3f]  ;;  %v4303_v40 = vld [vmem:[%s4817_s10 + $0x6a] sm:$0x3f]  ;;  %v7682_v62 = vld [vmem:[#allocation23_spill] sm:$0xff] }
 0x12e   : > { %v1472_v36 = vadd.f32 %v1456_v49, %v1439_v50  ;;  %v1473_v11 = vadd.f32 %v1457_v27, %v1440_v48  ;;  %v1474_v30 = vadd.f32 %v1458_v1, %v1441_v13  ;;  %v1475_v8 = vadd.f32 %v1459_v28, %v1442_v41  ;;  %v4301_v50 = vld [vmem:[%s4817_s10 + $0x4a] sm:$0x3f]  ;;  %v7680_v13 = vld [vmem:[#allocation20_spill] sm:$0xff]  ;;  %v5761_v28 = vld [vmem:[%s4817_s10 + $0x82] sm:$0xff] }
 0x12f   : > { %v1476_v38 = vadd.f32 %v1460_v19, %v1443_v3  ;;  %v1477_v42 = vadd.f32 %v1461_v55, %v1444_v29  ;;  %v1478_v31 = vadd.f32 %v1462_v10, %v1445_v59  ;;  %v1479_v16 = vadd.f32 %v1463_v25, %v1446_v24  ;;  %v4299_v3 = vld [vmem:[%s4817_s10 + $0x2a] sm:$0x3f]  ;;  %v4300_v59 = vld [vmem:[%s4817_s10 + $0x3a] sm:$0x3f]  ;;  %7683 = vst [vmem:[#allocation20_spill] sm:$0xff] %v5761_v28 }
 0x130   : > { %v1480_v56 = vadd.f32 %v1464_v39, %v1447_v23  ;;  %v1481_v4 = vadd.f32 %v1465_v46, %v1448_v47  ;;  %v1482_v63 = vadd.f32 %v1466_v12, %v1449_v52  ;;  %v1484_v9 = vmul.f32 %v5620_v53, %v5675_v5  ;;  %v4302_v47 = vld [vmem:[%s4817_s10 + $0x5a] sm:$0x3f]  ;;  %v4306_v55 = vld [vmem:[%s4817_s10 + $0x8a] sm:$0x3f] }
 0x131   : > { %v1485_v51 = vmul.f32 %v4298_v43, %v5675_v5  ;;  %v1486_v37 = vmul.f32 %v5627_v60, %v5675_v5  ;;  %v1487_v41 = vmul.f32 %v4299_v3, %v5675_v5  ;;  %v1488_v24 = vmul.f32 %v5634_v26, %v5675_v5  ;;  %v4304_v27 = vld [vmem:[%s4817_s10 + $0x7a] sm:$0x3f] }
 0x132   : > { %v1489_v23 = vmul.f32 %v4300_v59, %v5675_v5  ;;  %v1490_v53 = vmul.f32 %v5641_v18, %v5675_v5  ;;  %v1491_v48 = vmul.f32 %v4301_v50, %v5675_v5  ;;  %v1492_v29 = vmul.f32 %v7680_v13, %v5675_v5 }
 0x133   : > { %v1493_v52 = vmul.f32 %v4302_v47, %v5675_v5  ;;  %v1494_v2 = vmul.f32 %v7681_v34, %v5675_v5  ;;  %v1495_v32 = vmul.f32 %v4303_v40, %v5675_v5  ;;  %v1496_v49 = vmul.f32 %v7682_v62, %v5675_v5 }
 0x134   : > { %v1497_v1 = vmul.f32 %v4304_v27, %v5675_v5  ;;  %v1498_v19 = vmul.f32 %v5761_v28, %v5675_v5  ;;  %v1499_v10 = vmul.f32 %v4306_v55, %v5675_v5  ;;  %v1500_v25 = vadd.f32 %v1484_v9, %v1467_v22 }
 0x135   : > { %v1501_v6 = vadd.f32 %v1485_v51, %v1468_v61  ;;  %v1502_v39 = vadd.f32 %v1486_v37, %v1469_v7  ;;  %v1503_v46 = vadd.f32 %v1487_v41, %v1470_v15  ;;  %v1504_v0 = vadd.f32 %v1488_v24, %v1471_v17  ;;  %v4307_v7 = vld [vmem:[%s4817_s10 + $0x28] sm:$0x3f]  ;;  %v7687_v51 = vld [vmem:[#allocation19_spill] sm:$0xff]  ;;  %v4312_v41 = vld [vmem:[%s4817_s10 + $0x78] sm:$0x3f] }
 0x136   : > { %v1505_v12 = vadd.f32 %v1489_v23, %v1472_v36  ;;  %v1506_v43 = vadd.f32 %v1490_v53, %v1473_v11  ;;  %v1507_v3 = vadd.f32 %v1491_v48, %v1474_v30  ;;  %v1508_v59 = vadd.f32 %v1492_v29, %v1475_v8  ;;  %v4308_v36 = vld [vmem:[%s4817_s10 + $0x38] sm:$0x3f]  ;;  %v7684_v30 = vld [vmem:[#allocation17_spill] sm:$0xff]  ;;  %v4313_v48 = vld [vmem:[%s4817_s10 + $0x88] sm:$0x3f] }
 0x137   : > { %v1509_v50 = vadd.f32 %v1493_v52, %v1476_v38  ;;  %v1510_v47 = vadd.f32 %v1494_v2, %v1477_v42  ;;  %v1511_v40 = vadd.f32 %v1495_v32, %v1478_v31  ;;  %v1512_v27 = vadd.f32 %v1496_v49, %v1479_v16  ;;  %v7685_v42 = vld [vmem:[#allocation24_spill] sm:$0xff]  ;;  %v4314_v52 = vld [vmem:[%s4817_s10 + $0x90] sm:$0xff] }
 0x138   : > { %v1513_v28 = vadd.f32 %v1497_v1, %v1480_v56  ;;  %v1514_v5 = vadd.f32 %v1498_v19, %v1481_v4  ;;  %v1515_v22 = vadd.f32 %v1499_v10, %v1482_v63  ;;  %v1517_v61 = vmul.f32 %v5525_v54, %v5678_v33  ;;  %v4309_v54 = vld [vmem:[%s4817_s10 + $0x48] sm:$0x3f]  ;;  %v4310_v16 = vld [vmem:[%s4817_s10 + $0x58] sm:$0x3f] }
 0x139   : > { %v1518_v15 = vmul.f32 %v4307_v7, %v5678_v33  ;;  %v1519_v17 = vmul.f32 %v5530_v44, %v5678_v33  ;;  %v1520_v11 = vmul.f32 %v4308_v36, %v5678_v33  ;;  %v1521_v8 = vmul.f32 %v7684_v30, %v5678_v33  ;;  %v7686_v44 = vld [vmem:[#allocation18_spill] sm:$0xff]  ;;  %v7688_v23 = vld [vmem:[#allocation32_spill] sm:$0xff] }
 0x13a   : > { %v1522_v38 = vmul.f32 %v4309_v54, %v5678_v33  ;;  %v1523_v31 = vmul.f32 %v7685_v42, %v5678_v33  ;;  %v1524_v56 = vmul.f32 %v4310_v16, %v5678_v33  ;;  %v1525_v4 = vmul.f32 %v7686_v44, %v5678_v33  ;;  %v4311_v63 = vld [vmem:[%s4817_s10 + $0x68] sm:$0x3f]  ;;  %v4315_v32 = vld [vmem:[%s4817_s10 + $0x98] sm:$0x3f] }
 0x13b   : > { %v1526_v9 = vmul.f32 %v4311_v63, %v5678_v33  ;;  %v1527_v37 = vmul.f32 %v7687_v51, %v5678_v33  ;;  %v1528_v24 = vmul.f32 %v4312_v41, %v5678_v33  ;;  %v1529_v53 = vmul.f32 %v7688_v23, %v5678_v33 }
 0x13c   : > { %v1530_v29 = vmul.f32 %v4313_v48, %v5678_v33  ;;  %v1531_v2 = vmul.f32 %v4314_v52, %v5678_v33  ;;  %v1532_v49 = vmul.f32 %v4315_v32, %v5678_v33  ;;  %v1533_v1 = vadd.f32 %v1517_v61, %v1500_v25 }
 0x13d   : > { %v1534_v19 = vadd.f32 %v1518_v15, %v1501_v6  ;;  %v1535_v55 = vadd.f32 %v1519_v17, %v1502_v39  ;;  %v1536_v10 = vadd.f32 %v1520_v11, %v1503_v46  ;;  %v1537_v7 = vadd.f32 %v1521_v8, %v1504_v0  ;;  %v4320_v11 = vld [vmem:[%s4817_s10 + $0x69] sm:$0x3f] }
 0x13e   : > { %v1538_v36 = vadd.f32 %v1522_v38, %v1505_v12  ;;  %v1539_v30 = vadd.f32 %v1523_v31, %v1506_v43  ;;  %v1540_v54 = vadd.f32 %v1524_v56, %v1507_v3  ;;  %v1541_v42 = vadd.f32 %v1525_v4, %v1508_v59  ;;  %v4316_v12 = vld [vmem:[%s4817_s10 + $0x29] sm:$0x3f] }
 0x13f   : > { %v1542_v16 = vadd.f32 %v1526_v9, %v1509_v50  ;;  %v1543_v44 = vadd.f32 %v1527_v37, %v1510_v47  ;;  %v1544_v63 = vadd.f32 %v1528_v24, %v1511_v40  ;;  %v1545_v33 = vadd.f32 %v1529_v53, %v1512_v27  ;;  %v4317_v50 = vld [vmem:[%s4817_s10 + $0x39] sm:$0x3f]  ;;  %v4318_v27 = vld [vmem:[%s4817_s10 + $0x49] sm:$0x3f] }
 0x140   : > { %v1546_v25 = vadd.f32 %v1530_v29, %v1513_v28  ;;  %v5807_v61 = vadd.f32 %v1531_v2, %v1514_v5  ;;  %v5809_v6 = vadd.f32 %v1532_v49, %v1515_v22  ;;  %v1549_v39 = vstv %s5767_s3  ;;  %v4319_v22 = vld [vmem:[%s4817_s10 + $0x59] sm:$0x3f]  ;;  %v4322_v4 = vld [vmem:[%s4817_s10 + $0x89] sm:$0x3f]  ;;  %s6477_s3 = sld [smem:[#allocation8 + $0x12]] }
 0x141   : > { %v5813_v46 = vstv %s5769_s23  ;;  %v1550_v0 = vmul.f32 %v5566_v58, %v1549_v39  ;;  %v1551_v43 = vmul.f32 %v4316_v12, %v1549_v39  ;;  %v5818_v3 = vstv %s5775_s24  ;;  %v4324_v37 = vld [vmem:[%s4817_s10 + $0x99] sm:$0x3f]  ;;  %s6499_s23 = sld [smem:[#allocation8 + $0x13]]  ;;  %s6501_s24 = sld [smem:[#allocation8 + $0x14]] }
 0x142   : > { %v5821_v59 = vstv %s5777_s25  ;;  %v1552_v28 = vmul.f32 %v5573_v45, %v1549_v39  ;;  %v1553_v47 = vmul.f32 %v4317_v50, %v1549_v39  ;;  %v1554_v40 = vmul.f32 %v5580_v20, %v1549_v39  ;;  %v4321_v45 = vld [vmem:[%s4817_s10 + $0x79] sm:$0x3f]  ;;  %v4323_v20 = vld [vmem:[%s4817_s10 + $0x91] sm:$0xff]  ;;  %v4331_v50 = vld [vmem:[%s4817_s10 + $0x8a] sm:$0x3f]  ;;  %s6662_s25 = sld [smem:[#allocation8 + $0x15]] }
 0x143   : > { %v1555_v5 = vmul.f32 %v4318_v27, %v1549_v39  ;;  %v1556_v58 = vmul.f32 %v5587_v57, %v1549_v39  ;;  %v1557_v15 = vmul.f32 %v4319_v22, %v1549_v39  ;;  %v1558_v17 = vmul.f32 %v5594_v21, %v1549_v39 }
 0x144   : > { %v1559_v8 = vmul.f32 %v4320_v11, %v1549_v39  ;;  %v1560_v38 = vmul.f32 %v5601_v35, %v1549_v39  ;;  %v1561_v31 = vmul.f32 %v4321_v45, %v1549_v39  ;;  %v1562_v56 = vmul.f32 %v5726_v14, %v1549_v39  ;;  %v4333_v45 = vld [vmem:[%s4817_s10 + $0x9a] sm:$0x3f] }
 0x145   : > { %v1563_v9 = vmul.f32 %v4322_v4, %v1549_v39  ;;  %v1564_v51 = vmul.f32 %v4323_v20, %v1549_v39  ;;  %v1565_v41 = vmul.f32 %v4324_v37, %v1549_v39  ;;  %v1566_v57 = vadd.f32 %v1550_v0, %v1533_v1  ;;  %v4330_v39 = vld [vmem:[%s4817_s10 + $0x7a] sm:$0x3f] }
 0x146   : > { %v1567_v24 = vadd.f32 %v1551_v43, %v1534_v19  ;;  %v1568_v23 = vadd.f32 %v1552_v28, %v1535_v55  ;;  %v1569_v21 = vadd.f32 %v1553_v47, %v1536_v10  ;;  %v1570_v53 = vadd.f32 %v1554_v40, %v1537_v7  ;;  %v4325_v19 = vld [vmem:[%s4817_s10 + $0x2a] sm:$0x3f]  ;;  %v4326_v7 = vld [vmem:[%s4817_s10 + $0x3a] sm:$0x3f] }
 0x147   : > { %v1571_v48 = vadd.f32 %v1555_v5, %v1538_v36  ;;  %v1572_v35 = vadd.f32 %v1556_v58, %v1539_v30  ;;  %v1573_v29 = vadd.f32 %v1557_v15, %v1540_v54  ;;  %v1574_v52 = vadd.f32 %v1558_v17, %v1541_v42  ;;  %v4327_v54 = vld [vmem:[%s4817_s10 + $0x4a] sm:$0x3f] }
 0x148   : > { %v1575_v14 = vadd.f32 %v1559_v8, %v1542_v16  ;;  %v1576_v2 = vadd.f32 %v1560_v38, %v1543_v44  ;;  %v1577_v32 = vadd.f32 %v1561_v31, %v1544_v63  ;;  %v1578_v49 = vadd.f32 %v1562_v56, %v1545_v33  ;;  %v4328_v16 = vld [vmem:[%s4817_s10 + $0x5a] sm:$0x3f]  ;;  %v4332_v8 = vld [vmem:[%s4817_s10 + $0x92] sm:$0xff] }
 0x149   : > { %v1579_v12 = vadd.f32 %v1563_v9, %v1546_v25  ;;  %v1583_v1 = vmul.f32 %v5627_v60, %v5813_v46  ;;  %v1584_v55 = vmul.f32 %v4325_v19, %v5813_v46  ;;  %v1585_v10 = vmul.f32 %v5634_v26, %v5813_v46  ;;  %v4329_v26 = vld [vmem:[%s4817_s10 + $0x6a] sm:$0x3f] }
 0x14a   : > { %v1586_v36 = vmul.f32 %v4326_v7, %v5813_v46  ;;  %v1587_v30 = vmul.f32 %v5641_v18, %v5813_v46  ;;  %v1588_v42 = vmul.f32 %v4327_v54, %v5813_v46  ;;  %v1589_v60 = vmul.f32 %v7680_v13, %v5813_v46  ;;  %v7689_v13 = vld [vmem:[#allocation20_spill] sm:$0xff] }
 0x14b   : > { %v1590_v44 = vmul.f32 %v4328_v16, %v5813_v46  ;;  %v1591_v63 = vmul.f32 %v7681_v34, %v5813_v46  ;;  %v1592_v33 = vmul.f32 %v4329_v26, %v5813_v46  ;;  %v1593_v25 = vmul.f32 %v7682_v62, %v5813_v46  ;;  %v7691_v16 = vld [vmem:[#allocation26_spill] sm:$0xff] }
 0x14c   : > { %v1594_v18 = vmul.f32 %v4330_v39, %v5813_v46  ;;  %v1580_v0 = vadd.f32 %v1564_v51, %v5807_v61  ;;  %v1581_v43 = vadd.f32 %v1565_v41, %v5809_v6  ;;  %v1595_v28 = vmul.f32 %v7689_v13, %v5813_v46  ;;  %v7694_v39 = vld [vmem:[#allocation29_spill] sm:$0xff]  ;;  %v7696_v13 = vld [vmem:[#allocation22_spill] sm:$0xff] }
 0x14d   : > { %v1596_v34 = vmul.f32 %v4331_v50, %v5813_v46  ;;  %v1599_v47 = vadd.f32 %v1583_v1, %v1566_v57  ;;  %v1600_v40 = vadd.f32 %v1584_v55, %v1567_v24  ;;  %v1601_v27 = vadd.f32 %v1585_v10, %v1568_v23  ;;  %v7697_v50 = vld [vmem:[#allocation14_spill] sm:$0xff] }
 0x14e   : > { %v1602_v5 = vadd.f32 %v1586_v36, %v1569_v21  ;;  %v1603_v62 = vadd.f32 %v1587_v30, %v1570_v53  ;;  %v1604_v58 = vadd.f32 %v1588_v42, %v1571_v48  ;;  %v1605_v22 = vadd.f32 %v1589_v60, %v1572_v35  ;;  %v7690_v42 = vld [vmem:[#allocation13_spill] sm:$0xff] }
 0x14f   : > { %v1606_v15 = vadd.f32 %v1590_v44, %v1573_v29  ;;  %v1607_v17 = vadd.f32 %v1591_v63, %v1574_v52  ;;  %v1608_v61 = vadd.f32 %v1592_v33, %v1575_v14  ;;  %v1609_v11 = vadd.f32 %v1593_v25, %v1576_v2  ;;  %v7692_v63 = vld [vmem:[#allocation27_spill] sm:$0xff]  ;;  %v7693_v33 = vld [vmem:[#allocation28_spill] sm:$0xff] }
 0x150   : > { %v1610_v6 = vadd.f32 %v1594_v18, %v1577_v32  ;;  %v1597_v38 = vmul.f32 %v4332_v8, %v5813_v46  ;;  %v1598_v31 = vmul.f32 %v4333_v45, %v5813_v46  ;;  %v1611_v56 = vadd.f32 %v1595_v28, %v1578_v49 }
 0x151   : > { %v1612_v4 = vadd.f32 %v1596_v34, %v1579_v12  ;;  %v5871_v9 = vmax.f32 %v1599_v47, 0.0  ;;  %v5873_v20 = vmax.f32 %v1600_v40, 0.0  ;;  %v5875_v51 = vmax.f32 %v1601_v27, 0.0  ;;  %v7698_v47 = vld [vmem:[#allocation15_spill] sm:$0xff]  ;;  %v7699_v27 = vld [vmem:[#allocation16_spill] sm:$0xff] }
 0x152   : > { %v5877_v37 = vmax.f32 %v1602_v5, 0.0  ;;  %v5879_v41 = vmax.f32 %v1603_v62, 0.0  ;;  %v5881_v57 = vmax.f32 %v1604_v58, 0.0  ;;  %v5883_v24 = vmax.f32 %v1605_v22, 0.0  ;;  %v7700_v5 = vld [vmem:[#allocation31_spill] sm:$0xff]  ;;  %v7701_v58 = vld [vmem:[#allocation25_spill] sm:$0xff] }
 0x153   : > { %v5885_v23 = vmax.f32 %v1606_v15, 0.0  ;;  %v5887_v21 = vmax.f32 %v1607_v17, 0.0  ;;  %v5889_v46 = vmax.f32 %v1608_v61, 0.0  ;;  %v5891_v53 = vmax.f32 %v1609_v11, 0.0 }
 0x154   : > { %v5893_v48 = vmax.f32 %v1610_v6, 0.0  ;;  %v1613_v35 = vadd.f32 %v1597_v38, %v1580_v0  ;;  %v5895_v29 = vadd.f32 %v1598_v31, %v1581_v43  ;;  %v5897_v52 = vmax.f32 %v1611_v56, 0.0  ;;  %v7695_v0 = vld [vmem:[#allocation30_spill] sm:$0xff] }
 0x155   : > { %v5899_v14 = vmax.f32 %v1612_v4, 0.0  ;;  %v1632_v2 = vmul.f32 %v5818_v3, %v5871_v9  ;;  %v1633_v32 = vmul.f32 %v5818_v3, %v5873_v20  ;;  %v1634_v49 = vmul.f32 %v5818_v3, %v5875_v51 }
 0x156   : > { %v1635_v12 = vmul.f32 %v5818_v3, %v5877_v37  ;;  %v1636_v1 = vmul.f32 %v5818_v3, %v5879_v41  ;;  %v1637_v19 = vmul.f32 %v5818_v3, %v5881_v57  ;;  %v1638_v55 = vmul.f32 %v5818_v3, %v5883_v24 }
 0x157   : > { %v1639_v10 = vmul.f32 %v5818_v3, %v5885_v23  ;;  %v1640_v7 = vmul.f32 %v5818_v3, %v5887_v21  ;;  %v1641_v36 = vmul.f32 %v5818_v3, %v5889_v46  ;;  %v1642_v30 = vmul.f32 %v5818_v3, %v5891_v53 }
 0x158   : > { %v1643_v54 = vmul.f32 %v5818_v3, %v5893_v48  ;;  %v1644_v60 = vadd.f32 %v1632_v2, %v7690_v42  ;;  %v1645_v44 = vadd.f32 %v1633_v32, %v7691_v16  ;;  %v1646_v26 = vadd.f32 %v1634_v49, %v7692_v63 }
 0x159   : > { %v1647_v25 = vadd.f32 %v1635_v12, %v7693_v33  ;;  %v1648_v18 = vadd.f32 %v1636_v1, %v7694_v39  ;;  %v1649_v43 = vadd.f32 %v1637_v19, %v7695_v0  ;;  %v1650_v28 = vadd.f32 %v1638_v55, %v7696_v13 }
 0x15a   : > { %v1651_v34 = vadd.f32 %v1639_v10, %v7697_v50  ;;  %v1652_v40 = vadd.f32 %v1640_v7, %v7698_v47  ;;  %v1653_v3 = vadd.f32 %v1641_v36, %v7699_v27  ;;  %v1654_v62 = vadd.f32 %v1642_v30, %v7700_v5 }
 0x15b   : > { %v1655_v22 = vadd.f32 %v1643_v54, %v7701_v58  ;;  %v1657_v15 = vmul.f32 %v5821_v59, %v5871_v9  ;;  %v1658_v17 = vmul.f32 %v5821_v59, %v5873_v20  ;;  %v1659_v61 = vmul.f32 %v5821_v59, %v5875_v51 }
 0x15c   : > { %v1660_v11 = vmul.f32 %v5821_v59, %v5877_v37  ;;  %v1661_v6 = vmul.f32 %v5821_v59, %v5879_v41  ;;  %v1662_v8 = vmul.f32 %v5821_v59, %v5881_v57  ;;  %v1663_v38 = vmul.f32 %v5821_v59, %v5883_v24 }
 0x15d   : > { %v1664_v45 = vmul.f32 %v5821_v59, %v5885_v23  ;;  %v1665_v31 = vmul.f32 %v5821_v59, %v5887_v21  ;;  %v1666_v56 = vmul.f32 %v5821_v59, %v5889_v46  ;;  %v1667_v4 = vmul.f32 %v5821_v59, %v5891_v53 }
 0x15e   : > { %v1668_v2 = vmul.f32 %v5821_v59, %v5893_v48  ;;  %v1681_v32 = vrot.slane %v1657_v15, 1  ;;  %v1682_v49 = vrot.slane %v1658_v17, 1  ;;  %v1684_v12 = vrot.slane %v1659_v61, 1 }
 0x15f   : > { %v1685_v1 = vrot.slane %v1660_v11, 1  ;;  %v1687_v19 = vrot.slane %v1661_v6, 1  ;;  %v1688_v55 = vrot.slane %v1662_v8, 1  ;;  %v1690_v10 = vrot.slane %v1663_v38, 1 }
 0x160   : > { %v1691_v7 = vrot.slane %v1664_v45, 1  ;;  %v1683_v36 = vsel %vm888_vm0, %v1681_v32, %v1682_v49  ;;  %v1693_v54 = vrot.slane %v1665_v31, 1  ;;  %v1694_v42 = vrot.slane %v1666_v56, 1 }
 0x161   : > { %v1686_v30 = vsel %vm888_vm0, %v1684_v12, %v1685_v1  ;;  %v1689_v16 = vsel %vm888_vm0, %v1687_v19, %v1688_v55  ;;  %v1696_v33 = vrot.slane %v1667_v4, 1  ;;  %v1697_v59 = vrot.slane %v1668_v2, 1 }
 0x162   : > { %v1692_v63 = vsel %vm888_vm0, %v1690_v10, %v1691_v7  ;;  %v5967_v39 = vmax.f32 %v1613_v35, 0.0  ;;  %v1695_v0 = vsel %vm888_vm0, %v1693_v54, %v1694_v42  ;;  %v1711_v13 = vadd.f32 %v1683_v36, %v1644_v60 }
 0x163   : > { %v1712_v50 = vadd.f32 %v1682_v49, %v1645_v44  ;;  %v1698_v47 = vsel %vm888_vm0, %v1696_v33, %v1697_v59  ;;  %v1713_v27 = vadd.f32 %v1686_v30, %v1646_v26  ;;  %v1714_v5 = vadd.f32 %v1685_v1, %v1647_v25 }
 0x164   : > { %v1715_v58 = vadd.f32 %v1689_v16, %v1648_v18  ;;  %v1716_v15 = vadd.f32 %v1688_v55, %v1649_v43  ;;  %v1717_v17 = vadd.f32 %v1692_v63, %v1650_v28  ;;  %v1718_v61 = vadd.f32 %v1691_v7, %v1651_v34 }
 0x165   : > { %v1719_v11 = vadd.f32 %v1695_v0, %v1652_v40  ;;  %v1720_v6 = vadd.f32 %v1694_v42, %v1653_v3  ;;  %v1721_v8 = vadd.f32 %v1698_v47, %v1654_v62  ;;  %v1722_v35 = vadd.f32 %v1697_v59, %v1655_v22 }
 0x166   : > { %v1723_v38 = vstv %s5953_s29  ;;  %v1790_v16 = vstv %s5971_s30  ;;  %s6664_s29 = sld [smem:[#allocation8 + $0x16]]  ;;  %s6671_s30 = sld [smem:[#allocation8 + $0x17]] }
 0x167   : > { %v1724_v45 = vmul.f32 %v1723_v38, %v5871_v9  ;;  %v1725_v60 = vmul.f32 %v1723_v38, %v5873_v20  ;;  %v1726_v44 = vmul.f32 %v1723_v38, %v5875_v51  ;;  %v1727_v26 = vmul.f32 %v1723_v38, %v5877_v37 }
 0x168   : > { %v1728_v25 = vmul.f32 %v1723_v38, %v5879_v41  ;;  %v1729_v18 = vmul.f32 %v1723_v38, %v5881_v57  ;;  %v1730_v43 = vmul.f32 %v1723_v38, %v5883_v24  ;;  %v1731_v28 = vmul.f32 %v1723_v38, %v5885_v23 }
 0x169   : > { %v1732_v34 = vmul.f32 %v1723_v38, %v5887_v21  ;;  %v1733_v40 = vmul.f32 %v1723_v38, %v5889_v46  ;;  %v1734_v9 = vmul.f32 %v1723_v38, %v5891_v53  ;;  %v1735_v20 = vmul.f32 %v1723_v38, %v5893_v48 }
 0x16a   : > { %v1748_v3 = vrot.slane %v1724_v45, 2  ;;  %v1749_v62 = vrot.slane %v1725_v60, 2  ;;  %v1751_v22 = vrot.slane %v1726_v44, 2  ;;  %v1752_v31 = vrot.slane %v1727_v26, 2 }
 0x16b   : > { %v1754_v56 = vrot.slane %v1728_v25, 2  ;;  %v1755_v4 = vrot.slane %v1729_v18, 2  ;;  %v1757_v2 = vrot.slane %v1730_v43, 2  ;;  %v1758_v32 = vrot.slane %v1731_v28, 2 }
 0x16c   : > { %v1750_v49 = vsel %vm956_vm1, %v1748_v3, %v1749_v62  ;;  %v1753_v12 = vsel %vm956_vm1, %v1751_v22, %v1752_v31  ;;  %v1760_v1 = vrot.slane %v1732_v34, 2  ;;  %v1761_v19 = vrot.slane %v1733_v40, 2 }
 0x16d   : > { %v1756_v55 = vsel %vm956_vm1, %v1754_v56, %v1755_v4  ;;  %v1759_v10 = vsel %vm956_vm1, %v1757_v2, %v1758_v32  ;;  %v1763_v7 = vrot.slane %v1734_v9, 2  ;;  %v1764_v36 = vrot.slane %v1735_v20, 2 }
 0x16e   : > { %v1762_v30 = vsel %vm956_vm1, %v1760_v1, %v1761_v19  ;;  %v1778_v54 = vadd.f32 %v1750_v49, %v1711_v13  ;;  %v1779_v42 = vadd.f32 %v1749_v62, %v1712_v50  ;;  %v1780_v33 = vadd.f32 %v1753_v12, %v1713_v27 }
 0x16f   : > { %v1765_v63 = vsel %vm956_vm1, %v1763_v7, %v1764_v36  ;;  %v1781_v59 = vadd.f32 %v1752_v31, %v1714_v5  ;;  %v1782_v0 = vadd.f32 %v1756_v55, %v1715_v58  ;;  %v1783_v47 = vadd.f32 %v1755_v4, %v1716_v15 }
 0x170   : > { %v1784_v38 = vadd.f32 %v1759_v10, %v1717_v17  ;;  %v1785_v45 = vadd.f32 %v1758_v32, %v1718_v61  ;;  %v1786_v60 = vadd.f32 %v1762_v30, %v1719_v11  ;;  %v1787_v44 = vadd.f32 %v1761_v19, %v1720_v6 }
 0x171   : > { %v1788_v26 = vadd.f32 %v1765_v63, %v1721_v8  ;;  %v1791_v25 = vmul.f32 %v1790_v16, %v5875_v51  ;;  %v1792_v18 = vmul.f32 %v1790_v16, %v5877_v37  ;;  %v1793_v13 = vmul.f32 %v1790_v16, %v5879_v41 }
 0x172   : > { %v1794_v50 = vmul.f32 %v1790_v16, %v5881_v57  ;;  %v1795_v43 = vmul.f32 %v1790_v16, %v5883_v24  ;;  %v1796_v27 = vmul.f32 %v1790_v16, %v5885_v23  ;;  %v1797_v5 = vmul.f32 %v1790_v16, %v5887_v21 }
 0x173   : > { %v1798_v58 = vmul.f32 %v1790_v16, %v5889_v46  ;;  %v1799_v15 = vmul.f32 %v1790_v16, %v5891_v53  ;;  %v1800_v17 = vmul.f32 %v1790_v16, %v5893_v48  ;;  %v6006_v61 = vmax.f32 %v5895_v29, 0.0 }
 0x174   : > { %v1789_v11 = vadd.f32 %v1764_v36, %v1722_v35  ;;  %v1801_v6 = vmul.f32 %v1790_v16, %v5897_v52  ;;  %v1802_v8 = vmul.f32 %v1790_v16, %v5899_v14  ;;  %v1803_v28 = vadd.f32 %v1791_v25, %v1778_v54 }
 0x175   : > { %v1804_v34 = vadd.f32 %v1792_v18, %v1779_v42  ;;  %v1805_v40 = vadd.f32 %v1793_v13, %v1780_v33  ;;  %v1806_v9 = vadd.f32 %v1794_v50, %v1781_v59  ;;  %v1807_v20 = vadd.f32 %v1795_v43, %v1782_v0 }
 0x176   : > { %v1808_v3 = vadd.f32 %v1796_v27, %v1783_v47  ;;  %v1809_v62 = vadd.f32 %v1797_v5, %v1784_v38  ;;  %v1810_v22 = vadd.f32 %v1798_v58, %v1785_v45  ;;  %v1811_v31 = vadd.f32 %v1799_v15, %v1786_v60 }
 0x177   : > { %v1812_v56 = vadd.f32 %v1800_v17, %v1787_v44  ;;  %v6012_v29 = vadd.f32 %v1801_v6, %v1788_v26  ;;  %v1815_v4 = vstv %s5992_s6  ;;  %v1814_v50 = vadd.f32 %v1802_v8, %v1789_v11  ;;  %s6673_s6 = sld [smem:[#allocation8 + $0x18]] }
 0x178   : > { %v1816_v35 = vmul.f32 %v1815_v4, %v5875_v51  ;;  %v1817_v2 = vmul.f32 %v1815_v4, %v5877_v37  ;;  %v1818_v32 = vmul.f32 %v1815_v4, %v5879_v41  ;;  %v1819_v49 = vmul.f32 %v1815_v4, %v5881_v57 }
 0x179   : > { %v1820_v12 = vmul.f32 %v1815_v4, %v5883_v24  ;;  %v1821_v1 = vmul.f32 %v1815_v4, %v5885_v23  ;;  %v1822_v19 = vmul.f32 %v1815_v4, %v5887_v21  ;;  %v1823_v55 = vmul.f32 %v1815_v4, %v5889_v46 }
 0x17a   : > { %v1824_v10 = vmul.f32 %v1815_v4, %v5891_v53  ;;  %v1825_v7 = vmul.f32 %v1815_v4, %v5893_v48  ;;  %v1826_v36 = vmul.f32 %v1815_v4, %v5897_v52  ;;  %v6027_v30 = vmul.f32 %v1815_v4, %v5899_v14 }
 0x17b   : > { %v1840_v54 = vrot.slane %v1816_v35, 1  ;;  %v1841_v42 = vrot.slane %v1817_v2, 1  ;;  %v1843_v16 = vrot.slane %v1818_v32, 1  ;;  %v1844_v63 = vrot.slane %v1819_v49, 1 }
 0x17c   : > { %v1846_v33 = vrot.slane %v1820_v12, 1  ;;  %v1847_v59 = vrot.slane %v1821_v1, 1  ;;  %v1849_v0 = vrot.slane %v1822_v19, 1  ;;  %v1850_v47 = vrot.slane %v1823_v55, 1 }
 0x17d   : > { %v1842_v38 = vsel %vm888_vm0, %v1840_v54, %v1841_v42  ;;  %v1845_v45 = vsel %vm888_vm0, %v1843_v16, %v1844_v63  ;;  %v1852_v60 = vrot.slane %v1824_v10, 1  ;;  %v1853_v44 = vrot.slane %v1825_v7, 1 }
 0x17e   : > { %v1848_v26 = vsel %vm888_vm0, %v1846_v33, %v1847_v59  ;;  %v1851_v25 = vsel %vm888_vm0, %v1849_v0, %v1850_v47  ;;  %v1855_v18 = vrot.slane %v1826_v36, 1  ;;  %v1856_v13 = vrot.slane %v6027_v30, 1 }
 0x17f   : > { %v1854_v43 = vsel %vm888_vm0, %v1852_v60, %v1853_v44  ;;  %v1870_v27 = vadd.f32 %v1842_v38, %v1803_v28  ;;  %v1882_v5 = vstv %s6010_s8  ;;  %v1871_v15 = vadd.f32 %v1841_v42, %v1804_v34  ;;  %s6747_s8 = sld [smem:[#allocation8 + $0x19]] }
 0x180   : > { %v1857_v58 = vsel %vm888_vm0, %v1855_v18, %v1856_v13  ;;  %v1872_v17 = vadd.f32 %v1845_v45, %v1805_v40  ;;  %v1873_v6 = vadd.f32 %v1844_v63, %v1806_v9  ;;  %v1874_v4 = vadd.f32 %v1848_v26, %v1807_v20 }
 0x181   : > { %v1875_v35 = vadd.f32 %v1847_v59, %v1808_v3  ;;  %v1876_v2 = vadd.f32 %v1851_v25, %v1809_v62  ;;  %v1877_v32 = vadd.f32 %v1850_v47, %v1810_v22  ;;  %v1878_v49 = vadd.f32 %v1854_v43, %v1811_v31 }
 0x182   : > { %v1879_v12 = vadd.f32 %v1853_v44, %v1812_v56  ;;  %v1883_v1 = vmul.f32 %v1882_v5, %v5875_v51  ;;  %v1884_v19 = vmul.f32 %v1882_v5, %v5877_v37  ;;  %v1885_v11 = vmul.f32 %v1882_v5, %v5879_v41 }
 0x183   : > { %v1886_v8 = vmul.f32 %v1882_v5, %v5881_v57  ;;  %v1887_v28 = vmul.f32 %v1882_v5, %v5883_v24  ;;  %v1888_v34 = vmul.f32 %v1882_v5, %v5885_v23  ;;  %v1889_v40 = vmul.f32 %v1882_v5, %v5887_v21 }
 0x184   : > { %v1890_v9 = vmul.f32 %v1882_v5, %v5889_v46  ;;  %v1891_v20 = vmul.f32 %v1882_v5, %v5891_v53  ;;  %v1892_v3 = vmul.f32 %v1882_v5, %v5893_v48  ;;  %v1893_v51 = vmul.f32 %v1882_v5, %v5897_v52 }
 0x185   : > { %v1894_v37 = vmul.f32 %v1882_v5, %v5899_v14  ;;  %v1907_v62 = vrot.slane %v1883_v1, 2  ;;  %v1908_v22 = vrot.slane %v1884_v19, 2  ;;  %v1910_v31 = vrot.slane %v1885_v11, 2 }
 0x186   : > { %v1911_v56 = vrot.slane %v1886_v8, 2  ;;  %v1913_v55 = vrot.slane %v1887_v28, 2  ;;  %v1914_v10 = vrot.slane %v1888_v34, 2  ;;  %v1916_v36 = vrot.slane %v1889_v40, 2 }
 0x187   : > { %v1909_v7 = vsel %vm956_vm1, %v1907_v62, %v1908_v22  ;;  %v1917_v30 = vrot.slane %v1890_v9, 2  ;;  %v1919_v54 = vrot.slane %v1891_v20, 2  ;;  %v1920_v63 = vrot.slane %v1892_v3, 2 }
 0x188   : > { %v1912_v42 = vsel %vm956_vm1, %v1910_v31, %v1911_v56  ;;  %v1915_v16 = vsel %vm956_vm1, %v1913_v55, %v1914_v10  ;;  %v1922_v33 = vrot.slane %v1893_v51, 2  ;;  %v1880_v59 = vadd.f32 %v1857_v58, %v6012_v29 }
 0x189   : > { %v1881_v0 = vadd.f32 %v1856_v13, %v1814_v50  ;;  %v1918_v47 = vsel %vm956_vm1, %v1916_v36, %v1917_v30  ;;  %v1923_v38 = vrot.slane %v1894_v37, 2  ;;  %v1921_v45 = vsel %vm956_vm1, %v1919_v54, %v1920_v63 }
 0x18a   : > { %v1937_v60 = vadd.f32 %v1909_v7, %v1870_v27  ;;  %v1938_v44 = vadd.f32 %v1908_v22, %v1871_v15  ;;  %v1939_v26 = vadd.f32 %v1912_v42, %v1872_v17  ;;  %v1940_v18 = vadd.f32 %v1911_v56, %v1873_v6 }
 0x18b   : > { %v1924_v25 = vsel %vm956_vm1, %v1922_v33, %v1923_v38  ;;  %v1941_v43 = vadd.f32 %v1915_v16, %v1874_v4  ;;  %v1942_v5 = vadd.f32 %v1914_v10, %v1875_v35  ;;  %v1943_v1 = vadd.f32 %v1918_v47, %v1876_v2 }
 0x18c   : > { %v1944_v19 = vadd.f32 %v1917_v30, %v1877_v32  ;;  %v1945_v11 = vadd.f32 %v1921_v45, %v1878_v49  ;;  %v1946_v29 = vadd.f32 %v1920_v63, %v1879_v12  ;;  %v1947_v13 = vadd.f32 %v1924_v25, %v1880_v59 }
 0x18d   : > { %v1948_v50 = vadd.f32 %v1923_v38, %v1881_v0  ;;  %v1949_v58 = vstv %s6047_s26  ;;  %v1974_v8 = vstv %s6049_s9  ;;  %v6077_v12 = vstv %s6056_s12  ;;  %s6774_s26 = sld [smem:[#allocation8 + $0x1a]]  ;;  %s6798_s9 = sld [smem:[#allocation3 + $0x1b]] }
 0x18e   : > { %v1950_v28 = vmul.f32 %v1949_v58, %v5879_v41  ;;  %v1951_v27 = vmul.f32 %v1949_v58, %v5881_v57  ;;  %v1952_v15 = vmul.f32 %v1949_v58, %v5883_v24  ;;  %v1953_v17 = vmul.f32 %v1949_v58, %v5885_v23  ;;  %s6841_s12 = sld [smem:[#allocation3 + $0x1c]] }
 0x18f   : > { %v1954_v6 = vmul.f32 %v1949_v58, %v5887_v21  ;;  %v1955_v4 = vmul.f32 %v1949_v58, %v5889_v46  ;;  %v1956_v35 = vmul.f32 %v1949_v58, %v5891_v53  ;;  %v1957_v2 = vmul.f32 %v1949_v58, %v5893_v48 }
 0x190   : > { %v1958_v32 = vmul.f32 %v1949_v58, %v5897_v52  ;;  %v1959_v49 = vmul.f32 %v1949_v58, %v5899_v14  ;;  %v6080_v34 = vstv %s6054_s11  ;;  %v1960_v40 = vmul.f32 %v1949_v58, %v5967_v39  ;;  %s6800_s11 = sld [smem:[#allocation6 + $0x3]] }
 0x191   : > { %v1961_v9 = vmul.f32 %v1949_v58, %v6006_v61  ;;  %v1962_v20 = vadd.f32 %v1950_v28, %v1937_v60  ;;  %v1963_v3 = vadd.f32 %v1951_v27, %v1938_v44  ;;  %v1964_v51 = vadd.f32 %v1952_v15, %v1939_v26 }
 0x192   : > { %v1965_v37 = vadd.f32 %v1953_v17, %v1940_v18  ;;  %v1966_v62 = vadd.f32 %v1954_v6, %v1941_v43  ;;  %v1967_v22 = vadd.f32 %v1955_v4, %v1942_v5  ;;  %v1968_v31 = vadd.f32 %v1956_v35, %v1943_v1 }
 0x193   : > { %v1969_v56 = vadd.f32 %v1957_v2, %v1944_v19  ;;  %v1970_v55 = vadd.f32 %v1958_v32, %v1945_v11  ;;  %v1971_v10 = vadd.f32 %v1959_v49, %v1946_v29  ;;  %v1975_v7 = vmul.f32 %v1974_v8, %v5879_v41 }
 0x194   : > { %v1976_v36 = vmul.f32 %v1974_v8, %v5881_v57  ;;  %v1977_v30 = vmul.f32 %v1974_v8, %v5883_v24  ;;  %v1978_v54 = vmul.f32 %v1974_v8, %v5885_v23  ;;  %v1979_v42 = vmul.f32 %v1974_v8, %v5887_v21 }
 0x195   : > { %v1980_v16 = vmul.f32 %v1974_v8, %v5889_v46  ;;  %v1981_v63 = vmul.f32 %v1974_v8, %v5891_v53  ;;  %v1982_v33 = vmul.f32 %v1974_v8, %v5893_v48  ;;  %v1983_v59 = vmul.f32 %v1974_v8, %v5897_v52 }
 0x196   : > { %v1984_v0 = vmul.f32 %v1974_v8, %v5899_v14  ;;  %v1985_v47 = vmul.f32 %v1974_v8, %v5967_v39  ;;  %v6096_v38 = vmul.f32 %v1974_v8, %v6006_v61  ;;  %v1999_v45 = vrot.slane %v1975_v7, 1 }
 0x197   : > { %v2000_v60 = vrot.slane %v1976_v36, 1  ;;  %v2002_v44 = vrot.slane %v1977_v30, 1  ;;  %v2003_v26 = vrot.slane %v1978_v54, 1  ;;  %v2005_v25 = vrot.slane %v1979_v42, 1 }
 0x198   : > { %v2006_v18 = vrot.slane %v1980_v16, 1  ;;  %v2008_v43 = vrot.slane %v1981_v63, 1  ;;  %v2009_v5 = vrot.slane %v1982_v33, 1  ;;  %v2011_v11 = vrot.slane %v1983_v59, 1 }
 0x199   : > { %v2001_v1 = vsel %vm888_vm0, %v1999_v45, %v2000_v60  ;;  %v2004_v19 = vsel %vm888_vm0, %v2002_v44, %v2003_v26  ;;  %v2012_v29 = vrot.slane %v1984_v0, 1  ;;  %v2014_v8 = vrot.slane %v1985_v47, 1 }
 0x19a   : > { %v2007_v58 = vsel %vm888_vm0, %v2005_v25, %v2006_v18  ;;  %v2010_v28 = vsel %vm888_vm0, %v2008_v43, %v2009_v5  ;;  %v2015_v27 = vrot.slane %v6096_v38, 1  ;;  %v1972_v15 = vadd.f32 %v1960_v40, %v1947_v13 }
 0x19b   : > { %v1973_v17 = vadd.f32 %v1961_v9, %v1948_v50  ;;  %v2013_v6 = vsel %vm888_vm0, %v2011_v11, %v2012_v29  ;;  %v2029_v4 = vadd.f32 %v2001_v1, %v1962_v20  ;;  %v2030_v2 = vadd.f32 %v2000_v60, %v1963_v3 }
 0x19c   : > { %v2016_v35 = vsel %vm888_vm0, %v2014_v8, %v2015_v27  ;;  %v2031_v32 = vadd.f32 %v2004_v19, %v1964_v51  ;;  %v2032_v49 = vadd.f32 %v2003_v26, %v1965_v37  ;;  %v2033_v7 = vadd.f32 %v2007_v58, %v1966_v62 }
 0x19d   : > { %v2034_v36 = vadd.f32 %v2006_v18, %v1967_v22  ;;  %v2035_v30 = vadd.f32 %v2010_v28, %v1968_v31  ;;  %v2036_v54 = vadd.f32 %v2009_v5, %v1969_v56  ;;  %v2037_v42 = vadd.f32 %v2013_v6, %v1970_v55  ;;  %v4334_v28 = vld [vmem:[%s4817_s10] sm:$0xff] }
 0x19e   : > { %v2038_v16 = vadd.f32 %v2012_v29, %v1971_v10  ;;  %v2042_v63 = vmul.f32 %v6077_v12, %v5879_v41  ;;  %v2043_v13 = vmul.f32 %v6077_v12, %v5881_v57  ;;  %v2044_v50 = vmul.f32 %v6077_v12, %v5883_v24 }
 0x19f   : > { %v2045_v40 = vmul.f32 %v6077_v12, %v5885_v23  ;;  %v2046_v9 = vmul.f32 %v6077_v12, %v5887_v21  ;;  %v2047_v20 = vmul.f32 %v6077_v12, %v5889_v46  ;;  %v2048_v41 = vmul.f32 %v6077_v12, %v5891_v53 }
 0x1a0   : > { %v2049_v57 = vmul.f32 %v6077_v12, %v5893_v48  ;;  %v2050_v24 = vmul.f32 %v6077_v12, %v5897_v52  ;;  %v2051_v23 = vmul.f32 %v6077_v12, %v5899_v14  ;;  %v2052_v21 = vmul.f32 %v6077_v12, %v5967_v39 }
 0x1a1   : > { %v2053_v46 = vmul.f32 %v6077_v12, %v6006_v61  ;;  %v2066_v53 = vrot.slane %v2042_v63, 2  ;;  %v2067_v3 = vrot.slane %v2043_v13, 2  ;;  %v2069_v48 = vrot.slane %v2044_v50, 2  ;;  %v6195_v13 = vld [vmem:[%s4817_s10 + $0x40] sm:$0xff] }
 0x1a2   : > { %v2070_v51 = vrot.slane %v2045_v40, 2  ;;  %v2072_v52 = vrot.slane %v2046_v9, 2  ;;  %v2073_v37 = vrot.slane %v2047_v20, 2  ;;  %v2075_v62 = vrot.slane %v2048_v41, 2  ;;  %v4343_v40 = vld [vmem:[%s4817_s10 + $0x48] sm:$0x3f] }
 0x1a3   : > { %v2068_v14 = vsel %vm956_vm1, %v2066_v53, %v2067_v3  ;;  %v2076_v22 = vrot.slane %v2049_v57, 2  ;;  %v2078_v31 = vrot.slane %v2050_v24, 2  ;;  %v2079_v55 = vrot.slane %v2051_v23, 2  ;;  %v6200_v20 = vld [vmem:[%s4817_s10 + $0x50] sm:$0xff]  ;;  %v4345_v57 = vld [vmem:[%s4817_s10 + $0x58] sm:$0x3f] }
 0x1a4   : > { %v2071_v56 = vsel %vm956_vm1, %v2069_v48, %v2070_v51  ;;  %v2074_v39 = vsel %vm956_vm1, %v2072_v52, %v2073_v37  ;;  %v2081_v10 = vrot.slane %v2052_v21, 2  ;;  %v2039_v61 = vadd.f32 %v2016_v35, %v1972_v15  ;;  %v6205_v23 = vld [vmem:[%s4817_s10 + $0x60] sm:$0xff] }
 0x1a5   : > { %v2040_v12 = vadd.f32 %v2015_v27, %v1973_v17  ;;  %v2077_v33 = vsel %vm956_vm1, %v2075_v62, %v2076_v22  ;;  %v2082_v59 = vrot.slane %v2053_v46, 2  ;;  %v2080_v0 = vsel %vm956_vm1, %v2078_v31, %v2079_v55  ;;  %v4335_v27 = vld [vmem:[%s4817_s10 + $0x8] sm:$0x3f] }
 0x1a6   : > { %v6142_v47 = vadd.f32 %v2068_v14, %v2029_v4  ;;  %v6144_v38 = vadd.f32 %v2067_v3, %v2030_v2  ;;  %v6146_v45 = vadd.f32 %v2071_v56, %v2031_v32  ;;  %v6149_v44 = vadd.f32 %v2070_v51, %v2032_v49  ;;  %v6180_v4 = vld [vmem:[%s4817_s10 + $0x10] sm:$0xff]  ;;  %v4337_v2 = vld [vmem:[%s4817_s10 + $0x18] sm:$0x3f]  ;;  %v6185_v49 = vld [vmem:[%s4817_s10 + $0x20] sm:$0xff] }
 0x1a7   : > { %v2083_v60 = vsel %vm956_vm1, %v2081_v10, %v2082_v59  ;;  %v6151_v26 = vadd.f32 %v2074_v39, %v2033_v7  ;;  %v6153_v25 = vadd.f32 %v2073_v37, %v2034_v36  ;;  %v6155_v18 = vadd.f32 %v2077_v33, %v2035_v30  ;;  %v4339_v36 = vld [vmem:[%s4817_s10 + $0x28] sm:$0x3f]  ;;  %v6210_v3 = vld [vmem:[%s4817_s10 + $0x70] sm:$0xff]  ;;  %v4349_v51 = vld [vmem:[%s4817_s10 + $0x78] sm:$0x3f] }
 0x1a8   : > { %7702 = vst [vmem:[#allocation21_spill] sm:$0xff] %v6142_v47  ;;  %7703 = vst [vmem:[#allocation23_spill] sm:$0xff] %v6144_v38  ;;  %v6157_v43 = vadd.f32 %v2076_v22, %v2036_v54  ;;  %v6159_v5 = vadd.f32 %v2080_v0, %v2037_v42  ;;  %v6161_v1 = vadd.f32 %v2079_v55, %v2038_v16  ;;  %v2109_v29 = vstv %s6117_s14  ;;  %v6190_v54 = vld [vmem:[%s4817_s10 + $0x30] sm:$0xff]  ;;  %v4341_v16 = vld [vmem:[%s4817_s10 + $0x38] sm:$0x3f]  ;;  %s6843_s14 = sld [smem:[#allocation3 + $0x1d]] }
 0x1a9   : > { %7704 = vst [vmem:[#allocation17_spill] sm:$0xff] %v6146_v45  ;;  %7705 = vst [vmem:[#allocation24_spill] sm:$0xff] %v6149_v44  ;;  %v6163_v19 = vadd.f32 %v2083_v60, %v2039_v61  ;;  %v6165_v11 = vadd.f32 %v2082_v59, %v2040_v12  ;;  %v6169_v58 = vstv %s6127_s27  ;;  %v2110_v8 = vmul.f32 %v4334_v28, %v2109_v29  ;;  %v4347_v46 = vld [vmem:[%s4817_s10 + $0x68] sm:$0x3f]  ;;  %s6853_s27 = sld [smem:[#allocation3 + $0x1e]] }
 0x1aa   : > { %7706 = vst [vmem:[#allocation18_spill] sm:$0xff] %v6151_v26  ;;  %7707 = vst [vmem:[#allocation19_spill] sm:$0xff] %v6153_v25  ;;  %v2111_v15 = vmul.f32 %v4335_v27, %v2109_v29  ;;  %v6174_v17 = vstv %s6129_s7  ;;  %v6177_v6 = vstv %s6135_s13  ;;  %v2112_v35 = vmul.f32 %v6180_v4, %v2109_v29  ;;  %v4350_v28 = vld [vmem:[%s4817_s10 + $0x1] sm:$0xff]  ;;  %v4351_v27 = vld [vmem:[%s4817_s10 + $0x9] sm:$0x3f]  ;;  %s6855_s7 = sld [smem:[#allocation3 + $0x1f]] }
 0x1ab   : > { %7708 = vst [vmem:[#allocation32_spill] sm:$0xff] %v6155_v18  ;;  %7709 = vst [vmem:[#allocation20_spill] sm:$0xff] %v6157_v43  ;;  %v2113_v32 = vmul.f32 %v4337_v2, %v2109_v29  ;;  %v2114_v7 = vmul.f32 %v6185_v49, %v2109_v29  ;;  %v2115_v30 = vmul.f32 %v4339_v36, %v2109_v29  ;;  %v6242_v36 = vld [vmem:[%s4817_s10 + $0x21] sm:$0xff]  ;;  %s7045_s13 = sld [smem:[#allocation3 + $0x20]] }
 0x1ac   : > { %7710 = vst [vmem:[#allocation13_spill] sm:$0xff] %v6159_v5  ;;  %7711 = vst [vmem:[#allocation26_spill] sm:$0xff] %v6161_v1  ;;  %v2116_v42 = vmul.f32 %v6190_v54, %v2109_v29  ;;  %v2117_v63 = vmul.f32 %v4341_v16, %v2109_v29  ;;  %v2118_v50 = vmul.f32 %v6195_v13, %v2109_v29  ;;  %v6249_v16 = vld [vmem:[%s4817_s10 + $0x31] sm:$0xff] }
 0x1ad   : > { %7712 = vst [vmem:[#allocation27_spill] sm:$0xff] %v6163_v19  ;;  %7713 = vst [vmem:[#allocation28_spill] sm:$0xff] %v6165_v11  ;;  %v2119_v9 = vmul.f32 %v4343_v40, %v2109_v29  ;;  %v2120_v41 = vmul.f32 %v6200_v20, %v2109_v29  ;;  %v2121_v24 = vmul.f32 %v4345_v57, %v2109_v29  ;;  %v4359_v57 = vld [vmem:[%s4817_s10 + $0x49] sm:$0x3f] }
 0x1ae   : > { %v2122_v21 = vmul.f32 %v6205_v23, %v2109_v29  ;;  %v2123_v53 = vmul.f32 %v4347_v46, %v2109_v29  ;;  %v2124_v48 = vmul.f32 %v6210_v3, %v2109_v29  ;;  %v2125_v52 = vmul.f32 %v4349_v51, %v2109_v29  ;;  %v6270_v51 = vld [vmem:[%s4817_s10 + $0x61] sm:$0xff] }
 0x1af   : > { %v2126_v37 = vadd.f32 %v2110_v8, %v6080_v34  ;;  %v2127_v14 = vadd.f32 %v2111_v15, %v6080_v34  ;;  %v2128_v62 = vadd.f32 %v2112_v35, %v6080_v34  ;;  %v2129_v22 = vadd.f32 %v2113_v32, %v6080_v34  ;;  %v6235_v35 = vld [vmem:[%s4817_s10 + $0x11] sm:$0xff]  ;;  %v4353_v32 = vld [vmem:[%s4817_s10 + $0x19] sm:$0x3f] }
 0x1b0   : > { %v2130_v31 = vadd.f32 %v2114_v7, %v6080_v34  ;;  %v2131_v56 = vadd.f32 %v2115_v30, %v6080_v34  ;;  %v2132_v39 = vadd.f32 %v2116_v42, %v6080_v34  ;;  %v2133_v55 = vadd.f32 %v2117_v63, %v6080_v34  ;;  %v4355_v30 = vld [vmem:[%s4817_s10 + $0x29] sm:$0x3f] }
 0x1b1   : > { %v2134_v10 = vadd.f32 %v2118_v50, %v6080_v34  ;;  %v2135_v61 = vadd.f32 %v2119_v9, %v6080_v34  ;;  %v2136_v12 = vadd.f32 %v2120_v41, %v6080_v34  ;;  %v2137_v33 = vadd.f32 %v2121_v24, %v6080_v34  ;;  %v4357_v50 = vld [vmem:[%s4817_s10 + $0x39] sm:$0x3f]  ;;  %v6256_v9 = vld [vmem:[%s4817_s10 + $0x41] sm:$0xff] }
 0x1b2   : > { %v2138_v59 = vadd.f32 %v2122_v21, %v6080_v34  ;;  %v2139_v0 = vadd.f32 %v2123_v53, %v6080_v34  ;;  %v2140_v60 = vadd.f32 %v2124_v48, %v6080_v34  ;;  %v2141_v29 = vadd.f32 %v2125_v52, %v6080_v34  ;;  %v6263_v21 = vld [vmem:[%s4817_s10 + $0x51] sm:$0xff]  ;;  %v4361_v53 = vld [vmem:[%s4817_s10 + $0x59] sm:$0x3f] }
 0x1b3   : > { %v2143_v8 = vmul.f32 %v4350_v28, %v6169_v58  ;;  %v2144_v15 = vmul.f32 %v4351_v27, %v6169_v58  ;;  %v2145_v2 = vmul.f32 %v6235_v35, %v6169_v58  ;;  %v2146_v7 = vmul.f32 %v4353_v32, %v6169_v58  ;;  %v4363_v28 = vld [vmem:[%s4817_s10 + $0x69] sm:$0x3f]  ;;  %v6277_v32 = vld [vmem:[%s4817_s10 + $0x71] sm:$0xff] }
 0x1b4   : > { %v2147_v34 = vmul.f32 %v6242_v36, %v6169_v58  ;;  %v2148_v42 = vmul.f32 %v4355_v30, %v6169_v58  ;;  %v2149_v63 = vmul.f32 %v6249_v16, %v6169_v58  ;;  %v2150_v40 = vmul.f32 %v4357_v50, %v6169_v58  ;;  %7714 = vst [vmem:[#allocation29_spill] sm:$0xff] %v6277_v32  ;;  %v4365_v50 = vld [vmem:[%s4817_s10 + $0x79] sm:$0x3f] }
 0x1b5   : > { %v2151_v41 = vmul.f32 %v6256_v9, %v6169_v58  ;;  %v2152_v24 = vmul.f32 %v4359_v57, %v6169_v58  ;;  %v2153_v46 = vmul.f32 %v6263_v21, %v6169_v58  ;;  %v2154_v48 = vmul.f32 %v4361_v53, %v6169_v58 }
 0x1b6   : > { %v2155_v52 = vmul.f32 %v6270_v51, %v6169_v58  ;;  %v2156_v27 = vmul.f32 %v4363_v28, %v6169_v58  ;;  %v2157_v30 = vmul.f32 %v6277_v32, %v6169_v58  ;;  %v2158_v57 = vmul.f32 %v4365_v50, %v6169_v58 }
 0x1b7   : > { %v2159_v11 = vadd.f32 %v2143_v8, %v2126_v37  ;;  %v2160_v19 = vadd.f32 %v2144_v15, %v2127_v14  ;;  %v2161_v53 = vadd.f32 %v2145_v2, %v2128_v62  ;;  %v2162_v1 = vadd.f32 %v2146_v7, %v2129_v22  ;;  %v4366_v62 = vld [vmem:[%s4817_s10 + $0x2] sm:$0xff]  ;;  %v4373_v8 = vld [vmem:[%s4817_s10 + $0x3a] sm:$0x3f] }
 0x1b8   : > { %v2163_v5 = vadd.f32 %v2147_v34, %v2130_v31  ;;  %v2164_v43 = vadd.f32 %v2148_v42, %v2131_v56  ;;  %v2165_v18 = vadd.f32 %v2149_v63, %v2132_v39  ;;  %v2166_v28 = vadd.f32 %v2150_v40, %v2133_v55  ;;  %v4367_v31 = vld [vmem:[%s4817_s10 + $0xa] sm:$0x3f]  ;;  %v6288_v39 = vld [vmem:[%s4817_s10 + $0x12] sm:$0xff]  ;;  %v6309_v2 = vld [vmem:[%s4817_s10 + $0x42] sm:$0xff] }
 0x1b9   : > { %v2167_v25 = vadd.f32 %v2151_v41, %v2134_v10  ;;  %v2168_v26 = vadd.f32 %v2152_v24, %v2135_v61  ;;  %v2169_v44 = vadd.f32 %v2153_v46, %v2136_v12  ;;  %v2170_v45 = vadd.f32 %v2154_v48, %v2137_v33  ;;  %v4369_v10 = vld [vmem:[%s4817_s10 + $0x1a] sm:$0x3f]  ;;  %v6295_v12 = vld [vmem:[%s4817_s10 + $0x22] sm:$0xff]  ;;  %7717 = vst [vmem:[#allocation14_spill] sm:$0xff] %v6309_v2  ;;  %v4375_v34 = vld [vmem:[%s4817_s10 + $0x4a] sm:$0x3f] }
 0x1ba   : > { %v2171_v38 = vadd.f32 %v2155_v52, %v2138_v59  ;;  %v2172_v58 = vadd.f32 %v2156_v27, %v2139_v0  ;;  %v2173_v37 = vadd.f32 %v2157_v30, %v2140_v60  ;;  %v2174_v14 = vadd.f32 %v2158_v57, %v2141_v29  ;;  %7715 = vst [vmem:[#allocation30_spill] sm:$0xff] %v6295_v12  ;;  %v4371_v59 = vld [vmem:[%s4817_s10 + $0x2a] sm:$0x3f]  ;;  %v6302_v60 = vld [vmem:[%s4817_s10 + $0x32] sm:$0xff]  ;;  %v4377_v41 = vld [vmem:[%s4817_s10 + $0x5a] sm:$0x3f] }
 0x1bb   : > { %v2176_v22 = vmul.f32 %v4366_v62, %v6174_v17  ;;  %v2177_v56 = vmul.f32 %v4367_v31, %v6174_v17  ;;  %v2178_v55 = vmul.f32 %v6288_v39, %v6174_v17  ;;  %v2179_v61 = vmul.f32 %v4369_v10, %v6174_v17  ;;  %7716 = vst [vmem:[#allocation22_spill] sm:$0xff] %v6302_v60  ;;  %v6316_v63 = vld [vmem:[%s4817_s10 + $0x52] sm:$0xff]  ;;  %v6323_v46 = vld [vmem:[%s4817_s10 + $0x62] sm:$0xff]  ;;  %v4379_v52 = vld [vmem:[%s4817_s10 + $0x6a] sm:$0x3f] }
 0x1bc   : > { %v2180_v33 = vmul.f32 %v6295_v12, %v6174_v17  ;;  %v2181_v0 = vmul.f32 %v4371_v59, %v6174_v17  ;;  %v2182_v29 = vmul.f32 %v6302_v60, %v6174_v17  ;;  %v2183_v15 = vmul.f32 %v4373_v8, %v6174_v17  ;;  %7718 = vst [vmem:[#allocation15_spill] sm:$0xff] %v6316_v63  ;;  %v6330_v30 = vld [vmem:[%s4817_s10 + $0x72] sm:$0xff]  ;;  %v4381_v57 = vld [vmem:[%s4817_s10 + $0x7a] sm:$0x3f] }
 0x1bd   : > { %v2184_v7 = vmul.f32 %v6309_v2, %v6174_v17  ;;  %v2185_v42 = vmul.f32 %v4375_v34, %v6174_v17  ;;  %v2186_v40 = vmul.f32 %v6316_v63, %v6174_v17  ;;  %v2187_v24 = vmul.f32 %v4377_v41, %v6174_v17  ;;  %7719 = vst [vmem:[#allocation16_spill] sm:$0xff] %v6323_v46 }
 0x1be   : > { %v2188_v48 = vmul.f32 %v6323_v46, %v6174_v17  ;;  %v2189_v27 = vmul.f32 %v4379_v52, %v6174_v17  ;;  %7720 = vst [vmem:[#allocation31_spill] sm:$0xff] %v6330_v30  ;;  %v2190_v50 = vmul.f32 %v6330_v30, %v6174_v17  ;;  %v2191_v62 = vmul.f32 %v4381_v57, %v6174_v17 }
 0x1bf   : > { %v2192_v31 = vadd.f32 %v2176_v22, %v2159_v11  ;;  %v2193_v10 = vadd.f32 %v2177_v56, %v2160_v19  ;;  %v2194_v59 = vadd.f32 %v2178_v55, %v2161_v53  ;;  %v2195_v8 = vadd.f32 %v2179_v61, %v2162_v1  ;;  %v4387_v22 = vld [vmem:[%s4817_s10 + $0x68] sm:$0x3f]  ;;  %v4388_v61 = vld [vmem:[%s4817_s10 + $0x78] sm:$0x3f] }
 0x1c0   : > { %v2196_v34 = vadd.f32 %v2180_v33, %v2163_v5  ;;  %v2197_v41 = vadd.f32 %v2181_v0, %v2164_v43  ;;  %v2198_v47 = vadd.f32 %v2182_v29, %v2165_v18  ;;  %v2199_v46 = vadd.f32 %v2183_v15, %v2166_v28  ;;  %v4382_v43 = vld [vmem:[%s4817_s10 + $0x18] sm:$0x3f]  ;;  %v6373_v0 = vld [vmem:[%s4817_s10 + $0x80] sm:$0xff]  ;;  %v4390_v15 = vld [vmem:[%s4817_s10 + $0x88] sm:$0x3f] }
 0x1c1   : > { %v2200_v63 = vadd.f32 %v2184_v7, %v2167_v25  ;;  %v2201_v52 = vadd.f32 %v2185_v42, %v2168_v26  ;;  %v2202_v2 = vadd.f32 %v2186_v40, %v2169_v44  ;;  %v2203_v60 = vadd.f32 %v2187_v24, %v2170_v45  ;;  %v4383_v45 = vld [vmem:[%s4817_s10 + $0x28] sm:$0x3f]  ;;  %v4384_v5 = vld [vmem:[%s4817_s10 + $0x38] sm:$0x3f] }
 0x1c2   : > { %v2204_v12 = vadd.f32 %v2188_v48, %v2171_v38  ;;  %v2205_v30 = vadd.f32 %v2189_v27, %v2172_v58  ;;  %v2206_v19 = vadd.f32 %v2190_v50, %v2173_v37  ;;  %v2207_v1 = vadd.f32 %v2191_v62, %v2174_v14  ;;  %v4386_v58 = vld [vmem:[%s4817_s10 + $0x58] sm:$0x3f] }
 0x1c3   : > { %v2209_v18 = vmul.f32 %v6180_v4, %v6177_v6  ;;  %v2210_v25 = vmul.f32 %v4382_v43, %v6177_v6  ;;  %v2211_v38 = vmul.f32 %v6185_v49, %v6177_v6  ;;  %v2212_v44 = vmul.f32 %v4383_v45, %v6177_v6  ;;  %v4385_v4 = vld [vmem:[%s4817_s10 + $0x48] sm:$0x3f] }
 0x1c4   : > { %v2213_v26 = vmul.f32 %v6190_v54, %v6177_v6  ;;  %v2214_v11 = vmul.f32 %v4384_v5, %v6177_v6  ;;  %v2215_v17 = vmul.f32 %v6195_v13, %v6177_v6  ;;  %v2216_v53 = vmul.f32 %v4385_v4, %v6177_v6 }
 0x1c5   : > { %v2217_v28 = vmul.f32 %v6200_v20, %v6177_v6  ;;  %v2218_v37 = vmul.f32 %v4386_v58, %v6177_v6  ;;  %v2219_v14 = vmul.f32 %v6205_v23, %v6177_v6  ;;  %v2220_v56 = vmul.f32 %v4387_v22, %v6177_v6  ;;  %v4397_v58 = vld [vmem:[%s4817_s10 + $0x79] sm:$0x3f] }
 0x1c6   : > { %v2221_v55 = vmul.f32 %v6210_v3, %v6177_v6  ;;  %v2222_v33 = vmul.f32 %v4388_v61, %v6177_v6  ;;  %v2223_v29 = vmul.f32 %v6373_v0, %v6177_v6  ;;  %v2224_v7 = vmul.f32 %v4390_v15, %v6177_v6 }
 0x1c7   : > { %v2225_v42 = vadd.f32 %v2209_v18, %v2192_v31  ;;  %v2226_v40 = vadd.f32 %v2210_v25, %v2193_v10  ;;  %v2227_v24 = vadd.f32 %v2211_v38, %v2194_v59  ;;  %v2228_v48 = vadd.f32 %v2212_v44, %v2195_v8  ;;  %v4395_v44 = vld [vmem:[%s4817_s10 + $0x59] sm:$0x3f] }
 0x1c8   : > { %v2229_v27 = vadd.f32 %v2213_v26, %v2196_v34  ;;  %v2230_v50 = vadd.f32 %v2214_v11, %v2197_v41  ;;  %v2231_v57 = vadd.f32 %v2215_v17, %v2198_v47  ;;  %v2232_v62 = vadd.f32 %v2216_v53, %v2199_v46  ;;  %v4391_v47 = vld [vmem:[%s4817_s10 + $0x19] sm:$0x3f]  ;;  %v4396_v17 = vld [vmem:[%s4817_s10 + $0x69] sm:$0x3f] }
 0x1c9   : > { %v2233_v43 = vadd.f32 %v2217_v28, %v2200_v63  ;;  %v2234_v45 = vadd.f32 %v2218_v37, %v2201_v52  ;;  %v2235_v5 = vadd.f32 %v2219_v14, %v2202_v2  ;;  %v2236_v4 = vadd.f32 %v2220_v56, %v2203_v60  ;;  %v4393_v52 = vld [vmem:[%s4817_s10 + $0x39] sm:$0x3f]  ;;  %v6404_v14 = vld [vmem:[%s4817_s10 + $0x81] sm:$0xff]  ;;  %v4399_v56 = vld [vmem:[%s4817_s10 + $0x89] sm:$0x3f] }
 0x1ca   : > { %v2237_v6 = vadd.f32 %v2221_v55, %v2204_v12  ;;  %v2238_v31 = vadd.f32 %v2222_v33, %v2205_v30  ;;  %v2239_v18 = vadd.f32 %v2223_v29, %v2206_v19  ;;  %v2240_v10 = vadd.f32 %v2224_v7, %v2207_v1  ;;  %v4392_v12 = vld [vmem:[%s4817_s10 + $0x29] sm:$0x3f]  ;;  %7721 = vst [vmem:[#allocation25_spill] sm:$0xff] %v6404_v14 }
 0x1cb   : > { %v2241_v59 = vstv %s6336_s15  ;;  %v6381_v8 = vstv %s6338_s16  ;;  %v6386_v63 = vstv %s6344_s17  ;;  %v6389_v46 = vstv %s6346_s18  ;;  %s7047_s15 = sld [smem:[#allocation3 + $0x21]]  ;;  %s7049_s16 = sld [smem:[#allocation3 + $0x22]] }
 0x1cc   : > { %v2242_v34 = vmul.f32 %v6235_v35, %v2241_v59  ;;  %v2243_v41 = vmul.f32 %v4391_v47, %v2241_v59  ;;  %v2244_v60 = vmul.f32 %v6242_v36, %v2241_v59  ;;  %v2245_v2 = vmul.f32 %v4392_v12, %v2241_v59  ;;  %v4394_v1 = vld [vmem:[%s4817_s10 + $0x49] sm:$0x3f]  ;;  %s7051_s17 = sld [smem:[#allocation3 + $0x23]] }
 0x1cd   : > { %v2246_v30 = vmul.f32 %v6249_v16, %v2241_v59  ;;  %v2247_v19 = vmul.f32 %v4393_v52, %v2241_v59  ;;  %v2248_v35 = vmul.f32 %v6256_v9, %v2241_v59  ;;  %v2249_v25 = vmul.f32 %v4394_v1, %v2241_v59  ;;  %s7205_s18 = sld [smem:[#allocation8 + $0x1b]] }
 0x1ce   : > { %v2250_v38 = vmul.f32 %v6263_v21, %v2241_v59  ;;  %v2251_v26 = vmul.f32 %v4395_v44, %v2241_v59  ;;  %v2252_v11 = vmul.f32 %v6270_v51, %v2241_v59  ;;  %v2253_v53 = vmul.f32 %v4396_v17, %v2241_v59 }
 0x1cf   : > { %v2254_v28 = vmul.f32 %v6277_v32, %v2241_v59  ;;  %v2255_v37 = vmul.f32 %v4397_v58, %v2241_v59  ;;  %v2256_v22 = vmul.f32 %v6404_v14, %v2241_v59  ;;  %v2257_v55 = vmul.f32 %v4399_v56, %v2241_v59 }
 0x1d0   : > { %v2258_v61 = vadd.f32 %v2242_v34, %v2225_v42  ;;  %v2259_v33 = vadd.f32 %v2243_v41, %v2226_v40  ;;  %v2260_v29 = vadd.f32 %v2244_v60, %v2227_v24  ;;  %v2261_v15 = vadd.f32 %v2245_v2, %v2228_v48  ;;  %v4400_v24 = vld [vmem:[%s4817_s10 + $0x1a] sm:$0x3f] }
 0x1d1   : > { %v2262_v7 = vadd.f32 %v2246_v30, %v2229_v27  ;;  %v2263_v47 = vadd.f32 %v2247_v19, %v2230_v50  ;;  %v2264_v12 = vadd.f32 %v2248_v35, %v2231_v57  ;;  %v2265_v52 = vadd.f32 %v2249_v25, %v2232_v62  ;;  %v7722_v27 = vld [vmem:[#allocation30_spill] sm:$0xff]  ;;  %v4404_v41 = vld [vmem:[%s4817_s10 + $0x5a] sm:$0x3f]  ;;  %v7727_v25 = vld [vmem:[#allocation31_spill] sm:$0xff] }
 0x1d2   : > { %v2266_v1 = vadd.f32 %v2250_v38, %v2233_v43  ;;  %v2267_v44 = vadd.f32 %v2251_v26, %v2234_v45  ;;  %v2268_v17 = vadd.f32 %v2252_v11, %v2235_v5  ;;  %v2269_v58 = vadd.f32 %v2253_v53, %v2236_v4  ;;  %v4401_v57 = vld [vmem:[%s4817_s10 + $0x2a] sm:$0x3f]  ;;  %v4402_v5 = vld [vmem:[%s4817_s10 + $0x3a] sm:$0x3f]  ;;  %v6437_v53 = vld [vmem:[%s4817_s10 + $0x82] sm:$0xff] }
 0x1d3   : > { %v2270_v32 = vadd.f32 %v2254_v28, %v2237_v6  ;;  %v2271_v14 = vadd.f32 %v2255_v37, %v2238_v31  ;;  %v2272_v59 = vadd.f32 %v2256_v22, %v2239_v18  ;;  %v2273_v42 = vadd.f32 %v2257_v55, %v2240_v10  ;;  %v7723_v43 = vld [vmem:[#allocation22_spill] sm:$0xff]  ;;  %v7725_v10 = vld [vmem:[#allocation15_spill] sm:$0xff]  ;;  %v7726_v2 = vld [vmem:[#allocation16_spill] sm:$0xff]  ;;  %7728 = vst [vmem:[#allocation30_spill] sm:$0xff] %v6437_v53 }
 0x1d4   : > { %v2275_v40 = vmul.f32 %v6288_v39, %v6381_v8  ;;  %v2276_v48 = vmul.f32 %v4400_v24, %v6381_v8  ;;  %v2277_v50 = vmul.f32 %v7722_v27, %v6381_v8  ;;  %v2278_v62 = vmul.f32 %v4401_v57, %v6381_v8  ;;  %v7724_v39 = vld [vmem:[#allocation14_spill] sm:$0xff]  ;;  %v4406_v26 = vld [vmem:[%s4817_s10 + $0x7a] sm:$0x3f] }
 0x1d5   : > { %v2279_v45 = vmul.f32 %v7723_v43, %v6381_v8  ;;  %v2280_v4 = vmul.f32 %v4402_v5, %v6381_v8  ;;  %v2281_v6 = vmul.f32 %v7724_v39, %v6381_v8  ;;  %v4403_v31 = vld [vmem:[%s4817_s10 + $0x4a] sm:$0x3f]  ;;  %v2283_v34 = vmul.f32 %v7725_v10, %v6381_v8 }
 0x1d6   : > { %v2282_v18 = vmul.f32 %v4403_v31, %v6381_v8  ;;  %v2284_v60 = vmul.f32 %v4404_v41, %v6381_v8  ;;  %v2285_v30 = vmul.f32 %v7726_v2, %v6381_v8  ;;  %v4405_v19 = vld [vmem:[%s4817_s10 + $0x6a] sm:$0x3f]  ;;  %v2287_v38 = vmul.f32 %v7727_v25, %v6381_v8 }
 0x1d7   : > { %v2286_v35 = vmul.f32 %v4405_v19, %v6381_v8  ;;  %v2288_v11 = vmul.f32 %v4406_v26, %v6381_v8  ;;  %v2289_v28 = vmul.f32 %v6437_v53, %v6381_v8  ;;  %v4408_v37 = vld [vmem:[%s4817_s10 + $0x8a] sm:$0x3f]  ;;  %v2291_v56 = vadd.f32 %v2275_v40, %v2258_v61 }
 0x1d8   : > { %v2290_v22 = vmul.f32 %v4408_v37, %v6381_v8  ;;  %v2292_v55 = vadd.f32 %v2276_v48, %v2259_v33  ;;  %v2293_v24 = vadd.f32 %v2277_v50, %v2260_v29  ;;  %v2294_v57 = vadd.f32 %v2278_v62, %v2261_v15  ;;  %v4409_v29 = vld [vmem:[%s4817_s10 + $0x28] sm:$0x3f]  ;;  %v4416_v50 = vld [vmem:[%s4817_s10 + $0x90] sm:$0xff] }
 0x1d9   : > { %v2295_v5 = vadd.f32 %v2279_v45, %v2262_v7  ;;  %v2296_v31 = vadd.f32 %v2280_v4, %v2263_v47  ;;  %v2297_v41 = vadd.f32 %v2281_v6, %v2264_v12  ;;  %v2298_v19 = vadd.f32 %v2282_v18, %v2265_v52  ;;  %v4410_v47 = vld [vmem:[%s4817_s10 + $0x38] sm:$0x3f]  ;;  %v4415_v48 = vld [vmem:[%s4817_s10 + $0x88] sm:$0x3f] }
 0x1da   : > { %v2299_v26 = vadd.f32 %v2283_v34, %v2266_v1  ;;  %v2300_v25 = vadd.f32 %v2284_v60, %v2267_v44  ;;  %v2301_v2 = vadd.f32 %v2285_v30, %v2268_v17  ;;  %v2302_v10 = vadd.f32 %v2286_v35, %v2269_v58  ;;  %v4412_v1 = vld [vmem:[%s4817_s10 + $0x58] sm:$0x3f]  ;;  %v4413_v17 = vld [vmem:[%s4817_s10 + $0x68] sm:$0x3f] }
 0x1db   : > { %v2303_v53 = vadd.f32 %v2287_v38, %v2270_v32  ;;  %v2304_v39 = vadd.f32 %v2288_v11, %v2271_v14  ;;  %v2305_v8 = vadd.f32 %v2289_v28, %v2272_v59  ;;  %v2306_v61 = vadd.f32 %v2290_v22, %v2273_v42  ;;  %v4411_v14 = vld [vmem:[%s4817_s10 + $0x48] sm:$0x3f]  ;;  %v4417_v45 = vld [vmem:[%s4817_s10 + $0x98] sm:$0x3f] }
 0x1dc   : > { %v2308_v33 = vmul.f32 %v6185_v49, %v6386_v63  ;;  %v2309_v15 = vmul.f32 %v4409_v29, %v6386_v63  ;;  %v2310_v7 = vmul.f32 %v6190_v54, %v6386_v63  ;;  %v2311_v12 = vmul.f32 %v4410_v47, %v6386_v63 }
 0x1dd   : > { %v2312_v32 = vmul.f32 %v6195_v13, %v6386_v63  ;;  %v2313_v52 = vmul.f32 %v4411_v14, %v6386_v63  ;;  %v2314_v49 = vmul.f32 %v6200_v20, %v6386_v63  ;;  %v2315_v44 = vmul.f32 %v4412_v1, %v6386_v63  ;;  %v4414_v13 = vld [vmem:[%s4817_s10 + $0x78] sm:$0x3f] }
 0x1de   : > { %v2316_v54 = vmul.f32 %v6205_v23, %v6386_v63  ;;  %v2317_v58 = vmul.f32 %v4413_v17, %v6386_v63  ;;  %v2318_v59 = vmul.f32 %v6210_v3, %v6386_v63  ;;  %v2319_v42 = vmul.f32 %v4414_v13, %v6386_v63 }
 0x1df   : > { %v2320_v40 = vmul.f32 %v6373_v0, %v6386_v63  ;;  %v2321_v20 = vmul.f32 %v4415_v48, %v6386_v63  ;;  %v2322_v62 = vmul.f32 %v4416_v50, %v6386_v63  ;;  %v2323_v23 = vmul.f32 %v4417_v45, %v6386_v63 }
 0x1e0   : > { %v2324_v4 = vadd.f32 %v2308_v33, %v2291_v56  ;;  %v2325_v6 = vadd.f32 %v2309_v15, %v2292_v55  ;;  %v2326_v18 = vadd.f32 %v2310_v7, %v2293_v24  ;;  %v2327_v34 = vadd.f32 %v2311_v12, %v2294_v57  ;;  %v4418_v24 = vld [vmem:[%s4817_s10 + $0x29] sm:$0x3f]  ;;  %v7730_v33 = vld [vmem:[#allocation25_spill] sm:$0xff]  ;;  %v4426_v12 = vld [vmem:[%s4817_s10 + $0x99] sm:$0x3f] }
 0x1e1   : > { %v2328_v3 = vadd.f32 %v2312_v32, %v2295_v5  ;;  %v2329_v60 = vadd.f32 %v2313_v52, %v2296_v31  ;;  %v2330_v30 = vadd.f32 %v2314_v49, %v2297_v41  ;;  %v2331_v35 = vadd.f32 %v2315_v44, %v2298_v19  ;;  %v4421_v31 = vld [vmem:[%s4817_s10 + $0x59] sm:$0x3f]  ;;  %v4422_v19 = vld [vmem:[%s4817_s10 + $0x69] sm:$0x3f] }
 0x1e2   : > { %v2332_v0 = vadd.f32 %v2316_v54, %v2299_v26  ;;  %v2333_v38 = vadd.f32 %v2317_v58, %v2300_v25  ;;  %v2334_v11 = vadd.f32 %v2318_v59, %v2301_v2  ;;  %v2335_v28 = vadd.f32 %v2319_v42, %v2302_v10  ;;  %v4419_v2 = vld [vmem:[%s4817_s10 + $0x39] sm:$0x3f]  ;;  %v4424_v15 = vld [vmem:[%s4817_s10 + $0x89] sm:$0x3f] }
 0x1e3   : > { %v2336_v37 = vadd.f32 %v2320_v40, %v2303_v53  ;;  %v2337_v22 = vadd.f32 %v2321_v20, %v2304_v39  ;;  %v2338_v63 = vadd.f32 %v2322_v62, %v2305_v8  ;;  %v2339_v56 = vadd.f32 %v2323_v23, %v2306_v61  ;;  %v4420_v53 = vld [vmem:[%s4817_s10 + $0x49] sm:$0x3f]  ;;  %v4423_v61 = vld [vmem:[%s4817_s10 + $0x79] sm:$0x3f] }
 0x1e4   : > { %v2341_v55 = vmul.f32 %v6242_v36, %v6389_v46  ;;  %v2342_v57 = vmul.f32 %v4418_v24, %v6389_v46  ;;  %v2343_v10 = vmul.f32 %v6249_v16, %v6389_v46  ;;  %v2344_v39 = vmul.f32 %v4419_v2, %v6389_v46 }
 0x1e5   : > { %v2345_v25 = vmul.f32 %v6256_v9, %v6389_v46  ;;  %v2346_v5 = vmul.f32 %v4420_v53, %v6389_v46  ;;  %v2347_v36 = vmul.f32 %v6263_v21, %v6389_v46  ;;  %v2348_v41 = vmul.f32 %v4421_v31, %v6389_v46  ;;  %v7729_v9 = vld [vmem:[#allocation29_spill] sm:$0xff]  ;;  %v4433_v53 = vld [vmem:[%s4817_s10 + $0x8a] sm:$0x3f] }
 0x1e6   : > { %v2349_v16 = vmul.f32 %v6270_v51, %v6389_v46  ;;  %v2350_v26 = vmul.f32 %v4422_v19, %v6389_v46  ;;  %v2351_v8 = vmul.f32 %v7729_v9, %v6389_v46  ;;  %v2352_v21 = vmul.f32 %v4423_v61, %v6389_v46  ;;  %v4425_v51 = vld [vmem:[%s4817_s10 + $0x91] sm:$0xff] }
 0x1e7   : > { %v2353_v29 = vmul.f32 %v7730_v33, %v6389_v46  ;;  %v2354_v7 = vmul.f32 %v4424_v15, %v6389_v46  ;;  %v2355_v47 = vmul.f32 %v4425_v51, %v6389_v46  ;;  %v2356_v32 = vmul.f32 %v4426_v12, %v6389_v46  ;;  %v4434_v61 = vld [vmem:[%s4817_s10 + $0x92] sm:$0xff]  ;;  %v4435_v33 = vld [vmem:[%s4817_s10 + $0x9a] sm:$0x3f] }
 0x1e8   : > { %v2357_v14 = vadd.f32 %v2341_v55, %v2324_v4  ;;  %v2358_v52 = vadd.f32 %v2342_v57, %v2325_v6  ;;  %v2359_v49 = vadd.f32 %v2343_v10, %v2326_v18  ;;  %v2360_v1 = vadd.f32 %v2344_v39, %v2327_v34  ;;  %v4427_v4 = vld [vmem:[%s4817_s10 + $0x2a] sm:$0x3f]  ;;  %v4428_v34 = vld [vmem:[%s4817_s10 + $0x3a] sm:$0x3f] }
 0x1e9   : > { %v2361_v44 = vadd.f32 %v2345_v25, %v2328_v3  ;;  %v2362_v54 = vadd.f32 %v2346_v5, %v2329_v60  ;;  %v2363_v17 = vadd.f32 %v2347_v36, %v2330_v30  ;;  %v2364_v58 = vadd.f32 %v2348_v41, %v2331_v35  ;;  %v7731_v60 = vld [vmem:[#allocation14_spill] sm:$0xff]  ;;  %v4432_v10 = vld [vmem:[%s4817_s10 + $0x7a] sm:$0x3f] }
 0x1ea   : > { %v2365_v59 = vadd.f32 %v2349_v16, %v2332_v0  ;;  %v2366_v13 = vadd.f32 %v2350_v26, %v2333_v38  ;;  %v2367_v42 = vadd.f32 %v2351_v8, %v2334_v11  ;;  %v2368_v40 = vadd.f32 %v2352_v21, %v2335_v28  ;;  %v4429_v35 = vld [vmem:[%s4817_s10 + $0x4a] sm:$0x3f]  ;;  %v7732_v38 = vld [vmem:[#allocation15_spill] sm:$0xff]  ;;  %v4430_v28 = vld [vmem:[%s4817_s10 + $0x5a] sm:$0x3f] }
 0x1eb   : > { %v2369_v48 = vadd.f32 %v2353_v29, %v2336_v37  ;;  %v2370_v46 = vadd.f32 %v2354_v7, %v2337_v22  ;;  %v2371_v20 = vadd.f32 %v2355_v47, %v2338_v63  ;;  %v2372_v50 = vadd.f32 %v2356_v32, %v2339_v56  ;;  %v7733_v22 = vld [vmem:[#allocation16_spill] sm:$0xff]  ;;  %v7735_v39 = vld [vmem:[#allocation30_spill] sm:$0xff] }
 0x1ec   : > { %v2373_v62 = vstv %s6475_s19  ;;  %v6517_v45 = vstv %s6477_s3  ;;  %v6530_v55 = vstv %s6499_s23  ;;  %v6533_v24 = vstv %s6501_s24  ;;  %s7207_s19 = sld [smem:[#allocation8 + $0x1c]]  ;;  %s7217_s3 = sld [smem:[#allocation8 + $0x1d]] }
 0x1ed   : > { %v2374_v23 = vmul.f32 %v7722_v27, %v2373_v62  ;;  %v2375_v6 = vmul.f32 %v4427_v4, %v2373_v62  ;;  %v2376_v18 = vmul.f32 %v7723_v43, %v2373_v62  ;;  %v2377_v3 = vmul.f32 %v4428_v34, %v2373_v62  ;;  %v4431_v27 = vld [vmem:[%s4817_s10 + $0x6a] sm:$0x3f]  ;;  %v7734_v43 = vld [vmem:[#allocation31_spill] sm:$0xff]  ;;  %s7219_s23 = sld [smem:[#allocation8 + $0x1e]]  ;;  %s7365_s24 = sld [smem:[#allocation8 + $0x20]] }
 0x1ee   : > { %v2378_v30 = vmul.f32 %v7731_v60, %v2373_v62  ;;  %v2379_v0 = vmul.f32 %v4429_v35, %v2373_v62  ;;  %v2380_v11 = vmul.f32 %v7732_v38, %v2373_v62  ;;  %v2381_v37 = vmul.f32 %v4430_v28, %v2373_v62 }
 0x1ef   : > { %v2382_v63 = vmul.f32 %v7733_v22, %v2373_v62  ;;  %v2383_v56 = vmul.f32 %v4431_v27, %v2373_v62  ;;  %v2384_v57 = vmul.f32 %v7734_v43, %v2373_v62  ;;  %v2385_v2 = vmul.f32 %v4432_v10, %v2373_v62 }
 0x1f0   : > { %v2386_v25 = vmul.f32 %v7735_v39, %v2373_v62  ;;  %v2387_v5 = vmul.f32 %v4433_v53, %v2373_v62  ;;  %v2390_v36 = vadd.f32 %v2374_v23, %v2357_v14  ;;  %v2391_v31 = vadd.f32 %v2375_v6, %v2358_v52 }
 0x1f1   : > { %v2392_v41 = vadd.f32 %v2376_v18, %v2359_v49  ;;  %v2393_v16 = vadd.f32 %v2377_v3, %v2360_v1  ;;  %v2394_v19 = vadd.f32 %v2378_v30, %v2361_v44  ;;  %v2395_v26 = vadd.f32 %v2379_v0, %v2362_v54 }
 0x1f2   : > { %v2396_v9 = vadd.f32 %v2380_v11, %v2363_v17  ;;  %v2397_v8 = vadd.f32 %v2381_v37, %v2364_v58  ;;  %v2388_v21 = vmul.f32 %v4434_v61, %v2373_v62  ;;  %v2389_v29 = vmul.f32 %v4435_v33, %v2373_v62  ;;  %v7736_v37 = vld [vmem:[#allocation21_spill] sm:$0xff] }
 0x1f3   : > { %v2398_v15 = vadd.f32 %v2382_v63, %v2365_v59  ;;  %v2399_v7 = vadd.f32 %v2383_v56, %v2366_v13  ;;  %v2400_v51 = vadd.f32 %v2384_v57, %v2367_v42  ;;  %v2401_v47 = vadd.f32 %v2385_v2, %v2368_v40  ;;  %v7737_v63 = vld [vmem:[#allocation23_spill] sm:$0xff]  ;;  %v7738_v56 = vld [vmem:[#allocation17_spill] sm:$0xff]  ;;  %v7739_v57 = vld [vmem:[#allocation24_spill] sm:$0xff] }
 0x1f4   : > { %v2402_v12 = vadd.f32 %v2386_v25, %v2369_v48  ;;  %v2403_v32 = vadd.f32 %v2387_v5, %v2370_v46  ;;  %v6541_v4 = vmax.f32 %v2390_v36, 0.0  ;;  %v6543_v14 = vmax.f32 %v2391_v31, 0.0  ;;  %v7740_v2 = vld [vmem:[#allocation18_spill] sm:$0xff]  ;;  %v7741_v25 = vld [vmem:[#allocation19_spill] sm:$0xff]  ;;  %v7742_v5 = vld [vmem:[#allocation32_spill] sm:$0xff] }
 0x1f5   : > { %v6545_v52 = vmax.f32 %v2392_v41, 0.0  ;;  %v6547_v49 = vmax.f32 %v2393_v16, 0.0  ;;  %v6549_v1 = vmax.f32 %v2394_v19, 0.0  ;;  %v6551_v44 = vmax.f32 %v2395_v26, 0.0  ;;  %v7743_v31 = vld [vmem:[#allocation20_spill] sm:$0xff]  ;;  %v7744_v16 = vld [vmem:[#allocation13_spill] sm:$0xff] }
 0x1f6   : > { %v6553_v54 = vmax.f32 %v2396_v9, 0.0  ;;  %v6555_v17 = vmax.f32 %v2397_v8, 0.0  ;;  %v2404_v58 = vadd.f32 %v2388_v21, %v2371_v20  ;;  %v2405_v59 = vadd.f32 %v2389_v29, %v2372_v50  ;;  %v7745_v26 = vld [vmem:[#allocation26_spill] sm:$0xff] }
 0x1f7   : > { %v6557_v13 = vmax.f32 %v2398_v15, 0.0  ;;  %v6559_v42 = vmax.f32 %v2399_v7, 0.0  ;;  %v6561_v40 = vmax.f32 %v2400_v51, 0.0  ;;  %v6563_v48 = vmax.f32 %v2401_v47, 0.0 }
 0x1f8   : > { %v6565_v46 = vmax.f32 %v2402_v12, 0.0  ;;  %v6567_v62 = vmax.f32 %v2403_v32, 0.0  ;;  %v2423_v23 = vmul.f32 %v6517_v45, %v6541_v4  ;;  %v2424_v6 = vmul.f32 %v6517_v45, %v6543_v14 }
 0x1f9   : > { %v2425_v20 = vmul.f32 %v6517_v45, %v6545_v52  ;;  %v2426_v50 = vmul.f32 %v6517_v45, %v6547_v49  ;;  %v2427_v18 = vmul.f32 %v6517_v45, %v6549_v1  ;;  %v2428_v34 = vmul.f32 %v6517_v45, %v6551_v44 }
 0x1fa   : > { %v2429_v3 = vmul.f32 %v6517_v45, %v6553_v54  ;;  %v2430_v60 = vmul.f32 %v6517_v45, %v6555_v17  ;;  %v6585_v30 = vmax.f32 %v2404_v58, 0.0  ;;  %v6587_v35 = vmax.f32 %v2405_v59, 0.0 }
 0x1fb   : > { %v2431_v0 = vmul.f32 %v6517_v45, %v6557_v13  ;;  %v2432_v38 = vmul.f32 %v6517_v45, %v6559_v42  ;;  %v2433_v11 = vmul.f32 %v6517_v45, %v6561_v40  ;;  %v2434_v28 = vmul.f32 %v6517_v45, %v6563_v48 }
 0x1fc   : > { %v2435_v22 = vadd.f32 %v2423_v23, %v7736_v37  ;;  %v2436_v27 = vadd.f32 %v2424_v6, %v7737_v63  ;;  %v2437_v43 = vadd.f32 %v2425_v20, %v7738_v56  ;;  %v2438_v10 = vadd.f32 %v2426_v50, %v7739_v57  ;;  %v7746_v57 = vld [vmem:[#allocation27_spill] sm:$0xff] }
 0x1fd   : > { %v2439_v39 = vadd.f32 %v2427_v18, %v7740_v2  ;;  %v2440_v53 = vadd.f32 %v2428_v34, %v7741_v25  ;;  %v2441_v36 = vadd.f32 %v2429_v3, %v7742_v5  ;;  %v2442_v41 = vadd.f32 %v2430_v60, %v7743_v31  ;;  %v7747_v25 = vld [vmem:[#allocation28_spill] sm:$0xff] }
 0x1fe   : > { %v2443_v19 = vadd.f32 %v2431_v0, %v7744_v16  ;;  %v2444_v45 = vadd.f32 %v2432_v38, %v7745_v26  ;;  %v2448_v9 = vmul.f32 %v6530_v55, %v6541_v4  ;;  %v2449_v8 = vmul.f32 %v6530_v55, %v6543_v14 }
 0x1ff   : > { %v2450_v61 = vmul.f32 %v6530_v55, %v6545_v52  ;;  %v2451_v21 = vmul.f32 %v6530_v55, %v6547_v49  ;;  %v2452_v33 = vmul.f32 %v6530_v55, %v6549_v1  ;;  %v2453_v29 = vmul.f32 %v6530_v55, %v6551_v44 }
 0x200   : > { %v2454_v15 = vmul.f32 %v6530_v55, %v6553_v54  ;;  %v2455_v7 = vmul.f32 %v6530_v55, %v6555_v17  ;;  %v2456_v51 = vmul.f32 %v6530_v55, %v6557_v13  ;;  %v2457_v47 = vmul.f32 %v6530_v55, %v6559_v42 }
 0x201   : > { %v2458_v12 = vmul.f32 %v6530_v55, %v6561_v40  ;;  %v6631_v32 = vmul.f32 %v6530_v55, %v6563_v48  ;;  %v2472_v58 = vrot.slane %v2448_v9, 1  ;;  %v2473_v59 = vrot.slane %v2449_v8, 1 }
 0x202   : > { %v2475_v23 = vrot.slane %v2450_v61, 1  ;;  %v2476_v6 = vrot.slane %v2451_v21, 1  ;;  %v2478_v20 = vrot.slane %v2452_v33, 1  ;;  %v2479_v50 = vrot.slane %v2453_v29, 1 }
 0x203   : > { %v2481_v18 = vrot.slane %v2454_v15, 1  ;;  %v2482_v34 = vrot.slane %v2455_v7, 1  ;;  %v2474_v3 = vsel %vm888_vm0, %v2472_v58, %v2473_v59  ;;  %v2484_v0 = vrot.slane %v2456_v51, 1 }
 0x204   : > { %v2477_v60 = vsel %vm888_vm0, %v2475_v23, %v2476_v6  ;;  %v2485_v38 = vrot.slane %v2457_v47, 1  ;;  %v2480_v37 = vsel %vm888_vm0, %v2478_v20, %v2479_v50  ;;  %v2487_v55 = vrot.slane %v2458_v12, 1 }
 0x205   : > { %v2483_v63 = vsel %vm888_vm0, %v2481_v18, %v2482_v34  ;;  %v2488_v56 = vrot.slane %v6631_v32, 1  ;;  %v2445_v2 = vadd.f32 %v2433_v11, %v7746_v57  ;;  %v2446_v5 = vadd.f32 %v2434_v28, %v7747_v25 }
 0x206   : > { %v2486_v31 = vsel %vm888_vm0, %v2484_v0, %v2485_v38  ;;  %v2502_v16 = vadd.f32 %v2474_v3, %v2435_v22  ;;  %v2503_v9 = vadd.f32 %v2473_v59, %v2436_v27  ;;  %v2504_v8 = vadd.f32 %v2477_v60, %v2437_v43 }
 0x207   : > { %v2489_v26 = vsel %vm888_vm0, %v2487_v55, %v2488_v56  ;;  %v2505_v61 = vadd.f32 %v2476_v6, %v2438_v10  ;;  %v2506_v21 = vadd.f32 %v2480_v37, %v2439_v39  ;;  %v2507_v33 = vadd.f32 %v2479_v50, %v2440_v53 }
 0x208   : > { %v2508_v29 = vadd.f32 %v2483_v63, %v2441_v36  ;;  %v2509_v15 = vadd.f32 %v2482_v34, %v2442_v41  ;;  %v2510_v7 = vadd.f32 %v2486_v31, %v2443_v19  ;;  %v2511_v51 = vadd.f32 %v2485_v38, %v2444_v45 }
 0x209   : > { %v2515_v47 = vmul.f32 %v6533_v24, %v6541_v4  ;;  %v2516_v11 = vmul.f32 %v6533_v24, %v6543_v14  ;;  %v2517_v28 = vmul.f32 %v6533_v24, %v6545_v52  ;;  %v2518_v22 = vmul.f32 %v6533_v24, %v6547_v49 }
 0x20a   : > { %v2519_v27 = vmul.f32 %v6533_v24, %v6549_v1  ;;  %v2520_v43 = vmul.f32 %v6533_v24, %v6551_v44  ;;  %v2521_v10 = vmul.f32 %v6533_v24, %v6553_v54  ;;  %v2522_v4 = vmul.f32 %v6533_v24, %v6555_v17 }
 0x20b   : > { %v2523_v14 = vmul.f32 %v6533_v24, %v6557_v13  ;;  %v2524_v39 = vmul.f32 %v6533_v24, %v6559_v42  ;;  %v2525_v53 = vmul.f32 %v6533_v24, %v6561_v40  ;;  %v2526_v36 = vmul.f32 %v6533_v24, %v6563_v48 }
 0x20c   : > { %v2539_v41 = vrot.slane %v2515_v47, 2  ;;  %v2540_v19 = vrot.slane %v2516_v11, 2  ;;  %v2542_v45 = vrot.slane %v2517_v28, 2  ;;  %v2543_v12 = vrot.slane %v2518_v22, 2 }
 0x20d   : > { %v2545_v32 = vrot.slane %v2519_v27, 2  ;;  %v2546_v58 = vrot.slane %v2520_v43, 2  ;;  %v2548_v23 = vrot.slane %v2521_v10, 2  ;;  %v2549_v6 = vrot.slane %v2522_v4, 2 }
 0x20e   : > { %v2541_v59 = vsel %vm956_vm1, %v2539_v41, %v2540_v19  ;;  %v2551_v20 = vrot.slane %v2523_v14, 2  ;;  %v2544_v50 = vsel %vm956_vm1, %v2542_v45, %v2543_v12  ;;  %v2552_v24 = vrot.slane %v2524_v39, 2 }
 0x20f   : > { %v2547_v18 = vsel %vm956_vm1, %v2545_v32, %v2546_v58  ;;  %v2554_v34 = vrot.slane %v2525_v53, 2  ;;  %v2512_v3 = vadd.f32 %v2489_v26, %v2445_v2  ;;  %v2513_v60 = vadd.f32 %v2488_v56, %v2446_v5 }
 0x210   : > { %v2550_v0 = vsel %vm956_vm1, %v2548_v23, %v2549_v6  ;;  %v2555_v38 = vrot.slane %v2526_v36, 2  ;;  %v2553_v37 = vsel %vm956_vm1, %v2551_v20, %v2552_v24  ;;  %v2569_v63 = vadd.f32 %v2541_v59, %v2502_v16 }
 0x211   : > { %v2570_v55 = vadd.f32 %v2540_v19, %v2503_v9  ;;  %v2571_v57 = vadd.f32 %v2544_v50, %v2504_v8  ;;  %v2572_v31 = vadd.f32 %v2543_v12, %v2505_v61  ;;  %v2573_v47 = vadd.f32 %v2547_v18, %v2506_v21 }
 0x212   : > { %v2556_v25 = vsel %vm956_vm1, %v2554_v34, %v2555_v38  ;;  %v2574_v11 = vadd.f32 %v2546_v58, %v2507_v33  ;;  %v2575_v28 = vadd.f32 %v2550_v0, %v2508_v29  ;;  %v2576_v22 = vadd.f32 %v2549_v6, %v2509_v15 }
 0x213   : > { %v2577_v27 = vadd.f32 %v2553_v37, %v2510_v7  ;;  %v2578_v56 = vadd.f32 %v2552_v24, %v2511_v51  ;;  %v2579_v2 = vadd.f32 %v2556_v25, %v2512_v3  ;;  %v2580_v5 = vadd.f32 %v2555_v38, %v2513_v60 }
 0x214   : > { %v2581_v26 = vstv %s6662_s25  ;;  %v2606_v43 = vstv %s6664_s29  ;;  %v6693_v51 = vstv %s6671_s30  ;;  %v6696_v4 = vstv %s6673_s6  ;;  %s7367_s25 = sld [smem:[#allocation8 + $0x21]]  ;;  %s7369_s29 = sld [smem:[#allocation8 + $0x22]] }
 0x215   : > { %v2582_v10 = vmul.f32 %v2581_v26, %v6545_v52  ;;  %v2583_v16 = vmul.f32 %v2581_v26, %v6547_v49  ;;  %v2584_v9 = vmul.f32 %v2581_v26, %v6549_v1  ;;  %v2585_v8 = vmul.f32 %v2581_v26, %v6551_v44  ;;  %s7467_s30 = sld [smem:[#allocation8 + $0x23]]  ;;  %s282_s6 = smul.u32 6, %s4637_s20 }
 0x216   : > { %v2586_v61 = vmul.f32 %v2581_v26, %v6553_v54  ;;  %v2587_v21 = vmul.f32 %v2581_v26, %v6555_v17  ;;  %v2588_v33 = vmul.f32 %v2581_v26, %v6557_v13  ;;  %v2589_v29 = vmul.f32 %v2581_v26, %v6559_v42 }
 0x217   : > { %v2590_v15 = vmul.f32 %v2581_v26, %v6561_v40  ;;  %v2591_v7 = vmul.f32 %v2581_v26, %v6563_v48  ;;  %v2592_v14 = vmul.f32 %v2581_v26, %v6565_v46  ;;  %v2593_v39 = vmul.f32 %v2581_v26, %v6567_v62  ;;  %p285_p5 = scmp.lt.s32.totalorder %s282_s6, 11 }
 0x218   : > { %v2594_v53 = vadd.f32 %v2582_v10, %v2569_v63  ;;  %v2595_v36 = vadd.f32 %v2583_v16, %v2570_v55  ;;  %v2596_v41 = vadd.f32 %v2584_v9, %v2571_v57  ;;  %v2597_v19 = vadd.f32 %v2585_v8, %v2572_v31 }
 0x219   : > { %v2598_v45 = vadd.f32 %v2586_v61, %v2573_v47  ;;  %v2599_v12 = vadd.f32 %v2587_v21, %v2574_v11  ;;  %v2600_v32 = vadd.f32 %v2588_v33, %v2575_v28  ;;  %v2601_v58 = vadd.f32 %v2589_v29, %v2576_v22  ;;  %s7801_s6 = smov (!%p285_p5, %s282_s6), 11 }
 0x21a   : > { %v2602_v59 = vadd.f32 %v2590_v15, %v2577_v27  ;;  %v2603_v23 = vadd.f32 %v2591_v7, %v2578_v56  ;;  %v2607_v6 = vmul.f32 %v2606_v43, %v6545_v52  ;;  %v2608_v20 = vmul.f32 %v2606_v43, %v6547_v49  ;;  %s4116_s20 = sshll.u32 %s7801_s6, 4 }
 0x21b   : > { %v2609_v50 = vmul.f32 %v2606_v43, %v6549_v1  ;;  %v2610_v18 = vmul.f32 %v2606_v43, %v6551_v44  ;;  %v2611_v24 = vmul.f32 %v2606_v43, %v6553_v54  ;;  %v2612_v34 = vmul.f32 %v2606_v43, %v6555_v17 }
 0x21c   : > { %v2613_v3 = vmul.f32 %v2606_v43, %v6557_v13  ;;  %v2614_v60 = vmul.f32 %v2606_v43, %v6559_v42  ;;  %v2615_v0 = vmul.f32 %v2606_v43, %v6561_v40  ;;  %v2616_v38 = vmul.f32 %v2606_v43, %v6563_v48 }
 0x21d   : > { %v2617_v37 = vmul.f32 %v2606_v43, %v6565_v46  ;;  %v2618_v63 = vmul.f32 %v2606_v43, %v6567_v62  ;;  %v2631_v55 = vrot.slane %v2607_v6, 1  ;;  %v2632_v57 = vrot.slane %v2608_v20, 1 }
 0x21e   : > { %v2634_v25 = vrot.slane %v2609_v50, 1  ;;  %v2635_v31 = vrot.slane %v2610_v18, 1  ;;  %v2637_v47 = vrot.slane %v2611_v24, 1  ;;  %v2638_v11 = vrot.slane %v2612_v34, 1 }
 0x21f   : > { %v2640_v28 = vrot.slane %v2613_v3, 1  ;;  %v2641_v22 = vrot.slane %v2614_v60, 1  ;;  %v2633_v27 = vsel %vm888_vm0, %v2631_v55, %v2632_v57  ;;  %v2643_v26 = vrot.slane %v2615_v0, 1 }
 0x220   : > { %v2636_v56 = vsel %vm888_vm0, %v2634_v25, %v2635_v31  ;;  %v2644_v10 = vrot.slane %v2616_v38, 1  ;;  %v2639_v16 = vsel %vm888_vm0, %v2637_v47, %v2638_v11  ;;  %v2646_v8 = vrot.slane %v2617_v37, 1 }
 0x221   : > { %v2642_v9 = vsel %vm888_vm0, %v2640_v28, %v2641_v22  ;;  %v2647_v43 = vrot.slane %v2618_v63, 1  ;;  %v2604_v61 = vadd.f32 %v2592_v14, %v2579_v2  ;;  %v2605_v21 = vadd.f32 %v2593_v39, %v2580_v5 }
 0x222   : > { %v2645_v33 = vsel %vm888_vm0, %v2643_v26, %v2644_v10  ;;  %v2661_v29 = vadd.f32 %v2633_v27, %v2594_v53  ;;  %v2662_v7 = vadd.f32 %v2632_v57, %v2595_v36  ;;  %v2663_v6 = vadd.f32 %v2636_v56, %v2596_v41 }
 0x223   : > { %v2648_v15 = vsel %vm888_vm0, %v2646_v8, %v2647_v43  ;;  %v2664_v20 = vadd.f32 %v2635_v31, %v2597_v19  ;;  %v2665_v50 = vadd.f32 %v2639_v16, %v2598_v45  ;;  %v2666_v18 = vadd.f32 %v2638_v11, %v2599_v12 }
 0x224   : > { %v2667_v24 = vadd.f32 %v2642_v9, %v2600_v32  ;;  %v2668_v34 = vadd.f32 %v2641_v22, %v2601_v58  ;;  %v2669_v3 = vadd.f32 %v2645_v33, %v2602_v59  ;;  %v2670_v60 = vadd.f32 %v2644_v10, %v2603_v23 }
 0x225   : > { %v2674_v0 = vmul.f32 %v6693_v51, %v6545_v52  ;;  %v2675_v2 = vmul.f32 %v6693_v51, %v6547_v49  ;;  %v2676_v5 = vmul.f32 %v6693_v51, %v6549_v1  ;;  %v2677_v14 = vmul.f32 %v6693_v51, %v6551_v44 }
 0x226   : > { %v2678_v39 = vmul.f32 %v6693_v51, %v6553_v54  ;;  %v2679_v53 = vmul.f32 %v6693_v51, %v6555_v17  ;;  %v2680_v36 = vmul.f32 %v6693_v51, %v6557_v13  ;;  %v2681_v52 = vmul.f32 %v6693_v51, %v6559_v42 }
 0x227   : > { %v2682_v49 = vmul.f32 %v6693_v51, %v6561_v40  ;;  %v2683_v41 = vmul.f32 %v6693_v51, %v6563_v48  ;;  %v2684_v19 = vmul.f32 %v6693_v51, %v6565_v46  ;;  %v2685_v45 = vmul.f32 %v6693_v51, %v6567_v62 }
 0x228   : > { %v2698_v12 = vrot.slane %v2674_v0, 2  ;;  %v2699_v32 = vrot.slane %v2675_v2, 2  ;;  %v2701_v58 = vrot.slane %v2676_v5, 2  ;;  %v2702_v59 = vrot.slane %v2677_v14, 2 }
 0x229   : > { %v2704_v23 = vrot.slane %v2678_v39, 2  ;;  %v2705_v38 = vrot.slane %v2679_v53, 2  ;;  %v2707_v63 = vrot.slane %v2680_v36, 2  ;;  %v2708_v55 = vrot.slane %v2681_v52, 2 }
 0x22a   : > { %v2700_v37 = vsel %vm956_vm1, %v2698_v12, %v2699_v32  ;;  %v2710_v57 = vrot.slane %v2682_v49, 2  ;;  %v2703_v25 = vsel %vm956_vm1, %v2701_v58, %v2702_v59  ;;  %v2711_v47 = vrot.slane %v2683_v41, 2 }
 0x22b   : > { %v2706_v31 = vsel %vm956_vm1, %v2704_v23, %v2705_v38  ;;  %v2713_v11 = vrot.slane %v2684_v19, 2  ;;  %v2671_v28 = vadd.f32 %v2648_v15, %v2604_v61  ;;  %v2672_v22 = vadd.f32 %v2647_v43, %v2605_v21 }
 0x22c   : > { %v2709_v51 = vsel %vm956_vm1, %v2707_v63, %v2708_v55  ;;  %v2714_v27 = vrot.slane %v2685_v45, 2  ;;  %v2712_v56 = vsel %vm956_vm1, %v2710_v57, %v2711_v47  ;;  %v2728_v26 = vadd.f32 %v2700_v37, %v2661_v29 }
 0x22d   : > { %v2729_v10 = vadd.f32 %v2699_v32, %v2662_v7  ;;  %v2730_v16 = vadd.f32 %v2703_v25, %v2663_v6  ;;  %v2731_v8 = vadd.f32 %v2702_v59, %v2664_v20  ;;  %v2732_v33 = vadd.f32 %v2706_v31, %v2665_v50 }
 0x22e   : > { %v2715_v9 = vsel %vm956_vm1, %v2713_v11, %v2714_v27  ;;  %v2733_v0 = vadd.f32 %v2705_v38, %v2666_v18  ;;  %v2734_v2 = vadd.f32 %v2709_v51, %v2667_v24  ;;  %v2735_v5 = vadd.f32 %v2708_v55, %v2668_v34 }
 0x22f   : > { %v2736_v14 = vadd.f32 %v2712_v56, %v2669_v3  ;;  %v2737_v61 = vadd.f32 %v2711_v47, %v2670_v60  ;;  %v2741_v43 = vmul.f32 %v6696_v4, %v6549_v1  ;;  %v2742_v21 = vmul.f32 %v6696_v4, %v6551_v44 }
 0x230   : > { %v2743_v29 = vmul.f32 %v6696_v4, %v6553_v54  ;;  %v2744_v15 = vmul.f32 %v6696_v4, %v6555_v17  ;;  %v2745_v7 = vmul.f32 %v6696_v4, %v6557_v13  ;;  %v2746_v6 = vmul.f32 %v6696_v4, %v6559_v42 }
 0x231   : > { %v2747_v20 = vmul.f32 %v6696_v4, %v6561_v40  ;;  %v2748_v50 = vmul.f32 %v6696_v4, %v6563_v48  ;;  %v2738_v18 = vadd.f32 %v2715_v9, %v2671_v28  ;;  %v2749_v24 = vmul.f32 %v6696_v4, %v6565_v46 }
 0x232   : > { %v2750_v34 = vmul.f32 %v6696_v4, %v6567_v62  ;;  %v2751_v3 = vmul.f32 %v6696_v4, %v6585_v30  ;;  %v2739_v60 = vadd.f32 %v2714_v27, %v2672_v22  ;;  %v2752_v39 = vmul.f32 %v6696_v4, %v6587_v35 }
 0x233   : > { %v2753_v53 = vadd.f32 %v2741_v43, %v2728_v26  ;;  %v2754_v36 = vadd.f32 %v2742_v21, %v2729_v10  ;;  %v2755_v52 = vadd.f32 %v2743_v29, %v2730_v16  ;;  %v2756_v49 = vadd.f32 %v2744_v15, %v2731_v8 }
 0x234   : > { %v2757_v41 = vadd.f32 %v2745_v7, %v2732_v33  ;;  %v2758_v19 = vadd.f32 %v2746_v6, %v2733_v0  ;;  %v2759_v45 = vadd.f32 %v2747_v20, %v2734_v2  ;;  %v2760_v12 = vadd.f32 %v2748_v50, %v2735_v5 }
 0x235   : > { %v2761_v32 = vadd.f32 %v2749_v24, %v2736_v14  ;;  %v2762_v58 = vadd.f32 %v2750_v34, %v2737_v61  ;;  %v6776_v59 = vadd.f32 %v2751_v3, %v2738_v18  ;;  %v2765_v23 = vstv %s6747_s8 }
 0x236   : > { %v2766_v38 = vmul.f32 %v2765_v23, %v6549_v1  ;;  %v2767_v37 = vmul.f32 %v2765_v23, %v6551_v44  ;;  %v2768_v4 = vmul.f32 %v2765_v23, %v6553_v54  ;;  %v2769_v63 = vmul.f32 %v2765_v23, %v6555_v17 }
 0x237   : > { %v2770_v55 = vmul.f32 %v2765_v23, %v6557_v13  ;;  %v2771_v57 = vmul.f32 %v2765_v23, %v6559_v42  ;;  %v2772_v25 = vmul.f32 %v2765_v23, %v6561_v40  ;;  %v2773_v31 = vmul.f32 %v2765_v23, %v6563_v48 }
 0x238   : > { %v2774_v47 = vmul.f32 %v2765_v23, %v6565_v46  ;;  %v2775_v11 = vmul.f32 %v2765_v23, %v6567_v62  ;;  %v2776_v28 = vmul.f32 %v2765_v23, %v6585_v30  ;;  %v2777_v22 = vmul.f32 %v2765_v23, %v6587_v35 }
 0x239   : > { %v2790_v51 = vrot.slane %v2766_v38, 1  ;;  %v2791_v27 = vrot.slane %v2767_v37, 1  ;;  %v2793_v56 = vrot.slane %v2768_v4, 1  ;;  %v2794_v26 = vrot.slane %v2769_v63, 1 }
 0x23a   : > { %v2796_v10 = vrot.slane %v2770_v55, 1  ;;  %v2797_v16 = vrot.slane %v2771_v57, 1  ;;  %v2799_v9 = vrot.slane %v2772_v25, 1  ;;  %v2800_v8 = vrot.slane %v2773_v31, 1 }
 0x23b   : > { %v2792_v33 = vsel %vm888_vm0, %v2790_v51, %v2791_v27  ;;  %v2795_v0 = vsel %vm888_vm0, %v2793_v56, %v2794_v26  ;;  %v2802_v2 = vrot.slane %v2774_v47, 1  ;;  %v2803_v5 = vrot.slane %v2775_v11, 1 }
 0x23c   : > { %v2798_v14 = vsel %vm888_vm0, %v2796_v10, %v2797_v16  ;;  %v2801_v61 = vsel %vm888_vm0, %v2799_v9, %v2800_v8  ;;  %v2805_v43 = vrot.slane %v2776_v28, 1  ;;  %v2806_v21 = vrot.slane %v2777_v22, 1 }
 0x23d   : > { %v2764_v29 = vadd.f32 %v2752_v39, %v2739_v60  ;;  %v2804_v15 = vsel %vm888_vm0, %v2802_v2, %v2803_v5  ;;  %v2820_v7 = vadd.f32 %v2792_v33, %v2753_v53  ;;  %v2832_v6 = vstv %s6774_s26 }
 0x23e   : > { %v2807_v20 = vsel %vm888_vm0, %v2805_v43, %v2806_v21  ;;  %v2821_v50 = vadd.f32 %v2791_v27, %v2754_v36  ;;  %v2822_v18 = vadd.f32 %v2795_v0, %v2755_v52  ;;  %v2823_v24 = vadd.f32 %v2794_v26, %v2756_v49  ;;  %v4437_v43 = vld [vmem:[%s4817_s10 + $0x8] sm:$0x3f] }
 0x23f   : > { %v2824_v34 = vadd.f32 %v2798_v14, %v2757_v41  ;;  %v2825_v3 = vadd.f32 %v2797_v16, %v2758_v19  ;;  %v2826_v23 = vadd.f32 %v2801_v61, %v2759_v45  ;;  %v2827_v38 = vadd.f32 %v2800_v8, %v2760_v12  ;;  %v4436_v14 = vld [vmem:[%s4817_s10] sm:$0xff] }
 0x240   : > { %v2828_v37 = vadd.f32 %v2804_v15, %v2761_v32  ;;  %v2829_v4 = vadd.f32 %v2803_v5, %v2762_v58  ;;  %v2833_v60 = vmul.f32 %v2832_v6, %v6549_v1  ;;  %v2834_v39 = vmul.f32 %v2832_v6, %v6551_v44 }
 0x241   : > { %v2835_v53 = vmul.f32 %v2832_v6, %v6553_v54  ;;  %v2836_v36 = vmul.f32 %v2832_v6, %v6555_v17  ;;  %v2837_v52 = vmul.f32 %v2832_v6, %v6557_v13  ;;  %v2838_v49 = vmul.f32 %v2832_v6, %v6559_v42 }
 0x242   : > { %v2839_v41 = vmul.f32 %v2832_v6, %v6561_v40  ;;  %v2840_v19 = vmul.f32 %v2832_v6, %v6563_v48  ;;  %v2841_v45 = vmul.f32 %v2832_v6, %v6565_v46  ;;  %v2842_v12 = vmul.f32 %v2832_v6, %v6567_v62 }
 0x243   : > { %v2843_v1 = vmul.f32 %v2832_v6, %v6585_v30  ;;  %v2844_v44 = vmul.f32 %v2832_v6, %v6587_v35  ;;  %v2857_v32 = vrot.slane %v2833_v60, 2  ;;  %v2858_v54 = vrot.slane %v2834_v39, 2  ;;  %v4445_v60 = vld [vmem:[%s4817_s10 + $0x48] sm:$0x3f] }
 0x244   : > { %v2860_v58 = vrot.slane %v2835_v53, 2  ;;  %v2861_v17 = vrot.slane %v2836_v36, 2  ;;  %v2863_v63 = vrot.slane %v2837_v52, 2  ;;  %v2864_v13 = vrot.slane %v2838_v49, 2  ;;  %v6880_v53 = vld [vmem:[%s4817_s10 + $0x50] sm:$0xff] }
 0x245   : > { %v2859_v42 = vsel %vm956_vm1, %v2857_v32, %v2858_v54  ;;  %v2866_v40 = vrot.slane %v2839_v41, 2  ;;  %v2867_v48 = vrot.slane %v2840_v19, 2  ;;  %v2869_v55 = vrot.slane %v2841_v45, 2  ;;  %v4447_v52 = vld [vmem:[%s4817_s10 + $0x58] sm:$0x3f]  ;;  %v6885_v41 = vld [vmem:[%s4817_s10 + $0x60] sm:$0xff] }
 0x246   : > { %v2830_v46 = vadd.f32 %v2807_v20, %v6776_v59  ;;  %v2862_v62 = vsel %vm956_vm1, %v2860_v58, %v2861_v17  ;;  %v2870_v30 = vrot.slane %v2842_v12, 2  ;;  %v2872_v57 = vrot.slane %v2843_v1, 2  ;;  %v6865_v20 = vld [vmem:[%s4817_s10 + $0x20] sm:$0xff]  ;;  %v4449_v45 = vld [vmem:[%s4817_s10 + $0x68] sm:$0x3f]  ;;  %v6890_v1 = vld [vmem:[%s4817_s10 + $0x70] sm:$0xff] }
 0x247   : > { %v2831_v35 = vadd.f32 %v2806_v21, %v2764_v29  ;;  %v2865_v25 = vsel %vm956_vm1, %v2863_v63, %v2864_v13  ;;  %v2868_v31 = vsel %vm956_vm1, %v2866_v40, %v2867_v48  ;;  %v2873_v47 = vrot.slane %v2844_v44, 2  ;;  %v6860_v29 = vld [vmem:[%s4817_s10 + $0x10] sm:$0xff]  ;;  %v4451_v32 = vld [vmem:[%s4817_s10 + $0x78] sm:$0x3f] }
 0x248   : > { %v2871_v11 = vsel %vm956_vm1, %v2869_v55, %v2870_v30  ;;  %v6820_v28 = vadd.f32 %v2859_v42, %v2820_v7  ;;  %v6823_v22 = vstv %s6800_s11  ;;  %v2900_v51 = vstv %s6798_s9  ;;  %v4439_v7 = vld [vmem:[%s4817_s10 + $0x18] sm:$0x3f]  ;;  %s7512_s9 = scalar_lea.vmem %s7540_s5, %s4116_s20 }
 0x249   : > { %v2874_v27 = vsel %vm956_vm1, %v2872_v57, %v2873_v47  ;;  %v6827_v59 = vadd.f32 %v2858_v54, %v2821_v50  ;;  %v6829_v56 = vadd.f32 %v2862_v62, %v2822_v18  ;;  %v6831_v26 = vadd.f32 %v2861_v17, %v2823_v24  ;;  %v4441_v18 = vld [vmem:[%s4817_s10 + $0x28] sm:$0x3f] }
 0x24a   : > { %7748 = vst [vmem:[#allocation22_spill] sm:$0xff] %v6820_v28  ;;  %v6833_v10 = vadd.f32 %v2865_v25, %v2824_v34  ;;  %v6835_v16 = vadd.f32 %v2864_v13, %v2825_v3  ;;  %v6837_v9 = vadd.f32 %v2868_v31, %v2826_v23  ;;  %v6839_v8 = vadd.f32 %v2867_v48, %v2827_v38  ;;  %v6870_v34 = vld [vmem:[%s4817_s10 + $0x30] sm:$0xff]  ;;  %v4443_v23 = vld [vmem:[%s4817_s10 + $0x38] sm:$0x3f] }
 0x24b   : > { %7749 = vst [vmem:[#allocation29_spill] sm:$0xff] %v6827_v59  ;;  %7750 = vst [vmem:[#allocation25_spill] sm:$0xff] %v6829_v56  ;;  %v6845_v33 = vadd.f32 %v2871_v11, %v2828_v37  ;;  %v6847_v0 = vadd.f32 %v2870_v30, %v2829_v4  ;;  %v6849_v2 = vadd.f32 %v2874_v27, %v2830_v46  ;;  %v6875_v37 = vld [vmem:[%s4817_s10 + $0x40] sm:$0xff]  ;;  %v6915_v27 = vstv %s6853_s27 }
 0x24c   : > { %7751 = vst [vmem:[#allocation14_spill] sm:$0xff] %v6831_v26  ;;  %7752 = vst [vmem:[#allocation15_spill] sm:$0xff] %v6833_v10  ;;  %v6851_v5 = vadd.f32 %v2873_v47, %v2831_v35  ;;  %v2901_v61 = vmul.f32 %v4436_v14, %v2900_v51  ;;  %v2902_v21 = vmul.f32 %v4437_v43, %v2900_v51  ;;  %v2933_v47 = vstv %s6841_s12 }
 0x24d   : > { %7753 = vst [vmem:[#allocation16_spill] sm:$0xff] %v6835_v16  ;;  %7754 = vst [vmem:[#allocation31_spill] sm:$0xff] %v6837_v9  ;;  %v2903_v15 = vmul.f32 %v6860_v29, %v2900_v51  ;;  %v2904_v6 = vmul.f32 %v4439_v7, %v2900_v51  ;;  %v2905_v50 = vmul.f32 %v6865_v20, %v2900_v51  ;;  %v6918_v14 = vstv %s6855_s7  ;;  %v6923_v7 = vld [vmem:[%s4817_s10 + $0x11] sm:$0xff] }
 0x24e   : > { %7755 = vst [vmem:[#allocation30_spill] sm:$0xff] %v6839_v8  ;;  %7756 = vst [vmem:[#allocation21_spill] sm:$0xff] %v6845_v33  ;;  %v2906_v24 = vmul.f32 %v4441_v18, %v2900_v51  ;;  %v2907_v3 = vmul.f32 %v6870_v34, %v2900_v51  ;;  %v2908_v38 = vmul.f32 %v4443_v23, %v2900_v51  ;;  %v6928_v18 = vld [vmem:[%s4817_s10 + $0x21] sm:$0xff] }
 0x24f   : > { %7757 = vst [vmem:[#allocation23_spill] sm:$0xff] %v6847_v0  ;;  %7758 = vst [vmem:[#allocation17_spill] sm:$0xff] %v6849_v2  ;;  %v2909_v4 = vmul.f32 %v6875_v37, %v2900_v51  ;;  %v2910_v39 = vmul.f32 %v4445_v60, %v2900_v51  ;;  %v2911_v36 = vmul.f32 %v6880_v53, %v2900_v51  ;;  %v4459_v60 = vld [vmem:[%s4817_s10 + $0x39] sm:$0x3f] }
 0x250   : > { %7759 = vst [vmem:[#allocation24_spill] sm:$0xff] %v6851_v5  ;;  %v2912_v49 = vmul.f32 %v4447_v52, %v2900_v51  ;;  %v2913_v19 = vmul.f32 %v6885_v41, %v2900_v51  ;;  %v2914_v12 = vmul.f32 %v4449_v45, %v2900_v51  ;;  %v2915_v44 = vmul.f32 %v6890_v1, %v2900_v51  ;;  %v6943_v45 = vld [vmem:[%s4817_s10 + $0x51] sm:$0xff]  ;;  %v4467_v5 = vld [vmem:[%s4817_s10 + $0x79] sm:$0x3f] }
 0x251   : > { %v2916_v54 = vmul.f32 %v4451_v32, %v2900_v51  ;;  %v2917_v58 = vadd.f32 %v2901_v61, %v6823_v22  ;;  %v2918_v17 = vadd.f32 %v2902_v21, %v6823_v22  ;;  %v2919_v63 = vadd.f32 %v2903_v15, %v6823_v22  ;;  %v4452_v61 = vld [vmem:[%s4817_s10 + $0x1] sm:$0xff]  ;;  %v4453_v21 = vld [vmem:[%s4817_s10 + $0x9] sm:$0x3f] }
 0x252   : > { %v2920_v13 = vadd.f32 %v2904_v6, %v6823_v22  ;;  %v2921_v42 = vadd.f32 %v2905_v50, %v6823_v22  ;;  %v2922_v40 = vadd.f32 %v2906_v24, %v6823_v22  ;;  %v2923_v48 = vadd.f32 %v2907_v3, %v6823_v22  ;;  %v4457_v3 = vld [vmem:[%s4817_s10 + $0x29] sm:$0x3f] }
 0x253   : > { %v2924_v55 = vadd.f32 %v2908_v38, %v6823_v22  ;;  %v2925_v46 = vadd.f32 %v2909_v4, %v6823_v22  ;;  %v2926_v62 = vadd.f32 %v2910_v39, %v6823_v22  ;;  %v2927_v30 = vadd.f32 %v2911_v36, %v6823_v22  ;;  %v6933_v38 = vld [vmem:[%s4817_s10 + $0x31] sm:$0xff]  ;;  %v6938_v36 = vld [vmem:[%s4817_s10 + $0x41] sm:$0xff] }
 0x254   : > { %v2928_v57 = vadd.f32 %v2912_v49, %v6823_v22  ;;  %v2929_v35 = vadd.f32 %v2913_v19, %v6823_v22  ;;  %v2930_v25 = vadd.f32 %v2914_v12, %v6823_v22  ;;  %v2931_v31 = vadd.f32 %v2915_v44, %v6823_v22  ;;  %v4461_v49 = vld [vmem:[%s4817_s10 + $0x49] sm:$0x3f]  ;;  %v4463_v44 = vld [vmem:[%s4817_s10 + $0x59] sm:$0x3f] }
 0x255   : > { %v2932_v11 = vadd.f32 %v2916_v54, %v6823_v22  ;;  %v6912_v51 = vstv %s6843_s14  ;;  %v2934_v43 = vmul.f32 %v4452_v61, %v2933_v47  ;;  %v2935_v15 = vmul.f32 %v4453_v21, %v2933_v47  ;;  %v4455_v22 = vld [vmem:[%s4817_s10 + $0x19] sm:$0x3f]  ;;  %v6948_v54 = vld [vmem:[%s4817_s10 + $0x61] sm:$0xff]  ;;  %v4465_v21 = vld [vmem:[%s4817_s10 + $0x69] sm:$0x3f] }
 0x256   : > { %v2936_v6 = vmul.f32 %v6923_v7, %v2933_v47  ;;  %v2937_v50 = vmul.f32 %v4455_v22, %v2933_v47  ;;  %v2938_v24 = vmul.f32 %v6928_v18, %v2933_v47  ;;  %v2939_v23 = vmul.f32 %v4457_v3, %v2933_v47  ;;  %v6953_v3 = vld [vmem:[%s4817_s10 + $0x71] sm:$0xff] }
 0x257   : > { %v2940_v4 = vmul.f32 %v6933_v38, %v2933_v47  ;;  %v2941_v39 = vmul.f32 %v4459_v60, %v2933_v47  ;;  %v2942_v52 = vmul.f32 %v6938_v36, %v2933_v47  ;;  %v2943_v19 = vmul.f32 %v4461_v49, %v2933_v47 }
 0x258   : > { %v2944_v12 = vmul.f32 %v6943_v45, %v2933_v47  ;;  %v2945_v32 = vmul.f32 %v4463_v44, %v2933_v47  ;;  %v2946_v61 = vmul.f32 %v6948_v54, %v2933_v47  ;;  %v2947_v22 = vmul.f32 %v4465_v21, %v2933_v47 }
 0x259   : > { %v2948_v60 = vmul.f32 %v6953_v3, %v2933_v47  ;;  %v2949_v2 = vmul.f32 %v4467_v5, %v2933_v47  ;;  %v2950_v0 = vadd.f32 %v2934_v43, %v2917_v58  ;;  %v2951_v49 = vadd.f32 %v2935_v15, %v2918_v17  ;;  %v4475_v47 = vld [vmem:[%s4817_s10 + $0x3a] sm:$0x3f]  ;;  %v6983_v43 = vld [vmem:[%s4817_s10 + $0x42] sm:$0xff] }
 0x25a   : > { %v2952_v33 = vadd.f32 %v2936_v6, %v2919_v63  ;;  %v2953_v8 = vadd.f32 %v2937_v50, %v2920_v13  ;;  %v2954_v9 = vadd.f32 %v2938_v24, %v2921_v42  ;;  %v2955_v44 = vadd.f32 %v2939_v23, %v2922_v40  ;;  %v4468_v63 = vld [vmem:[%s4817_s10 + $0x2] sm:$0xff]  ;;  %v4469_v42 = vld [vmem:[%s4817_s10 + $0xa] sm:$0x3f]  ;;  %7763 = vst [vmem:[#allocation20_spill] sm:$0xff] %v6983_v43  ;;  %v6990_v24 = vld [vmem:[%s4817_s10 + $0x52] sm:$0xff] }
 0x25b   : > { %v2956_v16 = vadd.f32 %v2940_v4, %v2923_v48  ;;  %v2957_v10 = vadd.f32 %v2941_v39, %v2924_v55  ;;  %v2958_v26 = vadd.f32 %v2942_v52, %v2925_v46  ;;  %v2959_v21 = vadd.f32 %v2943_v19, %v2926_v62  ;;  %v6962_v48 = vld [vmem:[%s4817_s10 + $0x12] sm:$0xff]  ;;  %v4471_v46 = vld [vmem:[%s4817_s10 + $0x1a] sm:$0x3f]  ;;  %v4477_v6 = vld [vmem:[%s4817_s10 + $0x4a] sm:$0x3f]  ;;  %7764 = vst [vmem:[#allocation13_spill] sm:$0xff] %v6990_v24 }
 0x25c   : > { %v2960_v56 = vadd.f32 %v2944_v12, %v2927_v30  ;;  %v2961_v59 = vadd.f32 %v2945_v32, %v2928_v57  ;;  %v2962_v28 = vadd.f32 %v2946_v61, %v2929_v35  ;;  %v2963_v5 = vadd.f32 %v2947_v22, %v2930_v25  ;;  %7760 = vst [vmem:[#allocation18_spill] sm:$0xff] %v6962_v48  ;;  %v6969_v30 = vld [vmem:[%s4817_s10 + $0x22] sm:$0xff]  ;;  %v4473_v57 = vld [vmem:[%s4817_s10 + $0x2a] sm:$0x3f]  ;;  %v6976_v25 = vld [vmem:[%s4817_s10 + $0x32] sm:$0xff] }
 0x25d   : > { %v2964_v58 = vadd.f32 %v2948_v60, %v2931_v31  ;;  %v2965_v17 = vadd.f32 %v2949_v2, %v2932_v11  ;;  %v2967_v13 = vmul.f32 %v4468_v63, %v6912_v51  ;;  %v2968_v40 = vmul.f32 %v4469_v42, %v6912_v51  ;;  %7761 = vst [vmem:[#allocation19_spill] sm:$0xff] %v6969_v30  ;;  %v4479_v4 = vld [vmem:[%s4817_s10 + $0x5a] sm:$0x3f]  ;;  %v6997_v52 = vld [vmem:[%s4817_s10 + $0x62] sm:$0xff]  ;;  %v4481_v12 = vld [vmem:[%s4817_s10 + $0x6a] sm:$0x3f] }
 0x25e   : > { %v2969_v55 = vmul.f32 %v6962_v48, %v6912_v51  ;;  %v2970_v62 = vmul.f32 %v4471_v46, %v6912_v51  ;;  %v2971_v2 = vmul.f32 %v6969_v30, %v6912_v51  ;;  %v2972_v35 = vmul.f32 %v4473_v57, %v6912_v51  ;;  %7762 = vst [vmem:[#allocation32_spill] sm:$0xff] %v6976_v25  ;;  %v7004_v61 = vld [vmem:[%s4817_s10 + $0x72] sm:$0xff]  ;;  %v4483_v60 = vld [vmem:[%s4817_s10 + $0x7a] sm:$0x3f] }
 0x25f   : > { %v2973_v31 = vmul.f32 %v6976_v25, %v6912_v51  ;;  %v2974_v11 = vmul.f32 %v4475_v47, %v6912_v51  ;;  %v2975_v15 = vmul.f32 %v6983_v43, %v6912_v51  ;;  %v2976_v50 = vmul.f32 %v4477_v6, %v6912_v51  ;;  %7765 = vst [vmem:[#allocation26_spill] sm:$0xff] %v6997_v52 }
 0x260   : > { %v2977_v23 = vmul.f32 %v6990_v24, %v6912_v51  ;;  %v2978_v39 = vmul.f32 %v4479_v4, %v6912_v51  ;;  %v2979_v19 = vmul.f32 %v6997_v52, %v6912_v51  ;;  %v2980_v32 = vmul.f32 %v4481_v12, %v6912_v51  ;;  %7766 = vst [vmem:[#allocation27_spill] sm:$0xff] %v7004_v61 }
 0x261   : > { %v2981_v22 = vmul.f32 %v7004_v61, %v6912_v51  ;;  %v2982_v63 = vmul.f32 %v4483_v60, %v6912_v51  ;;  %v2983_v42 = vadd.f32 %v2967_v13, %v2950_v0  ;;  %v2984_v46 = vadd.f32 %v2968_v40, %v2951_v49  ;;  %v4487_v49 = vld [vmem:[%s4817_s10 + $0x48] sm:$0x3f] }
 0x262   : > { %v2985_v57 = vadd.f32 %v2969_v55, %v2952_v33  ;;  %v2986_v47 = vadd.f32 %v2970_v62, %v2953_v8  ;;  %v2987_v6 = vadd.f32 %v2971_v2, %v2954_v9  ;;  %v2988_v4 = vadd.f32 %v2972_v35, %v2955_v44  ;;  %v4484_v9 = vld [vmem:[%s4817_s10 + $0x18] sm:$0x3f]  ;;  %v4489_v13 = vld [vmem:[%s4817_s10 + $0x68] sm:$0x3f]  ;;  %v7039_v35 = vld [vmem:[%s4817_s10 + $0x80] sm:$0xff] }
 0x263   : > { %v2989_v52 = vadd.f32 %v2973_v31, %v2956_v16  ;;  %v2990_v24 = vadd.f32 %v2974_v11, %v2957_v10  ;;  %v2991_v12 = vadd.f32 %v2975_v15, %v2958_v26  ;;  %v2992_v43 = vadd.f32 %v2976_v50, %v2959_v21  ;;  %v4485_v26 = vld [vmem:[%s4817_s10 + $0x28] sm:$0x3f]  ;;  %v4490_v62 = vld [vmem:[%s4817_s10 + $0x78] sm:$0x3f] }
 0x264   : > { %v2993_v25 = vadd.f32 %v2977_v23, %v2960_v56  ;;  %v2994_v30 = vadd.f32 %v2978_v39, %v2961_v59  ;;  %v2995_v61 = vadd.f32 %v2979_v19, %v2962_v28  ;;  %v2996_v48 = vadd.f32 %v2980_v32, %v2963_v5  ;;  %v4486_v59 = vld [vmem:[%s4817_s10 + $0x38] sm:$0x3f]  ;;  %v4492_v11 = vld [vmem:[%s4817_s10 + $0x88] sm:$0x3f] }
 0x265   : > { %v2997_v51 = vadd.f32 %v2981_v22, %v2964_v58  ;;  %v2998_v0 = vadd.f32 %v2982_v63, %v2965_v17  ;;  %v3000_v33 = vmul.f32 %v6860_v29, %v6915_v27  ;;  %v3001_v8 = vmul.f32 %v4484_v9, %v6915_v27  ;;  %v4488_v5 = vld [vmem:[%s4817_s10 + $0x58] sm:$0x3f] }
 0x266   : > { %v3002_v10 = vmul.f32 %v6865_v20, %v6915_v27  ;;  %v3003_v56 = vmul.f32 %v4485_v26, %v6915_v27  ;;  %v3004_v28 = vmul.f32 %v6870_v34, %v6915_v27  ;;  %v3005_v16 = vmul.f32 %v4486_v59, %v6915_v27 }
 0x267   : > { %v3006_v29 = vmul.f32 %v6875_v37, %v6915_v27  ;;  %v3007_v44 = vmul.f32 %v4487_v49, %v6915_v27  ;;  %v3008_v21 = vmul.f32 %v6880_v53, %v6915_v27  ;;  %v3009_v58 = vmul.f32 %v4488_v5, %v6915_v27  ;;  %v4501_v5 = vld [vmem:[%s4817_s10 + $0x89] sm:$0x3f] }
 0x268   : > { %v3010_v17 = vmul.f32 %v6885_v41, %v6915_v27  ;;  %v3011_v40 = vmul.f32 %v4489_v13, %v6915_v27  ;;  %v3012_v55 = vmul.f32 %v6890_v1, %v6915_v27  ;;  %v3013_v2 = vmul.f32 %v4490_v62, %v6915_v27 }
 0x269   : > { %v3014_v31 = vmul.f32 %v7039_v35, %v6915_v27  ;;  %v3015_v15 = vmul.f32 %v4492_v11, %v6915_v27  ;;  %v3016_v50 = vadd.f32 %v3000_v33, %v2983_v42  ;;  %v3017_v23 = vadd.f32 %v3001_v8, %v2984_v46 }
 0x26a   : > { %v3018_v39 = vadd.f32 %v3002_v10, %v2985_v57  ;;  %v3019_v19 = vadd.f32 %v3003_v56, %v2986_v47  ;;  %v3020_v32 = vadd.f32 %v3004_v28, %v2987_v6  ;;  %v3021_v22 = vadd.f32 %v3005_v16, %v2988_v4  ;;  %v4495_v47 = vld [vmem:[%s4817_s10 + $0x39] sm:$0x3f]  ;;  %v4496_v4 = vld [vmem:[%s4817_s10 + $0x49] sm:$0x3f] }
 0x26b   : > { %v3022_v60 = vadd.f32 %v3006_v29, %v2989_v52  ;;  %v3023_v63 = vadd.f32 %v3007_v44, %v2990_v24  ;;  %v3024_v9 = vadd.f32 %v3008_v21, %v2991_v12  ;;  %v3025_v26 = vadd.f32 %v3009_v58, %v2992_v43  ;;  %v4494_v52 = vld [vmem:[%s4817_s10 + $0x29] sm:$0x3f]  ;;  %v4499_v16 = vld [vmem:[%s4817_s10 + $0x79] sm:$0x3f]  ;;  %v7082_v44 = vld [vmem:[%s4817_s10 + $0x81] sm:$0xff] }
 0x26c   : > { %v3026_v59 = vadd.f32 %v3010_v17, %v2993_v25  ;;  %v3027_v49 = vadd.f32 %v3011_v40, %v2994_v30  ;;  %v3028_v27 = vadd.f32 %v3012_v55, %v2995_v61  ;;  %v3029_v42 = vadd.f32 %v3013_v2, %v2996_v48  ;;  %v4493_v30 = vld [vmem:[%s4817_s10 + $0x19] sm:$0x3f]  ;;  %v4498_v10 = vld [vmem:[%s4817_s10 + $0x69] sm:$0x3f] }
 0x26d   : > { %v3030_v46 = vadd.f32 %v3014_v31, %v2997_v51  ;;  %v3031_v57 = vadd.f32 %v3015_v15, %v2998_v0  ;;  %v3033_v43 = vmul.f32 %v6923_v7, %v6918_v14  ;;  %v3034_v25 = vmul.f32 %v4493_v30, %v6918_v14  ;;  %v4497_v0 = vld [vmem:[%s4817_s10 + $0x59] sm:$0x3f] }
 0x26e   : > { %v3035_v24 = vmul.f32 %v6928_v18, %v6918_v14  ;;  %v3036_v48 = vmul.f32 %v4494_v52, %v6918_v14  ;;  %v3037_v61 = vmul.f32 %v6933_v38, %v6918_v14  ;;  %v3038_v6 = vmul.f32 %v4495_v47, %v6918_v14 }
 0x26f   : > { %v3039_v7 = vmul.f32 %v6938_v36, %v6918_v14  ;;  %v3040_v12 = vmul.f32 %v4496_v4, %v6918_v14  ;;  %v3041_v51 = vmul.f32 %v6943_v45, %v6918_v14  ;;  %v3042_v33 = vmul.f32 %v4497_v0, %v6918_v14 }
 0x270   : > { %v3043_v8 = vmul.f32 %v6948_v54, %v6918_v14  ;;  %v3044_v56 = vmul.f32 %v4498_v10, %v6918_v14  ;;  %v3045_v28 = vmul.f32 %v6953_v3, %v6918_v14  ;;  %v3046_v29 = vmul.f32 %v4499_v16, %v6918_v14  ;;  %v4507_v10 = vld [vmem:[%s4817_s10 + $0x6a] sm:$0x3f] }
 0x271   : > { %v3047_v21 = vmul.f32 %v7082_v44, %v6918_v14  ;;  %v3048_v58 = vmul.f32 %v4501_v5, %v6918_v14  ;;  %v3049_v17 = vadd.f32 %v3033_v43, %v3016_v50  ;;  %v3050_v13 = vadd.f32 %v3034_v25, %v3017_v23  ;;  %v7113_v5 = vld [vmem:[%s4817_s10 + $0x82] sm:$0xff] }
 0x272   : > { %v3051_v40 = vadd.f32 %v3035_v24, %v3018_v39  ;;  %v3052_v55 = vadd.f32 %v3036_v48, %v3019_v19  ;;  %v3053_v62 = vadd.f32 %v3037_v61, %v3020_v32  ;;  %v3054_v2 = vadd.f32 %v3038_v6, %v3021_v22  ;;  %v7768_v22 = vld [vmem:[#allocation18_spill] sm:$0xff]  ;;  %v7771_v24 = vld [vmem:[#allocation20_spill] sm:$0xff] }
 0x273   : > { %v3055_v31 = vadd.f32 %v3039_v7, %v3022_v60  ;;  %v3056_v11 = vadd.f32 %v3040_v12, %v3023_v63  ;;  %v3057_v15 = vadd.f32 %v3041_v51, %v3024_v9  ;;  %v3058_v30 = vadd.f32 %v3042_v33, %v3025_v26  ;;  %v4502_v63 = vld [vmem:[%s4817_s10 + $0x1a] sm:$0x3f]  ;;  %v7769_v26 = vld [vmem:[#allocation19_spill] sm:$0xff]  ;;  %v4505_v61 = vld [vmem:[%s4817_s10 + $0x4a] sm:$0x3f]  ;;  %7775 = vst [vmem:[#allocation18_spill] sm:$0xff] %v7113_v5 }
 0x274   : > { %v3059_v52 = vadd.f32 %v3043_v8, %v3026_v59  ;;  %v3060_v47 = vadd.f32 %v3044_v56, %v3027_v49  ;;  %v3061_v14 = vadd.f32 %v3045_v28, %v3028_v27  ;;  %v3062_v4 = vadd.f32 %v3046_v29, %v3029_v42  ;;  %v4503_v49 = vld [vmem:[%s4817_s10 + $0x2a] sm:$0x3f]  ;;  %v7770_v42 = vld [vmem:[#allocation32_spill] sm:$0xff]  ;;  %v7772_v7 = vld [vmem:[#allocation13_spill] sm:$0xff] }
 0x275   : > { %v3063_v50 = vadd.f32 %v3047_v21, %v3030_v46  ;;  %v3065_v23 = vstv %s7045_s13  ;;  %v3064_v39 = vadd.f32 %v3048_v58, %v3031_v57  ;;  %v7090_v43 = vstv %s7047_s15  ;;  %v4504_v57 = vld [vmem:[%s4817_s10 + $0x3a] sm:$0x3f]  ;;  %v7773_v33 = vld [vmem:[#allocation26_spill] sm:$0xff]  ;;  %v7774_v28 = vld [vmem:[#allocation27_spill] sm:$0xff] }
 0x276   : > { %v7093_v19 = vstv %s7049_s16  ;;  %v7096_v32 = vstv %s7051_s17  ;;  %v3066_v60 = vmul.f32 %v7768_v22, %v3065_v23  ;;  %v3067_v9 = vmul.f32 %v4502_v63, %v3065_v23  ;;  %v4506_v51 = vld [vmem:[%s4817_s10 + $0x5a] sm:$0x3f]  ;;  %v4510_v22 = vld [vmem:[%s4817_s10 + $0x8a] sm:$0x3f] }
 0x277   : > { %7767 = vst [vmem:[#allocation28_spill] sm:$0xff] %v7096_v32  ;;  %v3068_v59 = vmul.f32 %v7769_v26, %v3065_v23  ;;  %v3069_v27 = vmul.f32 %v4503_v49, %v3065_v23  ;;  %v3070_v46 = vmul.f32 %v7770_v42, %v3065_v23  ;;  %v3071_v25 = vmul.f32 %v4504_v57, %v3065_v23  ;;  %v4508_v29 = vld [vmem:[%s4817_s10 + $0x7a] sm:$0x3f] }
 0x278   : > { %v3072_v48 = vmul.f32 %v7771_v24, %v3065_v23  ;;  %v3073_v6 = vmul.f32 %v4505_v61, %v3065_v23  ;;  %v3074_v12 = vmul.f32 %v7772_v7, %v3065_v23  ;;  %v3075_v0 = vmul.f32 %v4506_v51, %v3065_v23 }
 0x279   : > { %v3076_v8 = vmul.f32 %v7773_v33, %v3065_v23  ;;  %v3077_v56 = vmul.f32 %v4507_v10, %v3065_v23  ;;  %v3078_v16 = vmul.f32 %v7774_v28, %v3065_v23  ;;  %v3079_v21 = vmul.f32 %v4508_v29, %v3065_v23 }
 0x27a   : > { %v3080_v58 = vmul.f32 %v7113_v5, %v3065_v23  ;;  %v3081_v63 = vmul.f32 %v4510_v22, %v3065_v23  ;;  %v3082_v49 = vadd.f32 %v3066_v60, %v3049_v17  ;;  %v3083_v57 = vadd.f32 %v3067_v9, %v3050_v13  ;;  %v4517_v9 = vld [vmem:[%s4817_s10 + $0x88] sm:$0x3f] }
 0x27b   : > { %v3084_v61 = vadd.f32 %v3068_v59, %v3051_v40  ;;  %v3085_v7 = vadd.f32 %v3069_v27, %v3052_v55  ;;  %v3086_v51 = vadd.f32 %v3070_v46, %v3053_v62  ;;  %v3087_v33 = vadd.f32 %v3071_v25, %v3054_v2  ;;  %v4511_v40 = vld [vmem:[%s4817_s10 + $0x28] sm:$0x3f]  ;;  %v4512_v2 = vld [vmem:[%s4817_s10 + $0x38] sm:$0x3f]  ;;  %v4518_v59 = vld [vmem:[%s4817_s10 + $0x90] sm:$0xff] }
 0x27c   : > { %v3088_v24 = vadd.f32 %v3072_v48, %v3055_v31  ;;  %v3089_v10 = vadd.f32 %v3073_v6, %v3056_v11  ;;  %v3090_v28 = vadd.f32 %v3074_v12, %v3057_v15  ;;  %v3091_v42 = vadd.f32 %v3075_v0, %v3058_v30  ;;  %v4513_v15 = vld [vmem:[%s4817_s10 + $0x48] sm:$0x3f]  ;;  %v4519_v46 = vld [vmem:[%s4817_s10 + $0x98] sm:$0x3f] }
 0x27d   : > { %v3092_v29 = vadd.f32 %v3076_v8, %v3059_v52  ;;  %v3093_v26 = vadd.f32 %v3077_v56, %v3060_v47  ;;  %v3094_v32 = vadd.f32 %v3078_v16, %v3061_v14  ;;  %v3095_v5 = vadd.f32 %v3079_v21, %v3062_v4  ;;  %v4514_v52 = vld [vmem:[%s4817_s10 + $0x58] sm:$0x3f]  ;;  %v4515_v14 = vld [vmem:[%s4817_s10 + $0x68] sm:$0x3f] }
 0x27e   : > { %v3096_v23 = vadd.f32 %v3080_v58, %v3063_v50  ;;  %v3097_v17 = vadd.f32 %v3081_v63, %v3064_v39  ;;  %v3099_v13 = vmul.f32 %v6865_v20, %v7090_v43  ;;  %v3100_v55 = vmul.f32 %v4511_v40, %v7090_v43  ;;  %v4526_v40 = vld [vmem:[%s4817_s10 + $0x89] sm:$0x3f] }
 0x27f   : > { %v3101_v62 = vmul.f32 %v6870_v34, %v7090_v43  ;;  %v3102_v31 = vmul.f32 %v4512_v2, %v7090_v43  ;;  %v3103_v11 = vmul.f32 %v6875_v37, %v7090_v43  ;;  %v3104_v30 = vmul.f32 %v4513_v15, %v7090_v43  ;;  %v4516_v37 = vld [vmem:[%s4817_s10 + $0x78] sm:$0x3f] }
 0x280   : > { %v3105_v20 = vmul.f32 %v6880_v53, %v7090_v43  ;;  %v3106_v47 = vmul.f32 %v4514_v52, %v7090_v43  ;;  %v3107_v34 = vmul.f32 %v6885_v41, %v7090_v43  ;;  %v3108_v4 = vmul.f32 %v4515_v14, %v7090_v43  ;;  %v4528_v2 = vld [vmem:[%s4817_s10 + $0x99] sm:$0x3f] }
 0x281   : > { %v3109_v50 = vmul.f32 %v6890_v1, %v7090_v43  ;;  %v3110_v39 = vmul.f32 %v4516_v37, %v7090_v43  ;;  %v3111_v60 = vmul.f32 %v7039_v35, %v7090_v43  ;;  %v3112_v53 = vmul.f32 %v4517_v9, %v7090_v43  ;;  %v7777_v9 = vld [vmem:[#allocation19_spill] sm:$0xff] }
 0x282   : > { %v3113_v27 = vmul.f32 %v4518_v59, %v7090_v43  ;;  %v3114_v41 = vmul.f32 %v4519_v46, %v7090_v43  ;;  %v3115_v25 = vadd.f32 %v3099_v13, %v3082_v49  ;;  %v3116_v48 = vadd.f32 %v3100_v55, %v3083_v57  ;;  %v4527_v55 = vld [vmem:[%s4817_s10 + $0x91] sm:$0xff]  ;;  %v4529_v59 = vld [vmem:[%s4817_s10 + $0x2a] sm:$0x3f] }
 0x283   : > { %v3117_v6 = vadd.f32 %v3101_v62, %v3084_v61  ;;  %v3118_v1 = vadd.f32 %v3102_v31, %v3085_v7  ;;  %v3119_v12 = vadd.f32 %v3103_v11, %v3086_v51  ;;  %v3120_v0 = vadd.f32 %v3104_v30, %v3087_v33  ;;  %v4520_v7 = vld [vmem:[%s4817_s10 + $0x29] sm:$0x3f]  ;;  %v4523_v61 = vld [vmem:[%s4817_s10 + $0x59] sm:$0x3f] }
 0x284   : > { %v3121_v8 = vadd.f32 %v3105_v20, %v3088_v24  ;;  %v3122_v56 = vadd.f32 %v3106_v47, %v3089_v10  ;;  %v3123_v35 = vadd.f32 %v3107_v34, %v3090_v28  ;;  %v3124_v16 = vadd.f32 %v3108_v4, %v3091_v42  ;;  %v4521_v42 = vld [vmem:[%s4817_s10 + $0x39] sm:$0x3f]  ;;  %v4524_v10 = vld [vmem:[%s4817_s10 + $0x69] sm:$0x3f] }
 0x285   : > { %v3125_v21 = vadd.f32 %v3109_v50, %v3092_v29  ;;  %v3126_v58 = vadd.f32 %v3110_v39, %v3093_v26  ;;  %v3127_v22 = vadd.f32 %v3111_v60, %v3094_v32  ;;  %v3128_v63 = vadd.f32 %v3112_v53, %v3095_v5  ;;  %v4522_v26 = vld [vmem:[%s4817_s10 + $0x49] sm:$0x3f]  ;;  %v7776_v60 = vld [vmem:[#allocation28_spill] sm:$0xff] }
 0x286   : > { %v3129_v43 = vadd.f32 %v3113_v27, %v3096_v23  ;;  %v3130_v49 = vadd.f32 %v3114_v41, %v3097_v17  ;;  %v3132_v57 = vmul.f32 %v6928_v18, %v7093_v19  ;;  %v3133_v33 = vmul.f32 %v4520_v7, %v7093_v19  ;;  %v7778_v46 = vld [vmem:[#allocation32_spill] sm:$0xff] }
 0x287   : > { %v3134_v24 = vmul.f32 %v6933_v38, %v7093_v19  ;;  %v3135_v28 = vmul.f32 %v4521_v42, %v7093_v19  ;;  %v3136_v32 = vmul.f32 %v6938_v36, %v7093_v19  ;;  %v3137_v5 = vmul.f32 %v4522_v26, %v7093_v19  ;;  %v4525_v36 = vld [vmem:[%s4817_s10 + $0x79] sm:$0x3f]  ;;  %v4535_v42 = vld [vmem:[%s4817_s10 + $0x8a] sm:$0x3f] }
 0x288   : > { %v3138_v18 = vmul.f32 %v6943_v45, %v7093_v19  ;;  %v3139_v51 = vmul.f32 %v4523_v61, %v7093_v19  ;;  %v3140_v38 = vmul.f32 %v6948_v54, %v7093_v19  ;;  %v3141_v29 = vmul.f32 %v4524_v10, %v7093_v19 }
 0x289   : > { %v3142_v23 = vmul.f32 %v6953_v3, %v7093_v19  ;;  %v3143_v17 = vmul.f32 %v4525_v36, %v7093_v19  ;;  %v3144_v13 = vmul.f32 %v7082_v44, %v7093_v19  ;;  %v3145_v45 = vmul.f32 %v4526_v40, %v7093_v19 }
 0x28a   : > { %v3146_v62 = vmul.f32 %v4527_v55, %v7093_v19  ;;  %v3147_v54 = vmul.f32 %v4528_v2, %v7093_v19  ;;  %v3148_v31 = vadd.f32 %v3132_v57, %v3115_v25  ;;  %v3149_v11 = vadd.f32 %v3133_v33, %v3116_v48  ;;  %v4530_v25 = vld [vmem:[%s4817_s10 + $0x3a] sm:$0x3f]  ;;  %v7783_v33 = vld [vmem:[#allocation18_spill] sm:$0xff] }
 0x28b   : > { %v3150_v15 = vadd.f32 %v3134_v24, %v3117_v6  ;;  %v3151_v3 = vadd.f32 %v3135_v28, %v3118_v1  ;;  %v3152_v30 = vadd.f32 %v3136_v32, %v3119_v12  ;;  %v3153_v20 = vadd.f32 %v3137_v5, %v3120_v0  ;;  %v7779_v6 = vld [vmem:[#allocation20_spill] sm:$0xff]  ;;  %v4531_v12 = vld [vmem:[%s4817_s10 + $0x4a] sm:$0x3f] }
 0x28c   : > { %v3154_v52 = vadd.f32 %v3138_v18, %v3121_v8  ;;  %v3155_v47 = vadd.f32 %v3139_v51, %v3122_v56  ;;  %v3156_v44 = vadd.f32 %v3140_v38, %v3123_v35  ;;  %v3157_v34 = vadd.f32 %v3141_v29, %v3124_v16  ;;  %v7780_v8 = vld [vmem:[#allocation13_spill] sm:$0xff]  ;;  %v4532_v35 = vld [vmem:[%s4817_s10 + $0x5a] sm:$0x3f]  ;;  %v4536_v32 = vld [vmem:[%s4817_s10 + $0x92] sm:$0xff] }
 0x28d   : > { %v3158_v14 = vadd.f32 %v3142_v23, %v3125_v21  ;;  %v3159_v4 = vadd.f32 %v3143_v17, %v3126_v58  ;;  %v3160_v50 = vadd.f32 %v3144_v13, %v3127_v22  ;;  %v3161_v37 = vadd.f32 %v3145_v45, %v3128_v63  ;;  %v7781_v21 = vld [vmem:[#allocation26_spill] sm:$0xff]  ;;  %v4534_v57 = vld [vmem:[%s4817_s10 + $0x7a] sm:$0x3f] }
 0x28e   : > { %v3162_v19 = vadd.f32 %v3146_v62, %v3129_v43  ;;  %v3163_v39 = vadd.f32 %v3147_v54, %v3130_v49  ;;  %v3165_v53 = vmul.f32 %v7777_v9, %v7776_v60  ;;  %v3166_v27 = vmul.f32 %v4529_v59, %v7776_v60  ;;  %v4533_v22 = vld [vmem:[%s4817_s10 + $0x6a] sm:$0x3f]  ;;  %v7782_v43 = vld [vmem:[#allocation27_spill] sm:$0xff]  ;;  %v4537_v5 = vld [vmem:[%s4817_s10 + $0x9a] sm:$0x3f]  ;;  %s7332_s10 = sld [smem:[#allocation8 + $0x1f]] }
 0x28f   : > { %v3167_v41 = vmul.f32 %v7778_v46, %v7776_v60  ;;  %v3168_v48 = vmul.f32 %v4530_v25, %v7776_v60  ;;  %v3169_v1 = vmul.f32 %v7779_v6, %v7776_v60  ;;  %v3170_v0 = vmul.f32 %v4531_v12, %v7776_v60 }
 0x290   : > { %v3171_v56 = vmul.f32 %v7780_v8, %v7776_v60  ;;  %v3172_v16 = vmul.f32 %v4532_v35, %v7776_v60  ;;  %v3173_v58 = vmul.f32 %v7781_v21, %v7776_v60  ;;  %v3174_v63 = vmul.f32 %v4533_v22, %v7776_v60  ;;  %v7784_v35 = vld [vmem:[#allocation22_spill] sm:$0xff]  ;;  %v7785_v21 = vld [vmem:[#allocation29_spill] sm:$0xff] }
 0x291   : > { %v3175_v49 = vmul.f32 %v7782_v43, %v7776_v60  ;;  %v3176_v7 = vmul.f32 %v4534_v57, %v7776_v60  ;;  %v3177_v24 = vmul.f32 %v7783_v33, %v7776_v60  ;;  %v3178_v28 = vmul.f32 %v4535_v42, %v7776_v60  ;;  %v7786_v22 = vld [vmem:[#allocation25_spill] sm:$0xff]  ;;  %v7787_v43 = vld [vmem:[#allocation14_spill] sm:$0xff]  ;;  %v7788_v57 = vld [vmem:[#allocation15_spill] sm:$0xff] }
 0x292   : > { %v3179_v26 = vmul.f32 %v4536_v32, %v7776_v60  ;;  %v3180_v18 = vmul.f32 %v4537_v5, %v7776_v60  ;;  %v3181_v61 = vadd.f32 %v3165_v53, %v3148_v31  ;;  %v3182_v51 = vadd.f32 %v3166_v27, %v3149_v11  ;;  %v7789_v33 = vld [vmem:[#allocation16_spill] sm:$0xff]  ;;  %v7790_v42 = vld [vmem:[#allocation31_spill] sm:$0xff]  ;;  %v7791_v32 = vld [vmem:[#allocation30_spill] sm:$0xff] }
 0x293   : > { %v3183_v38 = vadd.f32 %v3167_v41, %v3150_v15  ;;  %v3184_v10 = vadd.f32 %v3168_v48, %v3151_v3  ;;  %v3185_v29 = vadd.f32 %v3169_v1, %v3152_v30  ;;  %v3186_v23 = vadd.f32 %v3170_v0, %v3153_v20  ;;  %v7792_v5 = vld [vmem:[#allocation21_spill] sm:$0xff] }
 0x294   : > { %v3187_v36 = vadd.f32 %v3171_v56, %v3154_v52  ;;  %v3188_v17 = vadd.f32 %v3172_v16, %v3155_v47  ;;  %v3189_v13 = vadd.f32 %v3173_v58, %v3156_v44  ;;  %v3190_v40 = vadd.f32 %v3174_v63, %v3157_v34 }
 0x295   : > { %v3191_v45 = vadd.f32 %v3175_v49, %v3158_v14  ;;  %v3192_v55 = vadd.f32 %v3176_v7, %v3159_v4  ;;  %v3193_v62 = vadd.f32 %v3177_v24, %v3160_v50  ;;  %v3194_v2 = vadd.f32 %v3178_v28, %v3161_v37 }
 0x296   : > { %v7221_v54 = vadd.f32 %v3179_v26, %v3162_v19  ;;  %v7223_v31 = vadd.f32 %v3180_v18, %v3163_v39  ;;  %v7225_v11 = vmax.f32 %v3181_v61, 0.0  ;;  %v7227_v15 = vmax.f32 %v3182_v51, 0.0  ;;  %v7793_v61 = vld [vmem:[#allocation23_spill] sm:$0xff] }
 0x297   : > { %v7229_v3 = vmax.f32 %v3183_v38, 0.0  ;;  %v7231_v30 = vmax.f32 %v3184_v10, 0.0  ;;  %v7233_v20 = vmax.f32 %v3185_v29, 0.0  ;;  %v7235_v52 = vmax.f32 %v3186_v23, 0.0 }
 0x298   : > { %v7237_v47 = vmax.f32 %v3187_v36, 0.0  ;;  %v7239_v44 = vmax.f32 %v3188_v17, 0.0  ;;  %v7241_v34 = vmax.f32 %v3189_v13, 0.0  ;;  %v7243_v14 = vmax.f32 %v3190_v40, 0.0 }
 0x299   : > { %v7245_v4 = vmax.f32 %v3191_v45, 0.0  ;;  %v7247_v50 = vmax.f32 %v3192_v55, 0.0  ;;  %v7249_v37 = vmax.f32 %v3193_v62, 0.0  ;;  %v7251_v19 = vmax.f32 %v3194_v2, 0.0 }
 0x29a   : > { %v3213_v39 = vstv %s7205_s18  ;;  %v3238_v60 = vstv %s7207_s19  ;;  %v7266_v12 = vstv %s7217_s3  ;;  %v7269_v0 = vstv %s7219_s23 }
 0x29b   : > { %v3214_v9 = vmul.f32 %v3213_v39, %v7225_v11  ;;  %v3215_v53 = vmul.f32 %v3213_v39, %v7227_v15  ;;  %v3216_v59 = vmul.f32 %v3213_v39, %v7229_v3  ;;  %v3217_v27 = vmul.f32 %v3213_v39, %v7231_v30 }
 0x29c   : > { %v3218_v46 = vmul.f32 %v3213_v39, %v7233_v20  ;;  %v3219_v41 = vmul.f32 %v3213_v39, %v7235_v52  ;;  %v3220_v25 = vmul.f32 %v3213_v39, %v7237_v47  ;;  %v3221_v48 = vmul.f32 %v3213_v39, %v7239_v44 }
 0x29d   : > { %v3222_v6 = vmul.f32 %v3213_v39, %v7241_v34  ;;  %v3223_v1 = vmul.f32 %v3213_v39, %v7243_v14  ;;  %v3224_v8 = vmul.f32 %v3213_v39, %v7245_v4  ;;  %v3225_v56 = vmul.f32 %v3213_v39, %v7247_v50 }
 0x29e   : > { %v3226_v16 = vadd.f32 %v3214_v9, %v7784_v35  ;;  %v3227_v58 = vadd.f32 %v3215_v53, %v7785_v21  ;;  %v3228_v63 = vadd.f32 %v3216_v59, %v7786_v22  ;;  %v3229_v49 = vadd.f32 %v3217_v27, %v7787_v43 }
 0x29f   : > { %v3230_v7 = vadd.f32 %v3218_v46, %v7788_v57  ;;  %v3231_v24 = vadd.f32 %v3219_v41, %v7789_v33  ;;  %v3232_v28 = vadd.f32 %v3220_v25, %v7790_v42  ;;  %v3233_v26 = vadd.f32 %v3221_v48, %v7791_v32  ;;  %v7794_v57 = vld [vmem:[#allocation17_spill] sm:$0xff]  ;;  %v7795_v42 = vld [vmem:[#allocation24_spill] sm:$0xff] }
 0x2a0   : > { %v3234_v18 = vadd.f32 %v3222_v6, %v7792_v5  ;;  %v3235_v51 = vadd.f32 %v3223_v1, %v7793_v61  ;;  %v3239_v38 = vmul.f32 %v3238_v60, %v7225_v11  ;;  %v3240_v10 = vmul.f32 %v3238_v60, %v7227_v15 }
 0x2a1   : > { %v3241_v29 = vmul.f32 %v3238_v60, %v7229_v3  ;;  %v3242_v23 = vmul.f32 %v3238_v60, %v7231_v30  ;;  %v3243_v36 = vmul.f32 %v3238_v60, %v7233_v20  ;;  %v3244_v17 = vmul.f32 %v3238_v60, %v7235_v52 }
 0x2a2   : > { %v3245_v13 = vmul.f32 %v3238_v60, %v7237_v47  ;;  %v3246_v40 = vmul.f32 %v3238_v60, %v7239_v44  ;;  %v3247_v45 = vmul.f32 %v3238_v60, %v7241_v34  ;;  %v3248_v55 = vmul.f32 %v3238_v60, %v7243_v14 }
 0x2a3   : > { %v3249_v62 = vmul.f32 %v3238_v60, %v7245_v4  ;;  %v3250_v2 = vmul.f32 %v3238_v60, %v7247_v50  ;;  %v3263_v39 = vrot.slane %v3239_v38, 1  ;;  %v3264_v9 = vrot.slane %v3240_v10, 1 }
 0x2a4   : > { %v3266_v53 = vrot.slane %v3241_v29, 1  ;;  %v3267_v59 = vrot.slane %v3242_v23, 1  ;;  %v3269_v27 = vrot.slane %v3243_v36, 1  ;;  %v3270_v46 = vrot.slane %v3244_v17, 1 }
 0x2a5   : > { %v3272_v41 = vrot.slane %v3245_v13, 1  ;;  %v3273_v25 = vrot.slane %v3246_v40, 1  ;;  %v3265_v48 = vsel %vm888_vm0, %v3263_v39, %v3264_v9  ;;  %v3275_v1 = vrot.slane %v3247_v45, 1 }
 0x2a6   : > { %v3268_v6 = vsel %vm888_vm0, %v3266_v53, %v3267_v59  ;;  %v3276_v35 = vrot.slane %v3248_v55, 1  ;;  %v3271_v21 = vsel %vm888_vm0, %v3269_v27, %v3270_v46  ;;  %v3278_v43 = vrot.slane %v3249_v62, 1 }
 0x2a7   : > { %v3274_v22 = vsel %vm888_vm0, %v3272_v41, %v3273_v25  ;;  %v3279_v60 = vrot.slane %v3250_v2, 1  ;;  %v3236_v33 = vadd.f32 %v3224_v8, %v7794_v57  ;;  %v3237_v32 = vadd.f32 %v3225_v56, %v7795_v42 }
 0x2a8   : > { %v3277_v5 = vsel %vm888_vm0, %v3275_v1, %v3276_v35  ;;  %v3293_v61 = vadd.f32 %v3265_v48, %v3226_v16  ;;  %v3294_v10 = vadd.f32 %v3264_v9, %v3227_v58  ;;  %v3295_v29 = vadd.f32 %v3268_v6, %v3228_v63 }
 0x2a9   : > { %v3280_v38 = vsel %vm888_vm0, %v3278_v43, %v3279_v60  ;;  %v3296_v23 = vadd.f32 %v3267_v59, %v3229_v49  ;;  %v3297_v36 = vadd.f32 %v3271_v21, %v3230_v7  ;;  %v3298_v17 = vadd.f32 %v3270_v46, %v3231_v24 }
 0x2aa   : > { %v3299_v13 = vadd.f32 %v3274_v22, %v3232_v28  ;;  %v3300_v40 = vadd.f32 %v3273_v25, %v3233_v26  ;;  %v3301_v45 = vadd.f32 %v3277_v5, %v3234_v18  ;;  %v3302_v55 = vadd.f32 %v3276_v35, %v3235_v51 }
 0x2ab   : > { %v3306_v62 = vmul.f32 %v7266_v12, %v7225_v11  ;;  %v3307_v8 = vmul.f32 %v7266_v12, %v7227_v15  ;;  %v3308_v56 = vmul.f32 %v7266_v12, %v7229_v3  ;;  %v3309_v16 = vmul.f32 %v7266_v12, %v7231_v30 }
 0x2ac   : > { %v3310_v58 = vmul.f32 %v7266_v12, %v7233_v20  ;;  %v3311_v63 = vmul.f32 %v7266_v12, %v7235_v52  ;;  %v3312_v49 = vmul.f32 %v7266_v12, %v7237_v47  ;;  %v3313_v11 = vmul.f32 %v7266_v12, %v7239_v44 }
 0x2ad   : > { %v3314_v15 = vmul.f32 %v7266_v12, %v7241_v34  ;;  %v3315_v7 = vmul.f32 %v7266_v12, %v7243_v14  ;;  %v3316_v24 = vmul.f32 %v7266_v12, %v7245_v4  ;;  %v3317_v28 = vmul.f32 %v7266_v12, %v7247_v50 }
 0x2ae   : > { %v3330_v26 = vrot.slane %v3306_v62, 2  ;;  %v3331_v18 = vrot.slane %v3307_v8, 2  ;;  %v3333_v51 = vrot.slane %v3308_v56, 2  ;;  %v3334_v2 = vrot.slane %v3309_v16, 2 }
 0x2af   : > { %v3336_v39 = vrot.slane %v3310_v58, 2  ;;  %v3337_v9 = vrot.slane %v3311_v63, 2  ;;  %v3339_v59 = vrot.slane %v3312_v49, 2  ;;  %v3340_v27 = vrot.slane %v3313_v11, 2 }
 0x2b0   : > { %v3332_v53 = vsel %vm956_vm1, %v3330_v26, %v3331_v18  ;;  %v3342_v46 = vrot.slane %v3314_v15, 2  ;;  %v3335_v41 = vsel %vm956_vm1, %v3333_v51, %v3334_v2  ;;  %v3343_v48 = vrot.slane %v3315_v7, 2 }
 0x2b1   : > { %v3338_v25 = vsel %vm956_vm1, %v3336_v39, %v3337_v9  ;;  %v3345_v6 = vrot.slane %v3316_v24, 2  ;;  %v3303_v1 = vadd.f32 %v3280_v38, %v3236_v33  ;;  %v3304_v35 = vadd.f32 %v3279_v60, %v3237_v32 }
 0x2b2   : > { %v3341_v12 = vsel %vm956_vm1, %v3339_v59, %v3340_v27  ;;  %v3346_v21 = vrot.slane %v3317_v28, 2  ;;  %v3344_v22 = vsel %vm956_vm1, %v3342_v46, %v3343_v48  ;;  %v3360_v43 = vadd.f32 %v3332_v53, %v3293_v61 }
 0x2b3   : > { %v3361_v57 = vadd.f32 %v3331_v18, %v3294_v10  ;;  %v3362_v42 = vadd.f32 %v3335_v41, %v3295_v29  ;;  %v3363_v62 = vadd.f32 %v3334_v2, %v3296_v23  ;;  %v3364_v8 = vadd.f32 %v3338_v25, %v3297_v36 }
 0x2b4   : > { %v3347_v5 = vsel %vm956_vm1, %v3345_v6, %v3346_v21  ;;  %v3365_v56 = vadd.f32 %v3337_v9, %v3298_v17  ;;  %v3366_v16 = vadd.f32 %v3341_v12, %v3299_v13  ;;  %v3367_v58 = vadd.f32 %v3340_v27, %v3300_v40 }
 0x2b5   : > { %v3368_v63 = vadd.f32 %v3344_v22, %v3301_v45  ;;  %v3369_v33 = vadd.f32 %v3343_v48, %v3302_v55  ;;  %v3373_v60 = vmul.f32 %v7269_v0, %v7229_v3  ;;  %v3374_v32 = vmul.f32 %v7269_v0, %v7231_v30 }
 0x2b6   : > { %v3375_v61 = vmul.f32 %v7269_v0, %v7233_v20  ;;  %v3376_v38 = vmul.f32 %v7269_v0, %v7235_v52  ;;  %v3377_v10 = vmul.f32 %v7269_v0, %v7237_v47  ;;  %v3378_v29 = vmul.f32 %v7269_v0, %v7239_v44 }
 0x2b7   : > { %v3379_v23 = vmul.f32 %v7269_v0, %v7241_v34  ;;  %v3380_v36 = vmul.f32 %v7269_v0, %v7243_v14  ;;  %v3370_v17 = vadd.f32 %v3347_v5, %v3303_v1  ;;  %v3381_v13 = vmul.f32 %v7269_v0, %v7245_v4 }
 0x2b8   : > { %v3382_v40 = vmul.f32 %v7269_v0, %v7247_v50  ;;  %v3383_v45 = vmul.f32 %v7269_v0, %v7249_v37  ;;  %v7358_v55 = vmax.f32 %v7221_v54, 0.0  ;;  %v7361_v49 = vmax.f32 %v7223_v31, 0.0 }
 0x2b9   : > { %v3371_v11 = vadd.f32 %v3346_v21, %v3304_v35  ;;  %v3384_v15 = vmul.f32 %v7269_v0, %v7251_v19  ;;  %v3385_v7 = vadd.f32 %v3373_v60, %v3360_v43  ;;  %v3386_v24 = vadd.f32 %v3374_v32, %v3361_v57 }
 0x2ba   : > { %v3387_v28 = vadd.f32 %v3375_v61, %v3362_v42  ;;  %v3388_v26 = vadd.f32 %v3376_v38, %v3363_v62  ;;  %v3389_v18 = vadd.f32 %v3377_v10, %v3364_v8  ;;  %v3390_v51 = vadd.f32 %v3378_v29, %v3365_v56 }
 0x2bb   : > { %v3391_v2 = vadd.f32 %v3379_v23, %v3366_v16  ;;  %v3392_v39 = vadd.f32 %v3380_v36, %v3367_v58  ;;  %v7371_v54 = vadd.f32 %v3381_v13, %v3368_v63  ;;  %v7373_v31 = vadd.f32 %v3382_v40, %v3369_v33 }
 0x2bc   : > { %v7375_v9 = vadd.f32 %v3383_v45, %v3370_v17  ;;  %v3397_v0 = vstv %s7332_s10  ;;  %v3396_v60 = vadd.f32 %v3384_v15, %v3371_v11  ;;  %v3464_v29 = vstv %s7365_s24 }
 0x2bd   : > { %v3398_v53 = vmul.f32 %v3397_v0, %v7229_v3  ;;  %v3399_v59 = vmul.f32 %v3397_v0, %v7231_v30  ;;  %v3400_v27 = vmul.f32 %v3397_v0, %v7233_v20  ;;  %v3401_v46 = vmul.f32 %v3397_v0, %v7235_v52 }
 0x2be   : > { %v3402_v41 = vmul.f32 %v3397_v0, %v7237_v47  ;;  %v3403_v25 = vmul.f32 %v3397_v0, %v7239_v44  ;;  %v3404_v48 = vmul.f32 %v3397_v0, %v7241_v34  ;;  %v3405_v6 = vmul.f32 %v3397_v0, %v7243_v14 }
 0x2bf   : > { %v3406_v1 = vmul.f32 %v3397_v0, %v7245_v4  ;;  %v3407_v35 = vmul.f32 %v3397_v0, %v7247_v50  ;;  %v3408_v12 = vmul.f32 %v3397_v0, %v7249_v37  ;;  %v7390_v21 = vmul.f32 %v3397_v0, %v7251_v19 }
 0x2c0   : > { %v3422_v22 = vrot.slane %v3398_v53, 1  ;;  %v3423_v43 = vrot.slane %v3399_v59, 1  ;;  %v3425_v57 = vrot.slane %v3400_v27, 1  ;;  %v3426_v42 = vrot.slane %v3401_v46, 1 }
 0x2c1   : > { %v3428_v5 = vrot.slane %v3402_v41, 1  ;;  %v3429_v62 = vrot.slane %v3403_v25, 1  ;;  %v3431_v8 = vrot.slane %v3404_v48, 1  ;;  %v3432_v56 = vrot.slane %v3405_v6, 1 }
 0x2c2   : > { %v3424_v16 = vsel %vm888_vm0, %v3422_v22, %v3423_v43  ;;  %v3427_v58 = vsel %vm888_vm0, %v3425_v57, %v3426_v42  ;;  %v3434_v63 = vrot.slane %v3406_v1, 1  ;;  %v3435_v33 = vrot.slane %v3407_v35, 1 }
 0x2c3   : > { %v3430_v32 = vsel %vm888_vm0, %v3428_v5, %v3429_v62  ;;  %v3437_v61 = vrot.slane %v3408_v12, 1  ;;  %v3438_v38 = vrot.slane %v7390_v21, 1  ;;  %v3433_v10 = vsel %vm888_vm0, %v3431_v8, %v3432_v56 }
 0x2c4   : > { %v7399_v23 = vstv %s7367_s25  ;;  %v7402_v36 = vstv %s7369_s29  ;;  %v3436_v17 = vsel %vm888_vm0, %v3434_v63, %v3435_v33  ;;  %v3452_v13 = vadd.f32 %v3424_v16, %v3385_v7 }
 0x2c5   : > { %v3453_v40 = vadd.f32 %v3423_v43, %v3386_v24  ;;  %v3454_v45 = vadd.f32 %v3427_v58, %v3387_v28  ;;  %v3439_v0 = vsel %vm888_vm0, %v3437_v61, %v3438_v38  ;;  %v3455_v11 = vadd.f32 %v3426_v42, %v3388_v26 }
 0x2c6   : > { %v3456_v15 = vadd.f32 %v3430_v32, %v3389_v18  ;;  %v3457_v53 = vadd.f32 %v3429_v62, %v3390_v51  ;;  %v3458_v59 = vadd.f32 %v3433_v10, %v3391_v2  ;;  %v3459_v27 = vadd.f32 %v3432_v56, %v3392_v39 }
 0x2c7   : > { %v3465_v46 = vmul.f32 %v3464_v29, %v7229_v3  ;;  %v3466_v41 = vmul.f32 %v3464_v29, %v7231_v30  ;;  %v3467_v25 = vmul.f32 %v3464_v29, %v7233_v20  ;;  %v3468_v48 = vmul.f32 %v3464_v29, %v7235_v52 }
 0x2c8   : > { %v3469_v6 = vmul.f32 %v3464_v29, %v7237_v47  ;;  %v3470_v7 = vmul.f32 %v3464_v29, %v7239_v44  ;;  %v3471_v24 = vmul.f32 %v3464_v29, %v7241_v34  ;;  %v3472_v28 = vmul.f32 %v3464_v29, %v7243_v14 }
 0x2c9   : > { %v3473_v26 = vmul.f32 %v3464_v29, %v7245_v4  ;;  %v3474_v18 = vmul.f32 %v3464_v29, %v7247_v50  ;;  %v3475_v3 = vmul.f32 %v3464_v29, %v7249_v37  ;;  %v3476_v30 = vmul.f32 %v3464_v29, %v7251_v19 }
 0x2ca   : > { %v3489_v51 = vrot.slane %v3465_v46, 2  ;;  %v3490_v2 = vrot.slane %v3466_v41, 2  ;;  %v3492_v39 = vrot.slane %v3467_v25, 2  ;;  %v3493_v1 = vrot.slane %v3468_v48, 2 }
 0x2cb   : > { %v3495_v35 = vrot.slane %v3469_v6, 2  ;;  %v3496_v12 = vrot.slane %v3470_v7, 2  ;;  %v3498_v22 = vrot.slane %v3471_v24, 2  ;;  %v3499_v43 = vrot.slane %v3472_v28, 2 }
 0x2cc   : > { %v3491_v21 = vsel %vm956_vm1, %v3489_v51, %v3490_v2  ;;  %v3501_v57 = vrot.slane %v3473_v26, 2  ;;  %v3494_v42 = vsel %vm956_vm1, %v3492_v39, %v3493_v1  ;;  %v3502_v62 = vrot.slane %v3474_v18, 2 }
 0x2cd   : > { %v3497_v5 = vsel %vm956_vm1, %v3495_v35, %v3496_v12  ;;  %v3504_v8 = vrot.slane %v3475_v3, 2  ;;  %v3460_v56 = vadd.f32 %v3436_v17, %v7371_v54  ;;  %v3461_v16 = vadd.f32 %v3435_v33, %v7373_v31 }
 0x2ce   : > { %v3500_v58 = vsel %vm956_vm1, %v3498_v22, %v3499_v43  ;;  %v3505_v63 = vrot.slane %v3476_v30, 2  ;;  %v3462_v32 = vadd.f32 %v3439_v0, %v7375_v9  ;;  %v3463_v61 = vadd.f32 %v3438_v38, %v3396_v60 }
 0x2cf   : > { %v3519_v10 = vadd.f32 %v3491_v21, %v3452_v13  ;;  %v3520_v29 = vadd.f32 %v3490_v2, %v3453_v40  ;;  %v3503_v46 = vsel %vm956_vm1, %v3501_v57, %v3502_v62  ;;  %v3521_v41 = vadd.f32 %v3494_v42, %v3454_v45 }
 0x2d0   : > { %v3522_v25 = vadd.f32 %v3493_v1, %v3455_v11  ;;  %v3523_v48 = vadd.f32 %v3497_v5, %v3456_v15  ;;  %v3506_v6 = vsel %vm956_vm1, %v3504_v8, %v3505_v63  ;;  %v3524_v7 = vadd.f32 %v3496_v12, %v3457_v53 }
 0x2d1   : > { %v3525_v24 = vadd.f32 %v3500_v58, %v3458_v59  ;;  %v3526_v54 = vadd.f32 %v3499_v43, %v3459_v27  ;;  %v3532_v31 = vmul.f32 %v7399_v23, %v7233_v20  ;;  %v3533_v33 = vmul.f32 %v7399_v23, %v7235_v52 }
 0x2d2   : > { %v3534_v9 = vmul.f32 %v7399_v23, %v7237_v47  ;;  %v3535_v60 = vmul.f32 %v7399_v23, %v7239_v44  ;;  %v3536_v38 = vmul.f32 %v7399_v23, %v7241_v34  ;;  %v3537_v17 = vmul.f32 %v7399_v23, %v7243_v14 }
 0x2d3   : > { %v3538_v13 = vmul.f32 %v7399_v23, %v7245_v4  ;;  %v3539_v40 = vmul.f32 %v7399_v23, %v7247_v50  ;;  %v3527_v45 = vadd.f32 %v3503_v46, %v3460_v56  ;;  %v3528_v0 = vadd.f32 %v3502_v62, %v3461_v16 }
 0x2d4   : > { %v3529_v11 = vadd.f32 %v3506_v6, %v3462_v32  ;;  %v3530_v15 = vadd.f32 %v3505_v63, %v3463_v61  ;;  %v3540_v53 = vmul.f32 %v7399_v23, %v7249_v37  ;;  %v3541_v59 = vmul.f32 %v7399_v23, %v7251_v19 }
 0x2d5   : > { %v3542_v27 = vmul.f32 %v7399_v23, %v7358_v55  ;;  %v3543_v28 = vmul.f32 %v7399_v23, %v7361_v49  ;;  %v3544_v26 = vadd.f32 %v3532_v31, %v3519_v10  ;;  %v3545_v18 = vadd.f32 %v3533_v33, %v3520_v29 }
 0x2d6   : > { %v3546_v3 = vadd.f32 %v3534_v9, %v3521_v41  ;;  %v3547_v30 = vadd.f32 %v3535_v60, %v3522_v25  ;;  %v3548_v51 = vadd.f32 %v3536_v38, %v3523_v48  ;;  %v3549_v2 = vadd.f32 %v3537_v17, %v3524_v7 }
 0x2d7   : > { %v3550_v39 = vadd.f32 %v3538_v13, %v3525_v24  ;;  %v3551_v1 = vadd.f32 %v3539_v40, %v3526_v54  ;;  %v3557_v35 = vmul.f32 %v7402_v36, %v7233_v20  ;;  %v3558_v12 = vmul.f32 %v7402_v36, %v7235_v52 }
 0x2d8   : > { %v3559_v21 = vmul.f32 %v7402_v36, %v7237_v47  ;;  %v3560_v23 = vmul.f32 %v7402_v36, %v7239_v44  ;;  %v3561_v22 = vmul.f32 %v7402_v36, %v7241_v34  ;;  %v3562_v43 = vmul.f32 %v7402_v36, %v7243_v14 }
 0x2d9   : > { %v3563_v57 = vmul.f32 %v7402_v36, %v7245_v4  ;;  %v3564_v42 = vmul.f32 %v7402_v36, %v7247_v50  ;;  %v3565_v5 = vmul.f32 %v7402_v36, %v7249_v37  ;;  %v7473_v62 = vmul.f32 %v7402_v36, %v7251_v19 }
 0x2da   : > { %v3567_v8 = vmul.f32 %v7402_v36, %v7358_v55  ;;  %v7479_v56 = vmul.f32 %v7402_v36, %v7361_v49  ;;  %v3581_v16 = vrot.slane %v3557_v35, 1  ;;  %v3582_v58 = vrot.slane %v3558_v12, 1 }
 0x2db   : > { %v3584_v63 = vrot.slane %v3559_v21, 1  ;;  %v3585_v32 = vrot.slane %v3560_v23, 1  ;;  %v3587_v61 = vrot.slane %v3561_v22, 1  ;;  %v3588_v10 = vrot.slane %v3562_v43, 1 }
 0x2dc   : > { %v3590_v29 = vrot.slane %v3563_v57, 1  ;;  %v3591_v46 = vrot.slane %v3564_v42, 1  ;;  %v3583_v41 = vsel %vm888_vm0, %v3581_v16, %v3582_v58  ;;  %v3593_v48 = vrot.slane %v3565_v5, 1 }
 0x2dd   : > { %v3586_v25 = vsel %vm888_vm0, %v3584_v63, %v3585_v32  ;;  %v3594_v6 = vrot.slane %v7473_v62, 1  ;;  %v3552_v7 = vadd.f32 %v3540_v53, %v3527_v45  ;;  %v3589_v24 = vsel %vm888_vm0, %v3587_v61, %v3588_v10 }
 0x2de   : > { %v3596_v36 = vrot.slane %v3567_v8, 1  ;;  %v3597_v54 = vrot.slane %v7479_v56, 1  ;;  %v3553_v31 = vadd.f32 %v3541_v59, %v3528_v0  ;;  %v3554_v33 = vadd.f32 %v3542_v27, %v3529_v11 }
 0x2df   : > { %v3592_v9 = vsel %vm888_vm0, %v3590_v29, %v3591_v46  ;;  %v3595_v60 = vsel %vm888_vm0, %v3593_v48, %v3594_v6  ;;  %v3555_v38 = vadd.f32 %v3543_v28, %v3530_v15  ;;  %v3611_v17 = vadd.f32 %v3583_v41, %v3544_v26 }
 0x2e0   : > { %v3612_v13 = vadd.f32 %v3582_v58, %v3545_v18  ;;  %v3613_v40 = vadd.f32 %v3586_v25, %v3546_v3  ;;  %v3598_v35 = vsel %vm888_vm0, %v3596_v36, %v3597_v54  ;;  %v3614_v12 = vadd.f32 %v3585_v32, %v3547_v30 }
 0x2e1   : > { %v3615_v45 = vadd.f32 %v3589_v24, %v3548_v51  ;;  %v3616_v53 = vadd.f32 %v3588_v10, %v3549_v2  ;;  %v3617_v21 = vadd.f32 %v3592_v9, %v3550_v39  ;;  %v3618_v23 = vadd.f32 %v3591_v46, %v3551_v1 }
 0x2e2   : > { %v3619_v22 = vadd.f32 %v3595_v60, %v3552_v7  ;;  %v3623_v43 = vstv %s7467_s30  ;;  %v3620_v5 = vadd.f32 %v3594_v6, %v3553_v31  ;;  %v3621_v61 = vadd.f32 %v3598_v35, %v3554_v33 }
 0x2e3   : > { %v3624_v0 = vmul.f32 %v3623_v43, %v7233_v20  ;;  %v3625_v11 = vmul.f32 %v3623_v43, %v7235_v52  ;;  %v3626_v59 = vmul.f32 %v3623_v43, %v7237_v47  ;;  %v3627_v15 = vmul.f32 %v3623_v43, %v7239_v44 }
 0x2e4   : > { %v3628_v27 = vmul.f32 %v3623_v43, %v7241_v34  ;;  %v3629_v28 = vmul.f32 %v3623_v43, %v7243_v14  ;;  %v3630_v26 = vmul.f32 %v3623_v43, %v7245_v4  ;;  %v3631_v18 = vmul.f32 %v3623_v43, %v7247_v50 }
 0x2e5   : > { %v3632_v3 = vmul.f32 %v3623_v43, %v7249_v37  ;;  %v3633_v30 = vmul.f32 %v3623_v43, %v7251_v19  ;;  %v3634_v20 = vmul.f32 %v3623_v43, %v7358_v55  ;;  %v3635_v52 = vmul.f32 %v3623_v43, %v7361_v49 }
 0x2e6   : > { %v3648_v51 = vrot.slane %v3624_v0, 2  ;;  %v3649_v47 = vrot.slane %v3625_v11, 2  ;;  %v3651_v2 = vrot.slane %v3626_v59, 2  ;;  %v3652_v44 = vrot.slane %v3627_v15, 2 }
 0x2e7   : > { %v3654_v39 = vrot.slane %v3628_v27, 2  ;;  %v3655_v34 = vrot.slane %v3629_v28, 2  ;;  %v3657_v1 = vrot.slane %v3630_v26, 2  ;;  %v3658_v14 = vrot.slane %v3631_v18, 2 }
 0x2e8   : > { %v3650_v4 = vsel %vm956_vm1, %v3648_v51, %v3649_v47  ;;  %v3653_v50 = vsel %vm956_vm1, %v3651_v2, %v3652_v44  ;;  %v3660_v57 = vrot.slane %v3632_v3, 2  ;;  %v3661_v37 = vrot.slane %v3633_v30, 2 }
 0x2e9   : > { %v3656_v19 = vsel %vm956_vm1, %v3654_v39, %v3655_v34  ;;  %v3659_v55 = vsel %vm956_vm1, %v3657_v1, %v3658_v14  ;;  %v3663_v42 = vrot.slane %v3634_v20, 2  ;;  %v3664_v49 = vrot.slane %v3635_v52, 2 }
 0x2ea   : > { %v3678_v62 = vadd.f32 %v3650_v4, %v3611_v17  ;;  %v3679_v8 = vadd.f32 %v3649_v47, %v3612_v13  ;;  %v3680_v56 = vadd.f32 %v3653_v50, %v3613_v40  ;;  %v3662_v16 = vsel %vm956_vm1, %v3660_v57, %v3661_v37 }
 0x2eb   : > { %v3681_v58 = vadd.f32 %v3652_v44, %v3614_v12  ;;  %v3682_v63 = vadd.f32 %v3656_v19, %v3615_v45  ;;  %v3683_v32 = vadd.f32 %v3655_v34, %v3616_v53  ;;  %v3622_v10 = vadd.f32 %v3597_v54, %v3555_v38 }
 0x2ec   : > { %v3684_v29 = vadd.f32 %v3659_v55, %v3617_v21  ;;  %v3665_v46 = vsel %vm956_vm1, %v3663_v42, %v3664_v49  ;;  %v3685_v41 = vadd.f32 %v3658_v14, %v3618_v23  ;;  %v3690_v25 = vsub.f32 0.0, %v3678_v62 }
 0x2ed   : > { %v3691_v48 = vsub.f32 0.0, %v3679_v8  ;;  %v3686_v7 = vadd.f32 %v3662_v16, %v3619_v22  ;;  %v3692_v24 = vsub.f32 0.0, %v3680_v56  ;;  %v3693_v36 = vsub.f32 0.0, %v3681_v58 }
 0x2ee   : > { %v3694_v6 = vsub.f32 0.0, %v3682_v63  ;;  %v3687_v31 = vadd.f32 %v3661_v37, %v3620_v5  ;;  %v3695_v9 = vsub.f32 0.0, %v3683_v32  ;;  %v3688_v60 = vadd.f32 %v3665_v46, %v3621_v61 }
 0x2ef   : > { %v3696_v17 = vsub.f32 0.0, %v3684_v29  ;;  %v3702_v13 = vmul.f32 1.442695, %v3690_v25  ;;  %v3704_v40 = vmul.f32 1.442695, %v3691_v48  ;;  %v3689_v12 = vadd.f32 %v3664_v49, %v3622_v10 }
 0x2f0   : > { %v3697_v45 = vsub.f32 0.0, %v3685_v41  ;;  %v3706_v33 = vmul.f32 1.442695, %v3692_v24  ;;  %v3708_v54 = vmul.f32 1.442695, %v3693_v36  ;;  %v3698_v38 = vsub.f32 0.0, %v3686_v7 }
 0x2f1   : > { %4184 = vpow2.f32 %v3702_v13  ;;  %v3710_v35 = vmul.f32 1.442695, %v3694_v6  ;;  %v3699_v53 = vsub.f32 0.0, %v3687_v31  ;;  %v3712_v21 = vmul.f32 1.442695, %v3695_v9 }
 0x2f2   : > { %4186 = vpow2.f32 %v3704_v40  ;;  %v3700_v23 = vsub.f32 0.0, %v3688_v60  ;;  %v3714_v22 = vmul.f32 1.442695, %v3696_v17  ;;  %v3701_v43 = vsub.f32 0.0, %v3689_v12 }
 0x2f3   : > { %4188 = vpow2.f32 %v3706_v33  ;;  %v3716_v0 = vmul.f32 1.442695, %v3697_v45  ;;  %v3718_v11 = vmul.f32 1.442695, %v3698_v38  ;;  %v3720_v59 = vmul.f32 1.442695, %v3699_v53 }
 0x2f4   : > { %4190 = vpow2.f32 %v3708_v54  ;;  %v3722_v15 = vmul.f32 1.442695, %v3700_v23  ;;  %v3724_v27 = vmul.f32 1.442695, %v3701_v43 }
 0x2f5   : > { %4192 = vpow2.f32 %v3710_v35 }
 0x2f6   : > { %4194 = vpow2.f32 %v3712_v21 }
 0x2f7   : > { %4196 = vpow2.f32 %v3714_v22 }
 0x2f8   : > { %4198 = vpow2.f32 %v3716_v0 }
 0x2f9   : > { %4200 = vpow2.f32 %v3718_v11 }
 0x2fa   : > { %4202 = vpow2.f32 %v3720_v59 }
 0x2fb   : > { %v4185_v28 = vpop.eup %4184  ;;  %4204 = vpow2.f32 %v3722_v15 }
 0x2fc   : > { %v4187_v26 = vpop.eup %4186  ;;  %4206 = vpow2.f32 %v3724_v27  ;;  %v3726_v18 = vadd.f32 1.0, %v4185_v28 }
 0x2fd   : > { %v4189_v3 = vpop.eup %4188  ;;  %v3727_v30 = vadd.f32 1.0, %v4187_v26 }
 0x2fe   : > { %v4191_v20 = vpop.eup %4190  ;;  %v3728_v52 = vadd.f32 1.0, %v4189_v3  ;;  %4208 = vrcp.f32 %v3726_v18 }
 0x2ff   : > { %v4193_v51 = vpop.eup %4192  ;;  %v3729_v47 = vadd.f32 1.0, %v4191_v20  ;;  %4210 = vrcp.f32 %v3727_v30 }
 0x300   : > { %v4195_v2 = vpop.eup %4194  ;;  %v3730_v44 = vadd.f32 1.0, %v4193_v51  ;;  %4212 = vrcp.f32 %v3728_v52 }
 0x301   : > { %v4197_v39 = vpop.eup %4196  ;;  %v3731_v34 = vadd.f32 1.0, %v4195_v2  ;;  %4214 = vrcp.f32 %v3729_v47 }
 0x302   : > { %v4199_v1 = vpop.eup %4198  ;;  %v3732_v14 = vadd.f32 1.0, %v4197_v39  ;;  %4216 = vrcp.f32 %v3730_v44 }
 0x303   : > { %v4201_v4 = vpop.eup %4200  ;;  %v3733_v50 = vadd.f32 1.0, %v4199_v1  ;;  %4218 = vrcp.f32 %v3731_v34 }
 0x304   : > { %v4203_v57 = vpop.eup %4202  ;;  %v3734_v37 = vadd.f32 1.0, %v4201_v4  ;;  %4220 = vrcp.f32 %v3732_v14 }
 0x305   : > { %v4205_v19 = vpop.eup %4204  ;;  %v3735_v55 = vadd.f32 1.0, %v4203_v57  ;;  %4222 = vrcp.f32 %v3733_v50 }
 0x306   : > { %v4207_v42 = vpop.eup %4206  ;;  %v3736_v49 = vadd.f32 1.0, %v4205_v19  ;;  %4224 = vrcp.f32 %v3734_v37 }
 0x307   : > { %v3737_v5 = vadd.f32 1.0, %v4207_v42  ;;  %4226 = vrcp.f32 %v3735_v55 }
 0x308   : > { %v4209_v62 = vpop.eup %4208  ;;  %4228 = vrcp.f32 %v3736_v49 }
 0x309   : > { %v4211_v8 = vpop.eup %4210  ;;  %4230 = vrcp.f32 %v3737_v5  ;;  %v3750_v56 = vmul.f32 %v4209_v62, %v3726_v18 }
 0x30a   : > { %v4213_v16 = vpop.eup %4212  ;;  %v3751_v58 = vmul.f32 %v4211_v8, %v3727_v30 }
 0x30b   : > { %v4215_v63 = vpop.eup %4214  ;;  %v3752_v32 = vmul.f32 %v4213_v16, %v3728_v52  ;;  %v3762_v61 = vsub.f32 2.0, %v3750_v56 }
 0x30c   : > { %v4217_v10 = vpop.eup %4216  ;;  %v3753_v29 = vmul.f32 %v4215_v63, %v3729_v47  ;;  %v3763_v46 = vsub.f32 2.0, %v3751_v58 }
 0x30d   : > { %v4219_v41 = vpop.eup %4218  ;;  %v3754_v25 = vmul.f32 %v4217_v10, %v3730_v44  ;;  %v3764_v48 = vsub.f32 2.0, %v3752_v32  ;;  %v3774_v7 = vmul.f32 %v4209_v62, %v3762_v61 }
 0x30e   : > { %v4221_v24 = vpop.eup %4220  ;;  %v3755_v36 = vmul.f32 %v4219_v41, %v3731_v34  ;;  %v3765_v6 = vsub.f32 2.0, %v3753_v29  ;;  %v3775_v31 = vmul.f32 %v4211_v8, %v3763_v46 }
 0x30f   : > { %v4223_v9 = vpop.eup %4222  ;;  %v3756_v60 = vmul.f32 %v4221_v24, %v3732_v14  ;;  %v3766_v17 = vsub.f32 2.0, %v3754_v25  ;;  %v3776_v13 = vmul.f32 %v4213_v16, %v3764_v48  ;;  %3786 = vst [vmem:[%s7512_s9] sm:$0xff] %v3774_v7 }
 0x310   : > { %v4225_v40 = vpop.eup %4224  ;;  %v3757_v12 = vmul.f32 %v4223_v9, %v3733_v50  ;;  %v3767_v45 = vsub.f32 2.0, %v3755_v36  ;;  %v3777_v33 = vmul.f32 %v4215_v63, %v3765_v6  ;;  %3787 = vst [vmem:[%s7512_s9 + $0x8] sm:$0xf] %v3775_v31 }
 0x311   : > { %v4227_v54 = vpop.eup %4226  ;;  %v3758_v38 = vmul.f32 %v4225_v40, %v3734_v37  ;;  %v3768_v35 = vsub.f32 2.0, %v3756_v60  ;;  %v3778_v53 = vmul.f32 %v4217_v10, %v3766_v17  ;;  %3788 = vst [vmem:[%s7512_s9 + $0x10] sm:$0xff] %v3776_v13 }
 0x312   : > { %v4229_v21 = vpop.eup %4228  ;;  %v3759_v23 = vmul.f32 %v4227_v54, %v3735_v55  ;;  %v3769_v22 = vsub.f32 2.0, %v3757_v12  ;;  %v3779_v43 = vmul.f32 %v4219_v41, %v3767_v45  ;;  %3789 = vst [vmem:[%s7512_s9 + $0x18] sm:$0xf] %v3777_v33 }
 0x313   : > { %v4231_v0 = vpop.eup %4230  ;;  %v3760_v11 = vmul.f32 %v4229_v21, %v3736_v49  ;;  %v3770_v59 = vsub.f32 2.0, %v3758_v38  ;;  %v3780_v15 = vmul.f32 %v4221_v24, %v3768_v35  ;;  %3790 = vst [vmem:[%s7512_s9 + $0x20] sm:$0xff] %v3778_v53 }
 0x314   : > { %v3761_v27 = vmul.f32 %v4231_v0, %v3737_v5  ;;  %v3771_v28 = vsub.f32 2.0, %v3759_v23  ;;  %v3781_v26 = vmul.f32 %v4223_v9, %v3769_v22  ;;  %3791 = vst [vmem:[%s7512_s9 + $0x28] sm:$0xf] %v3779_v43 }
 0x315   : > { %v3772_v18 = vsub.f32 2.0, %v3760_v11  ;;  %v3782_v3 = vmul.f32 %v4225_v40, %v3770_v59  ;;  %3792 = vst [vmem:[%s7512_s9 + $0x30] sm:$0xff] %v3780_v15 }
 0x316   : > { %v3773_v30 = vsub.f32 2.0, %v3761_v27  ;;  %v3783_v20 = vmul.f32 %v4227_v54, %v3771_v28  ;;  %3793 = vst [vmem:[%s7512_s9 + $0x38] sm:$0xf] %v3781_v26 }
 0x317   : > { %v3784_v52 = vmul.f32 %v4229_v21, %v3772_v18  ;;  %3794 = vst [vmem:[%s7512_s9 + $0x40] sm:$0xff] %v3782_v3 }
 0x318   : > { %v3785_v51 = vmul.f32 %v4231_v0, %v3773_v30  ;;  %3795 = vst [vmem:[%s7512_s9 + $0x48] sm:$0xf] %v3783_v20 }
 0x319   : > { %3796 = vst [vmem:[%s7512_s9 + $0x50] sm:$0xff] %v3784_v52 }
 0x31a   : > { %3797 = vst [vmem:[%s7512_s9 + $0x58] sm:$0xf] %v3785_v51 }
 0x31b PF: > { %s19_s22 = sadd.s32 1, %s4645_s22   ;;  %s7796_s20 = smov %s4641_s21 }
 0x31c   : > { %p16_p8 = scmp.ge.s32.totalorder %s19_s22, 4   ;;  %s7797_s21 = smov %s7799_s28 }
 0x31e   :  { %18 = sbr.rel (!%p16_p8) target bundleno = 6 (0x6), region = 89 }
 0x325   :  { %3830 = vsyncpa [#allocation4], 1 }
 0x326   :  { %3832 = vsyncpa [#allocation4 + $0x1], 1 }
 0x327   :  { %3833 = vsyncpa [#allocation5], 1 }
 0x328   :  { %3835 = vsyncpa [#allocation5 + $0x1], 1 }
 0x329   :  { %3836 = vsyncpa [#allocation7], 1 }

</bundles_post_ra>
